<compile_context>
chip_gen: v5e
topology: v5e:2x2
jax: 0.10.0
libtpu: 0.0.40
codegen_flags: <defaults>
</compile_context>

<pallas_src>
import math

import jax
import jax.numpy as jnp
from jax import lax
from jax.experimental import pallas as pl
from jax.experimental.pallas import tpu as pltpu

IN_FEATURES = 300 * 200   # 60000
HIDDEN = 5
OUT = 3

# Tile sizes: tile_k must be a multiple of 128 (lane axis), tile_b of 8 (sublane).
DEFAULT_TILE_B = 512      # ~43 MiB double-buffered f32 footprint -> fits v7x 64 MiB
DEFAULT_TILE_K = 8576     # 67 * 128; Kp = 60032 -> 7 K tiles, only 32 pad columns


def _round_up(n, m):
    return ((n + m - 1) // m) * m


def _mlp_softmax_kernel(x_ref, w1_ref, b1_ref, w2_ref, b2_ref, o_ref, acc_ref):
    # x_ref : (TB, TK)  input dtype     w1_ref: (TK, 5) f32 (zero-padded rows)
    # b1_ref: (1, 5)   f32              w2_ref: (5, 3)  f32     b2_ref: (1, 3) f32
    # o_ref : (TB, 3)  f32              acc_ref: (TB, 5) f32 scratch (hidden acc)
    k = pl.program_id(1)
    tk = x_ref.shape[1]

    @pl.when(k == 0)
    def _():
        acc_ref[...] = jnp.zeros_like(acc_ref)

    # Mask the out-of-bounds tail columns of the ragged last K tile.  Edge-block
    # OOB data is arbitrary garbage (possibly NaN/Inf); zero rows in w1 are not
    # enough because NaN * 0 = NaN.  VPU select is free (kernel is DMA-bound).
    xv = x_ref[...].astype(jnp.float32)
    col = lax.broadcasted_iota(jnp.int32, (1, tk), 1)
    valid = IN_FEATURES - k * tk          # >= tk on every step but the last
    xv = jnp.where(col < valid, xv, 0.0)

    # layer1 partial product over this K tile (f32 accumulation).
    acc_ref[...] += jnp.dot(xv, w1_ref[...], preferred_element_type=jnp.float32)

    @pl.when(k == pl.num_programs(1) - 1)
    def _():
        # bias + ReLU
        h = jnp.maximum(acc_ref[...] + b1_ref[...], 0.0)

        # layer2: (TB,5) @ (5,3) + b2 (tiny, epilogue-only)
        logits = lax.dot_general(
            h, w2_ref[...],
            dimension_numbers=(((1,), (0,)), ((), ())),
            preferred_element_type=jnp.float32,
        ) + b2_ref[...]

        # numerically-stable softmax over dim=1 (exact division for parity).
        m = jnp.max(logits, axis=1, keepdims=True)
        e = jnp.exp(logits - m)
        o_ref[...] = e / jnp.sum(e, axis=1, keepdims=True)


def nn_model_forward(x, w1_t, b1, w2_t, b2, *,
                     tile_b=DEFAULT_TILE_B, tile_k=DEFAULT_TILE_K):
    """Forward pass.

    x    : any shape flattening to (-1, 60000); streamed as-is (f32 or bf16)
    w1_t : (60000, 5)  (PyTorch layer1.weight.T)
    b1   : (1, 5)
    w2_t : (5, 3)      (PyTorch layer2.weight.T)
    b2   : (1, 3)
    returns (B, 3) softmax probabilities (f32).
    """
    x2d = x.reshape(-1, IN_FEATURES)
    B = x2d.shape[0]

    # Batch tile: multiple of 8 (sublane), no host padding of x.  Capped at
    # ~ceil(B/2) so there are >=2 batch blocks when the batch allows it
    # (both v7x TensorCores busy); tiny batches get a single small block.
    TB = min(tile_b, max(8, _round_up(pl.cdiv(B, 2), 8)))
    num_b = pl.cdiv(B, TB)

    Kp = _round_up(IN_FEATURES, tile_k)
    num_k = Kp // tile_k

    # Host-side prep: only the small operands are touched (w1 is ~1.2 MB).
    w1_p = jnp.pad(w1_t.astype(jnp.float32), ((0, Kp - IN_FEATURES), (0, 0)))
    b1_f = b1.astype(jnp.float32).reshape(1, HIDDEN)
    w2_f = w2_t.astype(jnp.float32)
    b2_f = b2.astype(jnp.float32).reshape(1, OUT)

    out = pl.pallas_call(
        _mlp_softmax_kernel,
        out_shape=jax.ShapeDtypeStruct((B, OUT), jnp.float32),
        grid_spec=pltpu.PrefetchScalarGridSpec(
            num_scalar_prefetch=0,
            grid=(num_b, num_k),
            in_specs=[
                pl.BlockSpec((TB, tile_k), lambda i, k: (i, k)),      # x
                pl.BlockSpec((tile_k, HIDDEN), lambda i, k: (k, 0)),  # w1_t
                pl.BlockSpec((1, HIDDEN), lambda i, k: (0, 0)),       # b1
                pl.BlockSpec((HIDDEN, OUT), lambda i, k: (0, 0)),     # w2_t
                pl.BlockSpec((1, OUT), lambda i, k: (0, 0)),          # b2
            ],
            out_specs=pl.BlockSpec((TB, OUT), lambda i, k: (i, 0)),
            scratch_shapes=[pltpu.VMEM((TB, HIDDEN), jnp.float32)],
        ),
        compiler_params=pltpu.CompilerParams(
            dimension_semantics=("parallel", "arbitrary"),
            vmem_limit_bytes=56 << 20,   # under v7x's 64 MiB/TC; fine on v5e/v6e
        ),
    )(x2d, w1_p, b1_f, w2_f, b2_f)

    return out


def init_params(key):
    """Deterministic params mirroring the PyTorch module, stored pre-transposed.

    Weights: xavier_uniform_ (as in NNModel.init_weights), stored as (in, out).
    Biases : PyTorch Linear default U(-1/sqrt(fan_in), 1/sqrt(fan_in)).
    """
    k1, k2, k3, k4 = jax.random.split(key, 4)

    def xavier_uniform_t(k, fan_out, fan_in):  # returns (fan_in, fan_out)
        bound = math.sqrt(6.0 / (fan_in + fan_out))
        return jax.random.uniform(k, (fan_in, fan_out), jnp.float32, -bound, bound)

    w1_t = xavier_uniform_t(k1, HIDDEN, IN_FEATURES)   # (60000, 5)
    w2_t = xavier_uniform_t(k2, OUT, HIDDEN)           # (5, 3)
    b1 = jax.random.uniform(
        k3, (1, HIDDEN), jnp.float32,
        -1.0 / math.sqrt(IN_FEATURES), 1.0 / math.sqrt(IN_FEATURES))
    b2 = jax.random.uniform(
        k4, (1, OUT), jnp.float32,
        -1.0 / math.sqrt(HIDDEN), 1.0 / math.sqrt(HIDDEN))
    return w1_t, b1, w2_t, b2


if __name__ == "__main__":
    key = jax.random.PRNGKey(0)
    kx, kp = jax.random.split(key)

    # Input consistent with forward's view(-1, 300*200): batch of 2 "images".
    x = jax.random.normal(kx, (2, 300, 200), dtype=jnp.float32)
    w1_t, b1, w2_t, b2 = init_params(kp)

    out = nn_model_forward(x, w1_t, b1, w2_t, b2)
    out = jax.block_until_ready(out)

    # Pure-JAX f32 reference (kernel is now fully f32, so tolerance is tight).
    x2d = x.reshape(-1, IN_FEATURES)
    h_ref = jnp.maximum(
        jnp.dot(x2d, w1_t, precision=lax.Precision.HIGHEST) + b1, 0.0)
    ref = jax.nn.softmax(
        jnp.dot(h_ref, w2_t, precision=lax.Precision.HIGHEST) + b2, axis=1)

    assert out.shape == (2, 3)
    assert jnp.allclose(jnp.sum(out, axis=1), 1.0, atol=1e-3)
    assert jnp.allclose(out, ref, atol=2e-3), float(jnp.max(jnp.abs(out - ref)))

    print("KERNEL_OK")
</pallas_src>

<mosaic_0001>
module attributes {stable_mosaic.version = 11 : i64} {
  func.func @_mlp_softmax_kernel(%arg0: i32, %arg1: i32, %arg2: memref<8x8576xf32, #tpu.memory_space<vmem>>, %arg3: memref<8576x5xf32, #tpu.memory_space<vmem>>, %arg4: memref<1x5xf32, #tpu.memory_space<vmem>>, %arg5: memref<5x3xf32, #tpu.memory_space<vmem>>, %arg6: memref<1x3xf32, #tpu.memory_space<vmem>>, %arg7: memref<8x3xf32, #tpu.memory_space<vmem>>, %arg8: memref<8x5xf32, #tpu.memory_space<vmem>>) attributes {dimension_semantics = [#tpu.dimension_semantics<parallel>, #tpu.dimension_semantics<arbitrary>], iteration_bounds = array<i64: 1, 7>, scalar_prefetch = 0 : i64, scratch_operands = 1 : i64, tpu.core_type = #tpu.core_type<tc>, window_params = [{transform_indices = @transform_0, window_bounds = array<i64: 8, 8576>}, {transform_indices = @transform_1, window_bounds = array<i64: 8576, 5>}, {pipeline_mode = #tpu.pipeline_mode<synchronous>, transform_indices = @transform_2, window_bounds = array<i64: 1, 5>}, {pipeline_mode = #tpu.pipeline_mode<synchronous>, transform_indices = @transform_3, window_bounds = array<i64: 5, 3>}, {pipeline_mode = #tpu.pipeline_mode<synchronous>, transform_indices = @transform_4, window_bounds = array<i64: 1, 3>}, {transform_indices = @transform_5, window_bounds = array<i64: 8, 3>}]} {
    %c0_i32 = arith.constant 0 : i32
    %0 = arith.cmpi eq, %arg1, %c0_i32 : i32
    %1 = arith.extui %0 : i1 to i32
    %c0_i32_0 = arith.constant 0 : i32
    %2 = arith.cmpi ne, %1, %c0_i32_0 : i32
    scf.if %2 {
      %cst_10 = arith.constant 0.000000e+00 : f32
      %21 = vector.broadcast %cst_10 : f32 to vector<8x5xf32>
      %c0_11 = arith.constant 0 : index
      %c0_12 = arith.constant 0 : index
      %22 = vector.load %arg8[%c0_11, %c0_12] : memref<8x5xf32, #tpu.memory_space<vmem>>, vector<8x5xf32>
      tpu.vector_store %arg8[%c0_11, %c0_12], %21 {strides = array<i32>} : memref<8x5xf32, #tpu.memory_space<vmem>>, vector<8x5xf32>,
    } else {
    }
    %c0 = arith.constant 0 : index
    %c0_1 = arith.constant 0 : index
    %3 = vector.load %arg2[%c0, %c0_1] : memref<8x8576xf32, #tpu.memory_space<vmem>>, vector<8x8576xf32>
    %4 = tpu.iota {dimensions = array<i32: 1>} : vector<1x8576xi32>
    %c8576_i32 = arith.constant 8576 : i32
    %5 = arith.muli %arg1, %c8576_i32 : i32
    %c60000_i32 = arith.constant 60000 : i32
    %6 = arith.subi %c60000_i32, %5 : i32
    %7 = vector.broadcast %6 : i32 to vector<1x8576xi32>
    %8 = arith.cmpi slt, %4, %7 : vector<1x8576xi32>
    %cst = arith.constant 0.000000e+00 : f32
    %9 = vector.shape_cast %8 : vector<1x8576xi1> to vector<1x8576xi1>
    %10 = vector.broadcast %9 : vector<1x8576xi1> to vector<8x8576xi1>
    %11 = vector.broadcast %cst : f32 to vector<8x8576xf32>
    %12 = arith.select %10, %3, %11 : vector<8x8576xi1>, vector<8x8576xf32>
    %c0_2 = arith.constant 0 : index
    %c0_3 = arith.constant 0 : index
    %13 = vector.load %arg8[%c0_2, %c0_3] : memref<8x5xf32, #tpu.memory_space<vmem>>, vector<8x5xf32>
    %c0_4 = arith.constant 0 : index
    %c0_5 = arith.constant 0 : index
    %14 = vector.load %arg3[%c0_4, %c0_5] : memref<8576x5xf32, #tpu.memory_space<vmem>>, vector<8576x5xf32>
    %cst_6 = arith.constant dense<0.000000e+00> : vector<8x5xf32>
    %15 = tpu.matmul %12, %14, %cst_6 {dimension_numbers = #tpu.dot_dimension_numbers<[1], [0], [0], [1], [0, 0, 1, 1], [], []>} : vector<8x8576xf32>, vector<8576x5xf32>, vector<8x5xf32> -> vector<8x5xf32>
    %16 = arith.addf %13, %15 : vector<8x5xf32>
    %c0_7 = arith.constant 0 : index
    %c0_8 = arith.constant 0 : index
    %17 = vector.load %arg8[%c0_7, %c0_8] : memref<8x5xf32, #tpu.memory_space<vmem>>, vector<8x5xf32>
    tpu.vector_store %arg8[%c0_7, %c0_8], %16 {strides = array<i32>} : memref<8x5xf32, #tpu.memory_space<vmem>>, vector<8x5xf32>,
    %c6_i32 = arith.constant 6 : i32
    %18 = arith.cmpi eq, %arg1, %c6_i32 : i32
    %19 = arith.extui %18 : i1 to i32
    %c0_i32_9 = arith.constant 0 : i32
    %20 = arith.cmpi ne, %19, %c0_i32_9 : i32
    scf.if %20 {
      %c0_10 = arith.constant 0 : index
      %c0_11 = arith.constant 0 : index
      %21 = vector.load %arg8[%c0_10, %c0_11] : memref<8x5xf32, #tpu.memory_space<vmem>>, vector<8x5xf32>
      %c0_12 = arith.constant 0 : index
      %c0_13 = arith.constant 0 : index
      %22 = vector.load %arg4[%c0_12, %c0_13] : memref<1x5xf32, #tpu.memory_space<vmem>>, vector<1x5xf32>
      %23 = vector.broadcast %22 : vector<1x5xf32> to vector<8x5xf32>
      %24 = arith.addf %21, %23 : vector<8x5xf32>
      %cst_14 = arith.constant 0.000000e+00 : f32
      %25 = vector.broadcast %cst_14 : f32 to vector<8x5xf32>
      %26 = arith.maximumf %24, %25 : vector<8x5xf32>
      %c0_15 = arith.constant 0 : index
      %c0_16 = arith.constant 0 : index
      %27 = vector.load %arg5[%c0_15, %c0_16] : memref<5x3xf32, #tpu.memory_space<vmem>>, vector<5x3xf32>
      %cst_17 = arith.constant dense<0.000000e+00> : vector<8x3xf32>
      %28 = tpu.matmul %26, %27, %cst_17 {dimension_numbers = #tpu.dot_dimension_numbers<[1], [0], [0], [1], [0, 0, 1, 1], [], []>} : vector<8x5xf32>, vector<5x3xf32>, vector<8x3xf32> -> vector<8x3xf32>
      %c0_18 = arith.constant 0 : index
      %c0_19 = arith.constant 0 : index
      %29 = vector.load %arg6[%c0_18, %c0_19] : memref<1x3xf32, #tpu.memory_space<vmem>>, vector<1x3xf32>
      %30 = vector.broadcast %29 : vector<1x3xf32> to vector<8x3xf32>
      %31 = arith.addf %28, %30 : vector<8x3xf32>
      %cst_20 = arith.constant dense<0xFF800000> : vector<8xf32>
      %32 = vector.multi_reduction <maximumf>, %31, %cst_20 [1] : vector<8x3xf32> to vector<8xf32>
      %33 = vector.shape_cast %32 : vector<8xf32> to vector<8x1xf32>
      %34 = vector.broadcast %33 : vector<8x1xf32> to vector<8x3xf32>
      %35 = arith.subf %31, %34 : vector<8x3xf32>
      %36 = math.exp %35 : vector<8x3xf32>
      %cst_21 = arith.constant dense<0.000000e+00> : vector<8xf32>
      %37 = vector.multi_reduction <add>, %36, %cst_21 [1] : vector<8x3xf32> to vector<8xf32>
      %38 = vector.shape_cast %37 : vector<8xf32> to vector<8x1xf32>
      %39 = vector.broadcast %38 : vector<8x1xf32> to vector<8x3xf32>
      %40 = arith.divf %36, %39 : vector<8x3xf32>
      %c0_22 = arith.constant 0 : index
      %c0_23 = arith.constant 0 : index
      %41 = vector.load %arg7[%c0_22, %c0_23] : memref<8x3xf32, #tpu.memory_space<vmem>>, vector<8x3xf32>
      tpu.vector_store %arg7[%c0_22, %c0_23], %40 {strides = array<i32>} : memref<8x3xf32, #tpu.memory_space<vmem>>, vector<8x3xf32>,
    } else {
    }
    return
  }
  func.func @transform_0(%arg0: i32, %arg1: i32) -> (i32, i32) {
    %c0_i32 = arith.constant 0 : i32
    return %arg0, %arg1 : i32, i32
  }
  func.func @transform_1(%arg0: i32, %arg1: i32) -> (i32, i32) {
    %c0_i32 = arith.constant 0 : i32
    %c0_i32_0 = arith.constant 0 : i32
    return %arg1, %c0_i32 : i32, i32
  }
  func.func @transform_2(%arg0: i32, %arg1: i32) -> (i32, i32) {
    %c0_i32 = arith.constant 0 : i32
    %c0_i32_0 = arith.constant 0 : i32
    %c0_i32_1 = arith.constant 0 : i32
    return %c0_i32, %c0_i32_0 : i32, i32
  }
  func.func @transform_3(%arg0: i32, %arg1: i32) -> (i32, i32) {
    %c0_i32 = arith.constant 0 : i32
    %c0_i32_0 = arith.constant 0 : i32
    %c0_i32_1 = arith.constant 0 : i32
    return %c0_i32, %c0_i32_0 : i32, i32
  }
  func.func @transform_4(%arg0: i32, %arg1: i32) -> (i32, i32) {
    %c0_i32 = arith.constant 0 : i32
    %c0_i32_0 = arith.constant 0 : i32
    %c0_i32_1 = arith.constant 0 : i32
    return %c0_i32, %c0_i32_0 : i32, i32
  }
  func.func @transform_5(%arg0: i32, %arg1: i32) -> (i32, i32) {
    %c0_i32 = arith.constant 0 : i32
    %c0_i32_0 = arith.constant 0 : i32
    return %arg0, %c0_i32 : i32, i32
  }
}

</mosaic_0001>

<bundles_post_ra>
// kernel: tpu_custom_call.1
= control target key start
LH: loop header
LB: loop body
LE: loop exit
PB: predicated region body
PF: predicated region fallthrough
CT: control target
= control target key end

     0   :  { %10 = vsyncpa [#allocation5], 0  ;;  %s3996_s18 = smov 0   ;;  %s3998_s19 = smov 0   ;;  %s5424_s0 = inlined_call_operand.vmem [shape: f32[2,60000], index: 0, kind: input, shape index: {}]   ;;  %s5425_s1 = inlined_call_operand.vmem [shape: f32[60032,5], index: 1, kind: input, shape index: {}]   ;;  %s5426_s2 = inlined_call_operand.vmem [shape: f32[1,5], index: 2, kind: input, shape index: {}]   ;;  %s5427_s3 = inlined_call_operand.vmem [shape: f32[5,3], index: 3, kind: input, shape index: {}]   ;;  %s5428_s4 = inlined_call_operand.vmem [shape: f32[1,3], index: 4, kind: input, shape index: {}]   ;;  %s5429_s5 = inlined_call_operand.hbm [shape: f32[2,3], index: 5, kind: output, shape index: {}]  }
   0x1   :  { %s4000_s20 = smov 0   ;;  %s4002_s21 = smov 0  }
   0x2   :  { %s4004_s22 = smov 0  }
   0x3 LB: > { %s3645_s23 = sadd.s32 4294967295, %s3944_s22   ;;  %s25_s24 = sadd.s32 1, %s3940_s21  ;;  %s3944_s22 = sphi %s4004_s22, %s16_s22   ;;  %s3940_s21 = sphi %s4002_s21, %s5433_s21   ;;  %s3936_s20 = sphi %s4000_s20, %s5432_s20   ;;  %s3932_s19 = sphi %s3998_s19, %s5431_s19   ;;  %s3928_s18 = sphi %s3996_s18, %s5430_s18  }
   0x4   : > { %p26_p0 = scmp.ge.s32.totalorder %s25_s24, 7  ;;  %p44_p1 = scmp.ne.s32.totalorder %s3932_s19, %s3928_s18 }
   0x5   : > { %p45_p2 = scmp.eq.s32.totalorder %s3944_s22, 0  ;;  %s37_s26 = sadd.s32 1, %s3932_s19 }
   0x6   : > { %s5435_s24 = smov (%p26_p0, %s25_s24), 0  ;;  %p3647_p5 = scmp.ge.s32.totalorder %s3944_s22, 7 }
   0x7   : > { %p46_p3 = por %p45_p2, %p44_p1  ;;  %s33_s25 = ssub.s32 %s3940_s21, %s5435_s24 }
   0x8   : > { %p35_p4 = scmp.eq.s32.totalorder %s33_s25, 0  ;;  %194 = sbr.rel (%p3647_p5) target bundleno = 44 (0x2c), region = 28 }
   0xa   : > { %s4032_s27 = scalar_select %p35_p4, %s3932_s19, %s37_s26  }
   0xd   : > { %197 = sbr.rel (!%p46_p3) target bundleno = 44 (0x2c), region = 32  ;;  %s199_s28 = sand.u32 (%p46_p3), 1, %s3932_s19  }
   0xe   : > { %s3726_s29 = smul.u32 (%p46_p3), 134, %s3940_s21  ;;  %s4046_s12 = smov (%p46_p3), 0  }
   0xf   : > { %s3727_s30 = smul.u32 (%p46_p3), 536, %s199_s28 }
  0x10   : > { %s4040_s8 = scalar_lea.vmem (%p46_p3), %s5424_s0, %s3726_s29  }
  0x11   : > { %s217_s9 = scalar_lea.vmem (%p46_p3), %s4040_s8, 128   ;;  %s4043_s10 = scalar_lea.vmem (%p46_p3), [#allocation3], %s3727_s30  }
  0x12   : > { %s218_s11 = scalar_lea.vmem %s4043_s10, 128 [#allocation3]  }
  0x13 LB: >> { %v228_v0 = vld [vmem:[%s4040_s8] sm:$0xff]  ;;  %v230_v1 = vld [vmem:[%s4040_s8 + $0x8] sm:$0xff]  ;;  %v232_v2 = vld [vmem:[%s4040_s8 + $0x10] sm:$0xff]  ;;  %s222_s12 = sadd.s32 1, %s3948_s12   ;;  %s3948_s12 = sphi %s4046_s12, %s222_s12  }
  0x14   : >> { %229 = vst [vmem:[%s4043_s10] sm:$0xff] %v228_v0  ;;  %v234_v3 = vld [vmem:[%s4040_s8 + $0x18] sm:$0xff]  ;;  %v236_v4 = vld [vmem:[%s4040_s8 + $0x20] sm:$0xff]  ;;  %v238_v5 = vld [vmem:[%s4040_s8 + $0x28] sm:$0xff]  ;;  %p221_p6 = scmp.ge.s32.totalorder %s222_s12, 1 }
  0x15   : >> { %231 = vst [vmem:[%s4043_s10 + $0x8] sm:$0xff] %v230_v1  ;;  %v240_v6 = vld [vmem:[%s4040_s8 + $0x30] sm:$0xff]  ;;  %v242_v7 = vld [vmem:[%s4040_s8 + $0x38] sm:$0xff]  ;;  %v244_v8 = vld [vmem:[%s4040_s8 + $0x40] sm:$0xff]  ;;  %s3950_s13 = smov (%p221_p6), %s218_s11   ;;  %s3954_s14 = smov (%p221_p6), %s217_s9  }
  0x16   : >> { %233 = vst [vmem:[%s4043_s10 + $0x10] sm:$0xff] %v232_v2  ;;  %v246_v9 = vld [vmem:[%s4040_s8 + $0x48] sm:$0xff]  ;;  %v248_v10 = vld [vmem:[%s4040_s8 + $0x50] sm:$0xff]  ;;  %v250_v11 = vld [vmem:[%s4040_s8 + $0x58] sm:$0xff]  ;;  %s3958_s15 = smov (%p221_p6), 0  }
  0x17   : >> { %235 = vst [vmem:[%s4043_s10 + $0x18] sm:$0xff] %v234_v3  ;;  %v252_v12 = vld [vmem:[%s4040_s8 + $0x60] sm:$0xff]  ;;  %v254_v13 = vld [vmem:[%s4040_s8 + $0x68] sm:$0xff]  ;;  %v256_v14 = vld [vmem:[%s4040_s8 + $0x70] sm:$0xff] }
  0x18   : >> { %237 = vst [vmem:[%s4043_s10 + $0x20] sm:$0xff] %v236_v4  ;;  %v258_v15 = vld [vmem:[%s4040_s8 + $0x78] sm:$0xff] }
  0x19   : >> { %239 = vst [vmem:[%s4043_s10 + $0x28] sm:$0xff] %v238_v5 }
  0x1a   : >> { %241 = vst [vmem:[%s4043_s10 + $0x30] sm:$0xff] %v240_v6 }
  0x1b   : >> { %243 = vst [vmem:[%s4043_s10 + $0x38] sm:$0xff] %v242_v7 }
  0x1c   : >> { %245 = vst [vmem:[%s4043_s10 + $0x40] sm:$0xff] %v244_v8 }
  0x1d   : >> { %247 = vst [vmem:[%s4043_s10 + $0x48] sm:$0xff] %v246_v9 }
  0x1e   : >> { %249 = vst [vmem:[%s4043_s10 + $0x50] sm:$0xff] %v248_v10 }
  0x1f   : >> { %251 = vst [vmem:[%s4043_s10 + $0x58] sm:$0xff] %v250_v11  ;;  %224 = sbr.rel (!%p221_p6) target bundleno = 19 (0x13), region = 119 }
  0x20   : >> { %253 = vst [vmem:[%s4043_s10 + $0x60] sm:$0xff] %v252_v12 }
  0x21   : >> { %255 = vst [vmem:[%s4043_s10 + $0x68] sm:$0xff] %v254_v13 }
  0x22   : >> { %257 = vst [vmem:[%s4043_s10 + $0x70] sm:$0xff] %v256_v14 }
  0x23   : >> { %259 = vst [vmem:[%s4043_s10 + $0x78] sm:$0xff] %v258_v15 }
  0x24 LB: >> { %v278_v16 = vld [vmem:[%s3956_s14] sm:$0x3f]  ;;  %s272_s15 = sadd.s32 1, %s3960_s15   ;;  %s3955_s14 = smov %s217_s9   ;;  %s3960_s15 = sphi %s3958_s15, %s272_s15   ;;  %s3956_s14 = sphi %s3954_s14, %s3955_s14   ;;  %s3952_s13 = sphi %s3950_s13, %s3951_s13  }
  0x25   : >> { %279 = vst [vmem:[%s3952_s13] sm:$0x3f] %v278_v16  ;;  %p271_p7 = scmp.ge.s32.totalorder %s272_s15, 1  ;;  %s3951_s13 = smov %s218_s11  }
  0x27   : > { %274 = sbr.rel (!%p271_p7) target bundleno = 36 (0x24), region = 130 }
  0x2c PF: > { %p3649_p8 = scmp.ge.s32.totalorder %s3944_s22, 1  ;;  %p298_p9 = scmp.lt.s32.totalorder %s3944_s22, 8 }
  0x2e   : > { %p299_p10 = pnand %p3649_p8, %p298_p9 }
  0x2f   : > { %s305_s16 = sand.u32 (!%p299_p10), 1, %s3928_s18   ;;  %s337_s17 = smul.u32 (!%p299_p10), 1072, %s3936_s20 }
  0x30   : > { %302 = sbr.rel (%p299_p10) target bundleno = 1193 (0x4a9), region = 62  ;;  %p3651_p12 = scmp.ne.s32.totalorder (!%p299_p10), %s3936_s20, 0 }
  0x31   : > { %s3728_s25 = smul.u32 (!%p299_p10), 536, %s305_s16  ;;  %p338_p11 = scmp.lt.s32.totalorder (!%p299_p10), %s337_s17, 7503 }
  0x33   : > { %s4103_s6 = scalar_lea.vmem (!%p299_p10), [#allocation3], %s3728_s25 }
  0x35   : > { %s5437_s17 = smov (!%p338_p11, %s337_s17), 7503  ;;  %349 = sbr.rel (%p3651_p12) target bundleno = 60 (0x3c), region = 70 }
  0x36   : > { %s3650_s26 = sshll.u32 %s5437_s17, 3 }
  0x37   : > { %s4101_s30 = scalar_lea.vmem %s5425_s1, %s3650_s26 }
  0x3a   : > { %vm350_vm0 = vcmask 39936   ;;  %v3962_v17 = vmov 0.0  }
  0x3b   : > { %351 = vst.msk [vmem:[#allocation2] sm:$0xff] %vm350_vm0, %v3962_v17 }
  0x3c PF: > { %v1052_v18 = vld [vmem:[%s4101_s30 + $0x78] sm:$0xff]  ;;  %v1051_v20 = vld [vmem:[%s4101_s30 + $0x70] sm:$0xff]  ;;  %v1050_v24 = vld [vmem:[%s4101_s30 + $0x68] sm:$0xff]  ;;  %s488_s18 = smul.u32 8576, %s3936_s20  ;;  %p3719_p13 = scmp.ne.s32.totalorder %s3936_s20, 6 }
  0x3d   : > { %v1084_v19 = vld [vmem:[%s4101_s30 + $0x178] sm:$0xff]  ;;  %2109 = vmatpush.msra.mxu0 %v1052_v18  ;;  %v1083_v22 = vld [vmem:[%s4101_s30 + $0x170] sm:$0xff]  ;;  %v1082_v26 = vld [vmem:[%s4101_s30 + $0x168] sm:$0xff] }
  0x3e   : > { %2149 = vmatpush.msra.mxu2 %v1084_v19  ;;  %v1068_v21 = vld [vmem:[%s4101_s30 + $0xf8] sm:$0xff]  ;;  %v1067_v25 = vld [vmem:[%s4101_s30 + $0xf0] sm:$0xff]  ;;  %v1066_v28 = vld [vmem:[%s4101_s30 + $0xe8] sm:$0xff]  ;;  %s489_s7 = ssub.s32 60000, %s488_s18 }
  0x3f   : > { %v1100_v23 = vld [vmem:[%s4101_s30 + $0x1f8] sm:$0xff]  ;;  %2129 = vmatpush.msra.mxu1 %v1068_v21  ;;  %2110 = vmatpush.msra.mxu0 %v1051_v20  ;;  %v1099_v27 = vld [vmem:[%s4101_s30 + $0x1f0] sm:$0xff]  ;;  %v1049_v29 = vld [vmem:[%s4101_s30 + $0x60] sm:$0xff] }
  0x40   : > { %2169 = vmatpush.msra.mxu3 %v1100_v23  ;;  %2150 = vmatpush.msra.mxu2 %v1083_v22  ;;  %v1081_v30 = vld [vmem:[%s4101_s30 + $0x160] sm:$0xff]  ;;  %v1098_v31 = vld [vmem:[%s4101_s30 + $0x1e8] sm:$0xff]  ;;  %v1048_v34 = vld [vmem:[%s4101_s30 + $0x58] sm:$0xff] }
  0x41   : > { %2130 = vmatpush.msra.mxu1 %v1067_v25  ;;  %2111 = vmatpush.msra.mxu0 %v1050_v24  ;;  %v1065_v32 = vld [vmem:[%s4101_s30 + $0xe0] sm:$0xff]  ;;  %v1080_v35 = vld [vmem:[%s4101_s30 + $0x158] sm:$0xff]  ;;  %v1047_v38 = vld [vmem:[%s4101_s30 + $0x50] sm:$0xff] }
  0x42   : > { %2170 = vmatpush.msra.mxu3 %v1099_v27  ;;  %2151 = vmatpush.msra.mxu2 %v1082_v26  ;;  %v1097_v33 = vld [vmem:[%s4101_s30 + $0x1e0] sm:$0xff]  ;;  %v1064_v36 = vld [vmem:[%s4101_s30 + $0xd8] sm:$0xff]  ;;  %v1079_v39 = vld [vmem:[%s4101_s30 + $0x150] sm:$0xff] }
  0x43   : > { %2131 = vmatpush.msra.mxu1 %v1066_v28  ;;  %2112 = vmatpush.msra.mxu0 %v1049_v29  ;;  %v1096_v37 = vld [vmem:[%s4101_s30 + $0x1d8] sm:$0xff]  ;;  %v1063_v40 = vld [vmem:[%s4101_s30 + $0xd0] sm:$0xff]  ;;  %v1046_v42 = vld [vmem:[%s4101_s30 + $0x48] sm:$0xff] }
  0x44   : > { %2171 = vmatpush.msra.mxu3 %v1098_v31  ;;  %2152 = vmatpush.msra.mxu2 %v1081_v30  ;;  %v1095_v41 = vld [vmem:[%s4101_s30 + $0x1d0] sm:$0xff]  ;;  %v1078_v43 = vld [vmem:[%s4101_s30 + $0x148] sm:$0xff]  ;;  %v1045_v46 = vld [vmem:[%s4101_s30 + $0x40] sm:$0xff] }
  0x45   : > { %2132 = vmatpush.msra.mxu1 %v1065_v32  ;;  %2113 = vmatpush.msra.mxu0 %v1048_v34  ;;  %v1062_v44 = vld [vmem:[%s4101_s30 + $0xc8] sm:$0xff]  ;;  %v1077_v47 = vld [vmem:[%s4101_s30 + $0x140] sm:$0xff]  ;;  %v1044_v50 = vld [vmem:[%s4101_s30 + $0x38] sm:$0xff] }
  0x46   : > { %2172 = vmatpush.msra.mxu3 %v1097_v33  ;;  %2153 = vmatpush.msra.mxu2 %v1080_v35  ;;  %v1094_v45 = vld [vmem:[%s4101_s30 + $0x1c8] sm:$0xff]  ;;  %v1061_v48 = vld [vmem:[%s4101_s30 + $0xc0] sm:$0xff]  ;;  %v1076_v51 = vld [vmem:[%s4101_s30 + $0x138] sm:$0xff] }
  0x47   : > { %2133 = vmatpush.msra.mxu1 %v1064_v36  ;;  %2114 = vmatpush.msra.mxu0 %v1047_v38  ;;  %v1093_v49 = vld [vmem:[%s4101_s30 + $0x1c0] sm:$0xff]  ;;  %v1060_v52 = vld [vmem:[%s4101_s30 + $0xb8] sm:$0xff]  ;;  %v1043_v54 = vld [vmem:[%s4101_s30 + $0x30] sm:$0xff] }
  0x48   : > { %2173 = vmatpush.msra.mxu3 %v1096_v37  ;;  %2154 = vmatpush.msra.mxu2 %v1079_v39  ;;  %v1092_v53 = vld [vmem:[%s4101_s30 + $0x1b8] sm:$0xff]  ;;  %v1075_v55 = vld [vmem:[%s4101_s30 + $0x130] sm:$0xff]  ;;  %v1042_v58 = vld [vmem:[%s4101_s30 + $0x28] sm:$0xff] }
  0x49   : > { %2134 = vmatpush.msra.mxu1 %v1063_v40  ;;  %2115 = vmatpush.msra.mxu0 %v1046_v42  ;;  %v1059_v56 = vld [vmem:[%s4101_s30 + $0xb0] sm:$0xff]  ;;  %v1074_v59 = vld [vmem:[%s4101_s30 + $0x128] sm:$0xff]  ;;  %v1041_v62 = vld [vmem:[%s4101_s30 + $0x20] sm:$0xff] }
  0x4a   : > { %2174 = vmatpush.msra.mxu3 %v1095_v41  ;;  %2155 = vmatpush.msra.mxu2 %v1078_v43  ;;  %v1091_v57 = vld [vmem:[%s4101_s30 + $0x1b0] sm:$0xff]  ;;  %v1058_v60 = vld [vmem:[%s4101_s30 + $0xa8] sm:$0xff]  ;;  %v1073_v63 = vld [vmem:[%s4101_s30 + $0x120] sm:$0xff] }
  0x4b   : > { %2135 = vmatpush.msra.mxu1 %v1062_v44  ;;  %2116 = vmatpush.msra.mxu0 %v1045_v46  ;;  %v1090_v61 = vld [vmem:[%s4101_s30 + $0x1a8] sm:$0xff]  ;;  %v1057_v0 = vld [vmem:[%s4101_s30 + $0xa0] sm:$0xff]  ;;  %v1040_v2 = vld [vmem:[%s4101_s30 + $0x18] sm:$0xff] }
  0x4c   : > { %2175 = vmatpush.msra.mxu3 %v1094_v45  ;;  %2156 = vmatpush.msra.mxu2 %v1077_v47  ;;  %v1089_v1 = vld [vmem:[%s4101_s30 + $0x1a0] sm:$0xff]  ;;  %v1072_v3 = vld [vmem:[%s4101_s30 + $0x118] sm:$0xff]  ;;  %v1039_v6 = vld [vmem:[%s4101_s30 + $0x10] sm:$0xff] }
  0x4d   : > { %2136 = vmatpush.msra.mxu1 %v1061_v48  ;;  %2117 = vmatpush.msra.mxu0 %v1044_v50  ;;  %v1056_v4 = vld [vmem:[%s4101_s30 + $0x98] sm:$0xff]  ;;  %v1071_v7 = vld [vmem:[%s4101_s30 + $0x110] sm:$0xff]  ;;  %v1038_v10 = vld [vmem:[%s4101_s30 + $0x8] sm:$0xff] }
  0x4e   : > { %2176 = vmatpush.msra.mxu3 %v1093_v49  ;;  %2157 = vmatpush.msra.mxu2 %v1076_v51  ;;  %v1088_v5 = vld [vmem:[%s4101_s30 + $0x198] sm:$0xff]  ;;  %v1055_v8 = vld [vmem:[%s4101_s30 + $0x90] sm:$0xff]  ;;  %v1070_v11 = vld [vmem:[%s4101_s30 + $0x108] sm:$0xff] }
  0x4f   : > { %2137 = vmatpush.msra.mxu1 %v1060_v52  ;;  %2118 = vmatpush.msra.mxu0 %v1043_v54  ;;  %v1087_v9 = vld [vmem:[%s4101_s30 + $0x190] sm:$0xff]  ;;  %v1054_v12 = vld [vmem:[%s4101_s30 + $0x88] sm:$0xff]  ;;  %v1037_v14 = vld [vmem:[%s4101_s30] sm:$0xff] }
  0x50   : > { %2177 = vmatpush.msra.mxu3 %v1092_v53  ;;  %2158 = vmatpush.msra.mxu2 %v1075_v55  ;;  %v1086_v13 = vld [vmem:[%s4101_s30 + $0x188] sm:$0xff]  ;;  %v1069_v15 = vld [vmem:[%s4101_s30 + $0x100] sm:$0xff]  ;;  %v1116_v16 = vld [vmem:[%s4101_s30 + $0x278] sm:$0xff] }
  0x51   : > { %2138 = vmatpush.msra.mxu1 %v1059_v56  ;;  %2119 = vmatpush.msra.mxu0 %v1042_v58  ;;  %v1148_v17 = vld [vmem:[%s4101_s30 + $0x378] sm:$0xff]  ;;  %v1053_v18 = vld [vmem:[%s4101_s30 + $0x80] sm:$0xff]  ;;  %v1115_v20 = vld [vmem:[%s4101_s30 + $0x270] sm:$0xff]  ;;  %v420_v58 = vlaneseq }
  0x52   : > { %2178 = vmatpush.msra.mxu3 %v1091_v57  ;;  %2159 = vmatpush.msra.mxu2 %v1074_v59  ;;  %v1085_v19 = vld [vmem:[%s4101_s30 + $0x180] sm:$0xff]  ;;  %v1132_v21 = vld [vmem:[%s4101_s30 + $0x2f8] sm:$0xff]  ;;  %v1147_v22 = vld [vmem:[%s4101_s30 + $0x370] sm:$0xff] }
  0x53   : > { %2139 = vmatpush.msra.mxu1 %v1058_v60  ;;  %2120 = vmatpush.msra.mxu0 %v1041_v62  ;;  %v1164_v23 = vld [vmem:[%s4101_s30 + $0x3f8] sm:$0xff]  ;;  %v1114_v24 = vld [vmem:[%s4101_s30 + $0x268] sm:$0xff]  ;;  %v1131_v25 = vld [vmem:[%s4101_s30 + $0x2f0] sm:$0xff] }
  0x54   : > { %2179 = vmatpush.msra.mxu3 %v1090_v61  ;;  %2160 = vmatpush.msra.mxu2 %v1073_v63  ;;  %v1146_v26 = vld [vmem:[%s4101_s30 + $0x368] sm:$0xff]  ;;  %v1163_v27 = vld [vmem:[%s4101_s30 + $0x3f0] sm:$0xff]  ;;  %v1113_v28 = vld [vmem:[%s4101_s30 + $0x260] sm:$0xff] }
  0x55   : > { %2140 = vmatpush.msra.mxu1 %v1057_v0  ;;  %2121 = vmatpush.msra.mxu0 %v1040_v2  ;;  %v1130_v29 = vld [vmem:[%s4101_s30 + $0x2e8] sm:$0xff]  ;;  %v1145_v30 = vld [vmem:[%s4101_s30 + $0x360] sm:$0xff]  ;;  %v1112_v32 = vld [vmem:[%s4101_s30 + $0x258] sm:$0xff] }
  0x56   : > { %2180 = vmatpush.msra.mxu3 %v1089_v1  ;;  %2161 = vmatpush.msra.mxu2 %v1072_v3  ;;  %v1162_v31 = vld [vmem:[%s4101_s30 + $0x3e8] sm:$0xff]  ;;  %v1129_v33 = vld [vmem:[%s4101_s30 + $0x2e0] sm:$0xff]  ;;  %v1144_v34 = vld [vmem:[%s4101_s30 + $0x358] sm:$0xff] }
  0x57   : > { %2141 = vmatpush.msra.mxu1 %v1056_v4  ;;  %2122 = vmatpush.msra.mxu0 %v1039_v6  ;;  %v1161_v35 = vld [vmem:[%s4101_s30 + $0x3e0] sm:$0xff]  ;;  %v1111_v36 = vld [vmem:[%s4101_s30 + $0x250] sm:$0xff]  ;;  %v1128_v37 = vld [vmem:[%s4101_s30 + $0x2d8] sm:$0xff] }
  0x58   : > { %2181 = vmatpush.msra.mxu3 %v1088_v5  ;;  %2162 = vmatpush.msra.mxu2 %v1071_v7  ;;  %v1143_v38 = vld [vmem:[%s4101_s30 + $0x350] sm:$0xff]  ;;  %v1160_v39 = vld [vmem:[%s4101_s30 + $0x3d8] sm:$0xff]  ;;  %v1110_v40 = vld [vmem:[%s4101_s30 + $0x248] sm:$0xff]  ;;  %v4223_v7 = vand.u32 127, %v420_v58 }
  0x59   : > { %2142 = vmatpush.msra.mxu1 %v1055_v8  ;;  %2123 = vmatpush.msra.mxu0 %v1038_v10  ;;  %v1127_v41 = vld [vmem:[%s4101_s30 + $0x2d0] sm:$0xff]  ;;  %v403_v45 = vld [vmem:[%s4103_s6 + $0x192] sm:$0xff] }
  0x5a   : > { %2182 = vmatpush.msra.mxu3 %v1087_v9  ;;  %2163 = vmatpush.msra.mxu2 %v1070_v11  ;;  %v352_v42 = vld [vmem:[%s4103_s6] sm:$0xff]  ;;  %v386_v44 = vld [vmem:[%s4103_s6 + $0x10c] sm:$0xff]  ;;  %766 = vst [vmem:[#allocation1 + $0x3] ss:$4 sm:$0xff] %v403_v45  ;;  %v387_v63 = vld [vmem:[%s4103_s6 + $0x114] sm:$0xff] }
  0x5b   : > { %2143 = vmatpush.msra.mxu1 %v1054_v12  ;;  %2124 = vmatpush.msra.mxu0 %v1037_v14  ;;  %v369_v43 = vld [vmem:[%s4103_s6 + $0x86] sm:$0xff]  ;;  %760 = vst [vmem:[#allocation1] ss:$4 sm:$0xff] %v352_v42  ;;  %v1109_v48 = vld [vmem:[%s4101_s30 + $0x240] sm:$0xff] }
  0x5c   : > { %2183 = vmatpush.msra.mxu3 %v1086_v13  ;;  %2164 = vmatpush.msra.mxu2 %v1069_v15  ;;  %v1142_v46 = vld [vmem:[%s4101_s30 + $0x348] sm:$0xff]  ;;  %v1159_v47 = vld [vmem:[%s4101_s30 + $0x3d0] sm:$0xff]  ;;  %762 = vst [vmem:[#allocation1 + $0x1] ss:$4 sm:$0xff] %v369_v43  ;;  %v1141_v50 = vld [vmem:[%s4101_s30 + $0x340] sm:$0xff] }
  0x5d   : > { %2189 = vmatpush.msrb.mxu0 %v1116_v16  ;;  %2144 = vmatpush.msra.mxu1 %v1053_v18  ;;  %v1126_v49 = vld [vmem:[%s4101_s30 + $0x2c8] sm:$0xff]  ;;  %764 = vst [vmem:[#allocation1 + $0x2] ss:$4 sm:$0xff] %v386_v44  ;;  %v1108_v52 = vld [vmem:[%s4101_s30 + $0x238] sm:$0xff]  ;;  %v1125_v53 = vld [vmem:[%s4101_s30 + $0x2c0] sm:$0xff]  ;;  %v423_v16 = vadd.s32 256, %v4223_v7 }
  0x5e   : > { %2229 = vmatpush.msrb.mxu2 %v1148_v17  ;;  %2184 = vmatpush.msra.mxu3 %v1085_v19  ;;  %v1158_v51 = vld [vmem:[%s4101_s30 + $0x3c8] sm:$0xff]  ;;  %v1140_v54 = vld [vmem:[%s4101_s30 + $0x338] sm:$0xff]  ;;  %v1157_v55 = vld [vmem:[%s4101_s30 + $0x3c0] sm:$0xff]  ;;  %772 = vst [vmem:[#allocation1 + $0x22] ss:$4 sm:$0xff] %v387_v63  ;;  %v4236_v19 = vstv %s489_s7 }
  0x5f   : > { %2190 = vmatpush.msrb.mxu0 %v1115_v20  ;;  %2209 = vmatpush.msrb.mxu1 %v1132_v21  ;;  %v1107_v56 = vld [vmem:[%s4101_s30 + $0x230] sm:$0xff]  ;;  %v1124_v57 = vld [vmem:[%s4101_s30 + $0x2b8] sm:$0xff]  ;;  %v1106_v0 = vld [vmem:[%s4101_s30 + $0x228] sm:$0xff]  ;;  %vm493_vm1 = vcmp.lt.s32.totalorder %v423_v16, %v4236_v19  ;;  %vm491_vm2 = vcmp.lt.s32.totalorder %v4223_v7, %v4236_v19 }
  0x60   : > { %2230 = vmatpush.msrb.mxu2 %v1147_v22  ;;  %2249 = vmatpush.msrb.mxu3 %v1164_v23  ;;  %v353_v59 = vld [vmem:[%s4103_s6 + $0x8] sm:$0xff]  ;;  %v1138_v2 = vld [vmem:[%s4101_s30 + $0x328] sm:$0xff]  ;;  %v1105_v5 = vld [vmem:[%s4101_s30 + $0x220] sm:$0xff] }
  0x61   : > { %2191 = vmatpush.msrb.mxu0 %v1114_v24  ;;  %2210 = vmatpush.msrb.mxu1 %v1131_v25  ;;  %v370_v60 = vld [vmem:[%s4103_s6 + $0x8e] sm:$0xff]  ;;  %768 = vst [vmem:[#allocation1 + $0x20] ss:$4 sm:$0xff] %v353_v59  ;;  %v404_v4 = vld [vmem:[%s4103_s6 + $0x19a] sm:$0xff]  ;;  %v424_v24 = vadd.s32 384, %v4223_v7  ;;  %v405_v59 = vld [vmem:[%s4103_s6 + $0x1a2] sm:$0xff] }
  0x62   : > { %2231 = vmatpush.msrb.mxu2 %v1146_v26  ;;  %2250 = vmatpush.msrb.mxu3 %v1163_v27  ;;  %v1139_v61 = vld [vmem:[%s4101_s30 + $0x330] sm:$0xff]  ;;  %v1156_v62 = vld [vmem:[%s4101_s30 + $0x3b8] sm:$0xff]  ;;  %770 = vst [vmem:[#allocation1 + $0x21] ss:$4 sm:$0xff] %v370_v60  ;;  %v1122_v6 = vld [vmem:[%s4101_s30 + $0x2a8] sm:$0xff] }
  0x63   : > { %2192 = vmatpush.msrb.mxu0 %v1113_v28  ;;  %2211 = vmatpush.msrb.mxu1 %v1130_v29  ;;  %v1123_v1 = vld [vmem:[%s4101_s30 + $0x2b0] sm:$0xff]  ;;  %v1137_v8 = vld [vmem:[%s4101_s30 + $0x320] sm:$0xff]  ;;  %v1154_v9 = vld [vmem:[%s4101_s30 + $0x3a8] sm:$0xff]  ;;  %774 = vst [vmem:[#allocation1 + $0x23] ss:$4 sm:$0xff] %v404_v4  ;;  %v422_v29 = vadd.s32 128, %v4223_v7  ;;  %vm494_vm3 = vcmp.lt.s32.totalorder %v424_v24, %v4236_v19 }
  0x64   : > { %2232 = vmatpush.msrb.mxu2 %v1145_v30  ;;  %2251 = vmatpush.msrb.mxu3 %v1162_v31  ;;  %v1155_v3 = vld [vmem:[%s4101_s30 + $0x3b0] sm:$0xff]  ;;  %v1104_v10 = vld [vmem:[%s4101_s30 + $0x218] sm:$0xff]  ;;  %v1121_v11 = vld [vmem:[%s4101_s30 + $0x2a0] sm:$0xff] }
  0x65   : > { %2193 = vmatpush.msrb.mxu0 %v1112_v32  ;;  %2212 = vmatpush.msrb.mxu1 %v1129_v33  ;;  %v1136_v12 = vld [vmem:[%s4101_s30 + $0x318] sm:$0xff]  ;;  %v1153_v13 = vld [vmem:[%s4101_s30 + $0x3a0] sm:$0xff]  ;;  %v1103_v14 = vld [vmem:[%s4101_s30 + $0x210] sm:$0xff]  ;;  %vm492_vm4 = vcmp.lt.s32.totalorder %v422_v29, %v4236_v19 }
  0x66   : > { %2233 = vmatpush.msrb.mxu2 %v1144_v34  ;;  %2252 = vmatpush.msrb.mxu3 %v1161_v35  ;;  %v1120_v15 = vld [vmem:[%s4101_s30 + $0x298] sm:$0xff]  ;;  %v1135_v17 = vld [vmem:[%s4101_s30 + $0x310] sm:$0xff]  ;;  %v1102_v20 = vld [vmem:[%s4101_s30 + $0x208] sm:$0xff] }
  0x67   : > { %2194 = vmatpush.msrb.mxu0 %v1111_v36  ;;  %2213 = vmatpush.msrb.mxu1 %v1128_v37  ;;  %v1152_v18 = vld [vmem:[%s4101_s30 + $0x398] sm:$0xff]  ;;  %v1119_v21 = vld [vmem:[%s4101_s30 + $0x290] sm:$0xff]  ;;  %v1134_v22 = vld [vmem:[%s4101_s30 + $0x308] sm:$0xff] }
  0x68   : > { %2234 = vmatpush.msrb.mxu2 %v1143_v38  ;;  %2253 = vmatpush.msrb.mxu3 %v1160_v39  ;;  %v1151_v23 = vld [vmem:[%s4101_s30 + $0x390] sm:$0xff]  ;;  %v1101_v26 = vld [vmem:[%s4101_s30 + $0x200] sm:$0xff]  ;;  %v1118_v27 = vld [vmem:[%s4101_s30 + $0x288] sm:$0xff] }
  0x69   : > { %2195 = vmatpush.msrb.mxu0 %v1110_v40  ;;  %2214 = vmatpush.msrb.mxu1 %v1127_v41  ;;  %v777_v25 = vld.sshfl [vmem:[#allocation1 + $0x10] sm:$0xff pattern:$0x73625140]  ;;  %v1133_v28 = vld [vmem:[%s4101_s30 + $0x300] sm:$0xff]  ;;  %v1150_v30 = vld [vmem:[%s4101_s30 + $0x388] sm:$0xff]  ;;  %v427_v40 = vadd.s32 768, %v4223_v7 }
  0x6a   : > { %2235 = vmatpush.msrb.mxu2 %v1142_v46  ;;  %2254 = vmatpush.msrb.mxu3 %v1159_v47  ;;  %v775_v31 = vld.sshfl [vmem:[#allocation1] sm:$0xff pattern:$0x73625140]  ;;  %v778_v32 = vld.sshfl [vmem:[#allocation1 + $0x18] sm:$0xff pattern:$0x73625140] }
  0x6b   : > { %2196 = vmatpush.msrb.mxu0 %v1109_v48  ;;  %2215 = vmatpush.msrb.mxu1 %v1126_v49  ;;  %v1180_v33 = vld [vmem:[%s4101_s30 + $0x478] sm:$0xff]  ;;  %v1117_v35 = vld [vmem:[%s4101_s30 + $0x280] sm:$0xff]  ;;  %v776_v37 = vld.sshfl [vmem:[#allocation1 + $0x8] sm:$0xff pattern:$0x73625140]  ;;  %v425_v46 = vadd.s32 512, %v4223_v7  ;;  %vm497_vm5 = vcmp.lt.s32.totalorder %v427_v40, %v4236_v19 }
  0x6c   : > { %2236 = vmatpush.msrb.mxu2 %v1141_v50  ;;  %2255 = vmatpush.msrb.mxu3 %v1158_v51  ;;  %v1212_v34 = vld [vmem:[%s4101_s30 + $0x578] sm:$0xff]  ;;  %v1149_v36 = vld [vmem:[%s4101_s30 + $0x380] sm:$0xff]  ;;  %v1179_v38 = vld [vmem:[%s4101_s30 + $0x470] sm:$0xff]  ;;  %v428_v50 = vadd.s32 896, %v4223_v7  ;;  %786 = vst [vmem:[#allocation1 + $0x3] ss:$4 sm:$0xff] %v405_v59 }
  0x6d   : > { %2197 = vmatpush.msrb.mxu0 %v1108_v52  ;;  %2216 = vmatpush.msrb.mxu1 %v1125_v53  ;;  %v1196_v39 = vld [vmem:[%s4101_s30 + $0x4f8] sm:$0xff]  ;;  %v1211_v41 = vld [vmem:[%s4101_s30 + $0x570] sm:$0xff]  ;;  %v1178_v43 = vld [vmem:[%s4101_s30 + $0x468] sm:$0xff]  ;;  %vm495_vm6 = vcmp.lt.s32.totalorder %v425_v46, %v4236_v19 }
  0x6e   : > { %2237 = vmatpush.msrb.mxu2 %v1140_v54  ;;  %2256 = vmatpush.msrb.mxu3 %v1157_v55  ;;  %v1228_v42 = vld [vmem:[%s4101_s30 + $0x5f8] sm:$0xff]  ;;  %v1195_v44 = vld [vmem:[%s4101_s30 + $0x4f0] sm:$0xff]  ;;  %v1210_v45 = vld [vmem:[%s4101_s30 + $0x568] sm:$0xff]  ;;  %v426_v54 = vadd.s32 640, %v4223_v7  ;;  %vm498_vm7 = vcmp.lt.s32.totalorder %v428_v50, %v4236_v19  ;;  %v430_v50 = vadd.s32 1152, %v4223_v7 }
  0x6f   : > { %2198 = vmatpush.msrb.mxu0 %v1107_v56  ;;  %2217 = vmatpush.msrb.mxu1 %v1124_v57  ;;  %v1227_v47 = vld [vmem:[%s4101_s30 + $0x5f0] sm:$0xff]  ;;  %v1177_v48 = vld [vmem:[%s4101_s30 + $0x460] sm:$0xff]  ;;  %v1194_v49 = vld [vmem:[%s4101_s30 + $0x4e8] sm:$0xff] }
  0x70   : > { %2238 = vmatpush.msrb.mxu2 %v1139_v61  ;;  %2257 = vmatpush.msrb.mxu3 %v1156_v62  ;;  %v781_v51 = vld.sshfl [vmem:[#allocation1 + $0x30] sm:$0xff pattern:$0x73625140]  ;;  %v1209_v52 = vld [vmem:[%s4101_s30 + $0x560] sm:$0xff]  ;;  %v1226_v53 = vld [vmem:[%s4101_s30 + $0x5e8] sm:$0xff]  ;;  %vm496_vm8 = vcmp.lt.s32.totalorder %v426_v54, %v4236_v19  ;;  %vm500_vm11 = vcmp.lt.s32.totalorder %v430_v50, %v4236_v19 }
  0x71   : > { %2199 = vmatpush.msrb.mxu0 %v1106_v0  ;;  %2218 = vmatpush.msrb.mxu1 %v1123_v1  ;;  %v354_v55 = vld [vmem:[%s4103_s6 + $0x10] sm:$0xff]  ;;  %v388_v57 = vld [vmem:[%s4103_s6 + $0x11c] sm:$0xff] }
  0x72   : > { %2239 = vmatpush.msrb.mxu2 %v1138_v2  ;;  %2258 = vmatpush.msrb.mxu3 %v1155_v3  ;;  %v371_v56 = vld [vmem:[%s4103_s6 + $0x96] sm:$0xff]  ;;  %783 = vst [vmem:[#allocation1] ss:$4 sm:$0xff] %v354_v55  ;;  %v1175_v2 = vld [vmem:[%s4101_s30 + $0x450] sm:$0xff] }
  0x73   : > { %2200 = vmatpush.msrb.mxu0 %v1105_v5  ;;  %2219 = vmatpush.msrb.mxu1 %v1122_v6  ;;  %v779_v58 = vld.sshfl [vmem:[#allocation1 + $0x20] sm:$0xff pattern:$0x73625140]  ;;  %v782_v60 = vld.sshfl [vmem:[#allocation1 + $0x38] sm:$0xff pattern:$0x73625140] }
  0x74   : > { %2240 = vmatpush.msrb.mxu2 %v1137_v8  ;;  %2259 = vmatpush.msrb.mxu3 %v1154_v9  ;;  %v1176_v61 = vld [vmem:[%s4101_s30 + $0x458] sm:$0xff]  ;;  %784 = vst [vmem:[#allocation1 + $0x1] ss:$4 sm:$0xff] %v371_v56  ;;  %v1193_v62 = vld [vmem:[%s4101_s30 + $0x4e0] sm:$0xff]  ;;  %v1207_v4 = vld [vmem:[%s4101_s30 + $0x550] sm:$0xff] }
  0x75   : > { %2201 = vmatpush.msrb.mxu0 %v1104_v10  ;;  %2220 = vmatpush.msrb.mxu1 %v1121_v11  ;;  %v1208_v63 = vld [vmem:[%s4101_s30 + $0x558] sm:$0xff]  ;;  %785 = vst [vmem:[#allocation1 + $0x2] ss:$4 sm:$0xff] %v388_v57  ;;  %v1225_v0 = vld [vmem:[%s4101_s30 + $0x5e0] sm:$0xff]  ;;  %v1174_v6 = vld [vmem:[%s4101_s30 + $0x448] sm:$0xff] }
  0x76   : > { %2241 = vmatpush.msrb.mxu2 %v1136_v12  ;;  %2260 = vmatpush.msrb.mxu3 %v1153_v13  ;;  %v780_v1 = vld.sshfl [vmem:[#allocation1 + $0x28] sm:$0xff pattern:$0x73625140]  ;;  %v1192_v3 = vld [vmem:[%s4101_s30 + $0x4d8] sm:$0xff]  ;;  %v1191_v8 = vld [vmem:[%s4101_s30 + $0x4d0] sm:$0xff] }
  0x77   : > { %2202 = vmatpush.msrb.mxu0 %v1103_v14  ;;  %2221 = vmatpush.msrb.mxu1 %v1120_v15  ;;  %v1224_v5 = vld [vmem:[%s4101_s30 + $0x5d8] sm:$0xff]  ;;  %v1206_v9 = vld [vmem:[%s4101_s30 + $0x548] sm:$0xff]  ;;  %v1223_v10 = vld [vmem:[%s4101_s30 + $0x5d0] sm:$0xff] }
  0x78   : > { %2242 = vmatpush.msrb.mxu2 %v1135_v17  ;;  %2261 = vmatpush.msrb.mxu3 %v1152_v18  ;;  %v1173_v11 = vld [vmem:[%s4101_s30 + $0x440] sm:$0xff]  ;;  %v1190_v12 = vld [vmem:[%s4101_s30 + $0x4c8] sm:$0xff]  ;;  %v1172_v15 = vld [vmem:[%s4101_s30 + $0x438] sm:$0xff] }
  0x79   : > { %2203 = vmatpush.msrb.mxu0 %v1102_v20  ;;  %2222 = vmatpush.msrb.mxu1 %v1119_v21  ;;  %v1205_v13 = vld [vmem:[%s4101_s30 + $0x540] sm:$0xff]  ;;  %v1222_v14 = vld [vmem:[%s4101_s30 + $0x5c8] sm:$0xff]  ;;  %v1204_v17 = vld [vmem:[%s4101_s30 + $0x538] sm:$0xff] }
  0x7a   : > { %2243 = vmatpush.msrb.mxu2 %v1134_v22  ;;  %2262 = vmatpush.msrb.mxu3 %v1151_v23  ;;  %v1189_v16 = vld [vmem:[%s4101_s30 + $0x4c0] sm:$0xff]  ;;  %v1171_v20 = vld [vmem:[%s4101_s30 + $0x430] sm:$0xff]  ;;  %v1188_v21 = vld [vmem:[%s4101_s30 + $0x4b8] sm:$0xff] }
  0x7b   : > { %3654 = vmatmul.msk.f32.vlgmr.msra.gmra.mxu2 %vm493_vm1, %v777_v25  ;;  %2204 = vmatpush.msrb.mxu0 %v1101_v26  ;;  %v1221_v18 = vld [vmem:[%s4101_s30 + $0x5c0] sm:$0xff]  ;;  %v1203_v22 = vld [vmem:[%s4101_s30 + $0x530] sm:$0xff]  ;;  %v1220_v23 = vld [vmem:[%s4101_s30 + $0x5b8] sm:$0xff] }
  0x7c   : > { %2223 = vmatpush.msrb.mxu1 %v1118_v27  ;;  %2244 = vmatpush.msrb.mxu2 %v1133_v28  ;;  %v1170_v24 = vld [vmem:[%s4101_s30 + $0x428] sm:$0xff]  ;;  %v1187_v25 = vld [vmem:[%s4101_s30 + $0x4b0] sm:$0xff]  ;;  %v1169_v28 = vld [vmem:[%s4101_s30 + $0x420] sm:$0xff] }
  0x7d   : > { %2263 = vmatpush.msrb.mxu3 %v1150_v30  ;;  %3652 = vmatmul.msk.f32.vlgmr.msra.gmra.mxu0 %vm491_vm2, %v775_v31  ;;  %v1202_v26 = vld [vmem:[%s4101_s30 + $0x528] sm:$0xff]  ;;  %v1219_v27 = vld [vmem:[%s4101_s30 + $0x5b0] sm:$0xff]  ;;  %v1201_v30 = vld [vmem:[%s4101_s30 + $0x520] sm:$0xff] }
  0x7e   : > { %3655 = vmatmul.msk.f32.vlgmr.msra.gmra.mxu3 %vm494_vm3, %v778_v32  ;;  %2269 = vmatpush.msra.mxu0 %v1180_v33  ;;  %v1186_v29 = vld [vmem:[%s4101_s30 + $0x4a8] sm:$0xff]  ;;  %v1168_v32 = vld [vmem:[%s4101_s30 + $0x418] sm:$0xff]  ;;  %v1185_v33 = vld [vmem:[%s4101_s30 + $0x4a0] sm:$0xff] }
  0x7f   : > { %2309 = vmatpush.msra.mxu2 %v1212_v34  ;;  %2224 = vmatpush.msrb.mxu1 %v1117_v35  ;;  %v1218_v31 = vld [vmem:[%s4101_s30 + $0x5a8] sm:$0xff]  ;;  %v1200_v34 = vld [vmem:[%s4101_s30 + $0x518] sm:$0xff]  ;;  %v1217_v35 = vld [vmem:[%s4101_s30 + $0x5a0] sm:$0xff] }
  0x80   : > { %2264 = vmatpush.msrb.mxu3 %v1149_v36  ;;  %3653 = vmatmul.msk.f32.vlgmr.msra.gmra.mxu1 %vm492_vm4, %v776_v37  ;;  %v1167_v36 = vld [vmem:[%s4101_s30 + $0x410] sm:$0xff]  ;;  %v1184_v37 = vld [vmem:[%s4101_s30 + $0x498] sm:$0xff]  ;;  %v1166_v40 = vld [vmem:[%s4101_s30 + $0x408] sm:$0xff] }
  0x81   : > { %2270 = vmatpush.msra.mxu0 %v1179_v38  ;;  %2289 = vmatpush.msra.mxu1 %v1196_v39  ;;  %v1199_v38 = vld [vmem:[%s4101_s30 + $0x510] sm:$0xff]  ;;  %v1216_v39 = vld [vmem:[%s4101_s30 + $0x598] sm:$0xff]  ;;  %v1214_v55 = vld [vmem:[%s4101_s30 + $0x588] sm:$0xff] }
  0x82   : > { %2310 = vmatpush.msra.mxu2 %v1211_v41  ;;  %2329 = vmatpush.msra.mxu3 %v1228_v42  ;;  %v1183_v41 = vld [vmem:[%s4101_s30 + $0x490] sm:$0xff]  ;;  %v1198_v42 = vld [vmem:[%s4101_s30 + $0x508] sm:$0xff]  ;;  %v791_v56 = vld.sshfl [vmem:[#allocation1] sm:$0xff pattern:$0x73625140] }
  0x83   : > { %2271 = vmatpush.msra.mxu0 %v1178_v43  ;;  %2290 = vmatpush.msra.mxu1 %v1195_v44  ;;  %v429_v43 = vadd.s32 1024, %v4223_v7  ;;  %v431_v44 = vadd.s32 1280, %v4223_v7  ;;  %v372_v46 = vld [vmem:[%s4103_s6 + $0x9e] sm:$0xff]  ;;  %v406_v54 = vld [vmem:[%s4103_s6 + $0x1aa] sm:$0xff] }
  0x84   : > { %2311 = vmatpush.msra.mxu2 %v1210_v45  ;;  %2330 = vmatpush.msra.mxu3 %v1227_v47  ;;  %v355_v45 = vld [vmem:[%s4103_s6 + $0x18] sm:$0xff]  ;;  %v1215_v47 = vld [vmem:[%s4101_s30 + $0x590] sm:$0xff]  ;;  %788 = vst [vmem:[#allocation1 + $0x21] ss:$4 sm:$0xff] %v372_v46  ;;  %v1276_v59 = vld [vmem:[%s4101_s30 + $0x778] sm:$0xff] }
  0x85   : > { %3658 = vmatmul.msk.f32.vlgmr.msrb.gmra.mxu2 %vm497_vm5, %v781_v51  ;;  %2272 = vmatpush.msra.mxu0 %v1177_v48  ;;  %v1165_v48 = vld [vmem:[%s4101_s30 + $0x400] sm:$0xff]  ;;  %787 = vst [vmem:[#allocation1 + $0x20] ss:$4 sm:$0xff] %v355_v45  ;;  %vm499_vm9 = vcmp.lt.s32.totalorder %v429_v43, %v4236_v19  ;;  %vm501_vm10 = vcmp.lt.s32.totalorder %v431_v44, %v4236_v19  ;;  %v793_v57 = vld.sshfl [vmem:[#allocation1 + $0x10] sm:$0xff pattern:$0x73625140] }
  0x86   : > { %2291 = vmatpush.msra.mxu1 %v1194_v49  ;;  %2312 = vmatpush.msra.mxu2 %v1209_v52  ;;  %v1182_v49 = vld [vmem:[%s4101_s30 + $0x488] sm:$0xff]  ;;  %v1197_v51 = vld [vmem:[%s4101_s30 + $0x500] sm:$0xff]  ;;  %v432_v52 = vadd.s32 1408, %v4223_v7  ;;  %790 = vst [vmem:[#allocation1 + $0x23] ss:$4 sm:$0xff] %v406_v54  ;;  %v1232_v46 = vld [vmem:[%s4101_s30 + $0x618] sm:$0xff] }
  0x87   : > { %2331 = vmatpush.msra.mxu3 %v1226_v53  ;;  %3656 = vmatmul.msk.f32.vlgmr.msrb.gmra.mxu0 %vm495_vm6, %v779_v58  ;;  %v389_v53 = vld [vmem:[%s4103_s6 + $0x124] sm:$0xff]  ;;  %v1265_v44 = vld [vmem:[%s4101_s30 + $0x720] sm:$0xff] }
  0x88   : > { %3659 = vmatmul.msk.f32.vlgmr.msrb.gmra.mxu3 %vm498_vm7, %v782_v60  ;;  %2273 = vmatpush.msra.mxu0 %v1176_v61  ;;  %789 = vst [vmem:[#allocation1 + $0x22] ss:$4 sm:$0xff] %v389_v53  ;;  %v1244_v58 = vld [vmem:[%s4101_s30 + $0x678] sm:$0xff]  ;;  %v1181_v60 = vld [vmem:[%s4101_s30 + $0x480] sm:$0xff]  ;;  %vm502_vm12 = vcmp.lt.s32.totalorder %v432_v52, %v4236_v19  ;;  %v1250_v43 = vld [vmem:[%s4101_s30 + $0x6a8] sm:$0xff] }
  0x89   : > { %2292 = vmatpush.msra.mxu1 %v1193_v62  ;;  %2313 = vmatpush.msra.mxu2 %v1208_v63  ;;  %v1213_v61 = vld [vmem:[%s4101_s30 + $0x580] sm:$0xff]  ;;  %v792_v62 = vld.sshfl [vmem:[#allocation1 + $0x8] sm:$0xff pattern:$0x73625140]  ;;  %v1231_v50 = vld [vmem:[%s4101_s30 + $0x610] sm:$0xff] }
  0x8a   : > { %2332 = vmatpush.msra.mxu3 %v1225_v0  ;;  %3657 = vmatmul.msk.f32.vlgmr.msrb.gmra.mxu1 %vm496_vm8, %v780_v1  ;;  %v794_v63 = vld.sshfl [vmem:[#allocation1 + $0x18] sm:$0xff pattern:$0x73625140]  ;;  %v1243_v0 = vld [vmem:[%s4101_s30 + $0x670] sm:$0xff]  ;;  %v1282_v45 = vld [vmem:[%s4101_s30 + $0x7a8] sm:$0xff] }
  0x8b   : > { %2274 = vmatpush.msra.mxu0 %v1175_v2  ;;  %2293 = vmatpush.msra.mxu1 %v1192_v3  ;;  %v1260_v1 = vld [vmem:[%s4101_s30 + $0x6f8] sm:$0xff]  ;;  %v1275_v2 = vld [vmem:[%s4101_s30 + $0x770] sm:$0xff]  ;;  %v1230_v54 = vld [vmem:[%s4101_s30 + $0x608] sm:$0xff] }
  0x8c   : > { %2314 = vmatpush.msra.mxu2 %v1207_v4  ;;  %2333 = vmatpush.msra.mxu3 %v1224_v5  ;;  %v1292_v3 = vld [vmem:[%s4101_s30 + $0x7f8] sm:$0xff]  ;;  %v1242_v4 = vld [vmem:[%s4101_s30 + $0x668] sm:$0xff]  ;;  %v1259_v5 = vld [vmem:[%s4101_s30 + $0x6f0] sm:$0xff] }
  0x8d   : > { %2275 = vmatpush.msra.mxu0 %v1174_v6  ;;  %2294 = vmatpush.msra.mxu1 %v1191_v8  ;;  %v1274_v6 = vld [vmem:[%s4101_s30 + $0x768] sm:$0xff]  ;;  %v1291_v8 = vld [vmem:[%s4101_s30 + $0x7f0] sm:$0xff]  ;;  %v1280_v53 = vld [vmem:[%s4101_s30 + $0x798] sm:$0xff] }
  0x8e   : > { %2315 = vmatpush.msra.mxu2 %v1206_v9  ;;  %2334 = vmatpush.msra.mxu3 %v1223_v10  ;;  %v1241_v9 = vld [vmem:[%s4101_s30 + $0x660] sm:$0xff]  ;;  %v1258_v10 = vld [vmem:[%s4101_s30 + $0x6e8] sm:$0xff]  ;;  %v1263_v52 = vld [vmem:[%s4101_s30 + $0x710] sm:$0xff] }
  0x8f   : > { %2276 = vmatpush.msra.mxu0 %v1173_v11  ;;  %2295 = vmatpush.msra.mxu1 %v1190_v12  ;;  %v1273_v11 = vld [vmem:[%s4101_s30 + $0x760] sm:$0xff]  ;;  %v1290_v12 = vld [vmem:[%s4101_s30 + $0x7e8] sm:$0xff] }
  0x90   : > { %2316 = vmatpush.msra.mxu2 %v1205_v13  ;;  %2335 = vmatpush.msra.mxu3 %v1222_v14  ;;  %v1240_v13 = vld [vmem:[%s4101_s30 + $0x658] sm:$0xff]  ;;  %v1257_v14 = vld [vmem:[%s4101_s30 + $0x6e0] sm:$0xff] }
  0x91   : > { %2277 = vmatpush.msra.mxu0 %v1172_v15  ;;  %2296 = vmatpush.msra.mxu1 %v1189_v16  ;;  %v1272_v15 = vld [vmem:[%s4101_s30 + $0x758] sm:$0xff]  ;;  %v1289_v16 = vld [vmem:[%s4101_s30 + $0x7e0] sm:$0xff] }
  0x92   : > { %2317 = vmatpush.msra.mxu2 %v1204_v17  ;;  %2336 = vmatpush.msra.mxu3 %v1221_v18  ;;  %v1239_v17 = vld [vmem:[%s4101_s30 + $0x650] sm:$0xff]  ;;  %v1256_v18 = vld [vmem:[%s4101_s30 + $0x6d8] sm:$0xff] }
  0x93   : > { %2278 = vmatpush.msra.mxu0 %v1171_v20  ;;  %2297 = vmatpush.msra.mxu1 %v1188_v21  ;;  %v1271_v20 = vld [vmem:[%s4101_s30 + $0x750] sm:$0xff]  ;;  %v1288_v21 = vld [vmem:[%s4101_s30 + $0x7d8] sm:$0xff] }
  0x94   : > { %2318 = vmatpush.msra.mxu2 %v1203_v22  ;;  %2337 = vmatpush.msra.mxu3 %v1220_v23  ;;  %v1238_v22 = vld [vmem:[%s4101_s30 + $0x648] sm:$0xff]  ;;  %v1255_v23 = vld [vmem:[%s4101_s30 + $0x6d0] sm:$0xff] }
  0x95   : > { %2279 = vmatpush.msra.mxu0 %v1170_v24  ;;  %2298 = vmatpush.msra.mxu1 %v1187_v25  ;;  %v1270_v24 = vld [vmem:[%s4101_s30 + $0x748] sm:$0xff]  ;;  %v1287_v25 = vld [vmem:[%s4101_s30 + $0x7d0] sm:$0xff] }
  0x96   : > { %2319 = vmatpush.msra.mxu2 %v1202_v26  ;;  %2338 = vmatpush.msra.mxu3 %v1219_v27  ;;  %v1237_v26 = vld [vmem:[%s4101_s30 + $0x640] sm:$0xff]  ;;  %v1254_v27 = vld [vmem:[%s4101_s30 + $0x6c8] sm:$0xff] }
  0x97   : > { %2280 = vmatpush.msra.mxu0 %v1169_v28  ;;  %2299 = vmatpush.msra.mxu1 %v1186_v29  ;;  %v1269_v28 = vld [vmem:[%s4101_s30 + $0x740] sm:$0xff]  ;;  %v1286_v29 = vld [vmem:[%s4101_s30 + $0x7c8] sm:$0xff] }
  0x98   : > { %2320 = vmatpush.msra.mxu2 %v1201_v30  ;;  %2339 = vmatpush.msra.mxu3 %v1218_v31  ;;  %v1236_v30 = vld [vmem:[%s4101_s30 + $0x638] sm:$0xff]  ;;  %v1253_v31 = vld [vmem:[%s4101_s30 + $0x6c0] sm:$0xff] }
  0x99   : > { %2281 = vmatpush.msra.mxu0 %v1168_v32  ;;  %2300 = vmatpush.msra.mxu1 %v1185_v33  ;;  %v1268_v32 = vld [vmem:[%s4101_s30 + $0x738] sm:$0xff]  ;;  %v1285_v33 = vld [vmem:[%s4101_s30 + $0x7c0] sm:$0xff] }
  0x9a   : > { %2321 = vmatpush.msra.mxu2 %v1200_v34  ;;  %2340 = vmatpush.msra.mxu3 %v1217_v35  ;;  %v1235_v34 = vld [vmem:[%s4101_s30 + $0x630] sm:$0xff]  ;;  %v1252_v35 = vld [vmem:[%s4101_s30 + $0x6b8] sm:$0xff] }
  0x9b   : > { %2282 = vmatpush.msra.mxu0 %v1167_v36  ;;  %2301 = vmatpush.msra.mxu1 %v1184_v37  ;;  %v1267_v36 = vld [vmem:[%s4101_s30 + $0x730] sm:$0xff]  ;;  %v1284_v37 = vld [vmem:[%s4101_s30 + $0x7b8] sm:$0xff] }
  0x9c   : > { %2322 = vmatpush.msra.mxu2 %v1199_v38  ;;  %2341 = vmatpush.msra.mxu3 %v1216_v39  ;;  %v1234_v38 = vld [vmem:[%s4101_s30 + $0x628] sm:$0xff]  ;;  %v1251_v39 = vld [vmem:[%s4101_s30 + $0x6b0] sm:$0xff] }
  0x9d   : > { %2283 = vmatpush.msra.mxu0 %v1166_v40  ;;  %2302 = vmatpush.msra.mxu1 %v1183_v41  ;;  %v1266_v40 = vld [vmem:[%s4101_s30 + $0x728] sm:$0xff]  ;;  %v1283_v41 = vld [vmem:[%s4101_s30 + $0x7b0] sm:$0xff] }
  0x9e   : > { %2323 = vmatpush.msra.mxu2 %v1198_v42  ;;  %2342 = vmatpush.msra.mxu3 %v1215_v47  ;;  %v1233_v42 = vld [vmem:[%s4101_s30 + $0x620] sm:$0xff] }
  0x9f   : > { %2284 = vmatpush.msra.mxu0 %v1165_v48  ;;  %2303 = vmatpush.msra.mxu1 %v1182_v49  ;;  %v1249_v47 = vld [vmem:[%s4101_s30 + $0x6a0] sm:$0xff]  ;;  %v1264_v48 = vld [vmem:[%s4101_s30 + $0x718] sm:$0xff] }
  0xa0   : > { %2324 = vmatpush.msra.mxu2 %v1197_v51  ;;  %2343 = vmatpush.msra.mxu3 %v1214_v55  ;;  %v1281_v49 = vld [vmem:[%s4101_s30 + $0x7a0] sm:$0xff]  ;;  %v1248_v51 = vld [vmem:[%s4101_s30 + $0x698] sm:$0xff]  ;;  %v1247_v55 = vld [vmem:[%s4101_s30 + $0x690] sm:$0xff] }
  0xa1   : > { %3660 = vmatmul.msk.f32.vlgmr.msra.gmra.mxu0 %vm499_vm9, %v791_v56  ;;  %3662 = vmatmul.msk.f32.vlgmr.msra.gmra.mxu2 %vm501_vm10, %v793_v57  ;;  %v1262_v56 = vld [vmem:[%s4101_s30 + $0x708] sm:$0xff]  ;;  %v1279_v57 = vld [vmem:[%s4101_s30 + $0x790] sm:$0xff] }
  0xa2   : > { %2349 = vmatpush.msrb.mxu0 %v1244_v58  ;;  %2389 = vmatpush.msrb.mxu2 %v1276_v59  ;;  %v433_v58 = vadd.s32 1536, %v4223_v7  ;;  %v435_v59 = vadd.s32 1792, %v4223_v7 }
  0xa3   : > { %2304 = vmatpush.msra.mxu1 %v1181_v60  ;;  %2344 = vmatpush.msra.mxu3 %v1213_v61  ;;  %v356_v60 = vld [vmem:[%s4103_s6 + $0x20] sm:$0xff] }
  0xa4   : > { %3661 = vmatmul.msk.f32.vlgmr.msra.gmra.mxu1 %vm500_vm11, %v792_v62  ;;  %3663 = vmatmul.msk.f32.vlgmr.msra.gmra.mxu3 %vm502_vm12, %v794_v63  ;;  %v373_v61 = vld [vmem:[%s4103_s6 + $0xa6] sm:$0xff]  ;;  %v1229_v62 = vld [vmem:[%s4101_s30 + $0x600] sm:$0xff]  ;;  %799 = vst [vmem:[#allocation1] ss:$4 sm:$0xff] %v356_v60  ;;  %vm503_vm13 = vcmp.lt.s32.totalorder %v433_v58, %v4236_v19  ;;  %vm505_vm14 = vcmp.lt.s32.totalorder %v435_v59, %v4236_v19 }
  0xa5   : > { %2350 = vmatpush.msrb.mxu0 %v1243_v0  ;;  %2369 = vmatpush.msrb.mxu1 %v1260_v1  ;;  %v1246_v63 = vld [vmem:[%s4101_s30 + $0x688] sm:$0xff]  ;;  %v1261_v0 = vld [vmem:[%s4101_s30 + $0x700] sm:$0xff]  ;;  %800 = vst [vmem:[#allocation1 + $0x1] ss:$4 sm:$0xff] %v373_v61  ;;  %v1296_v60 = vld [vmem:[%s4101_s30 + $0x818] sm:$0xff] }
  0xa6   : > { %2390 = vmatpush.msrb.mxu2 %v1275_v2  ;;  %2409 = vmatpush.msrb.mxu3 %v1292_v3  ;;  %v1278_v1 = vld [vmem:[%s4101_s30 + $0x788] sm:$0xff]  ;;  %v434_v2 = vadd.s32 1664, %v4223_v7  ;;  %v390_v3 = vld [vmem:[%s4103_s6 + $0x12c] sm:$0xff] }
  0xa7   : > { %2351 = vmatpush.msrb.mxu0 %v1242_v4  ;;  %2370 = vmatpush.msrb.mxu1 %v1259_v5  ;;  %v407_v4 = vld [vmem:[%s4103_s6 + $0x1b2] sm:$0xff]  ;;  %801 = vst [vmem:[#allocation1 + $0x2] ss:$4 sm:$0xff] %v390_v3 }
  0xa8   : > { %2391 = vmatpush.msrb.mxu2 %v1274_v6  ;;  %2410 = vmatpush.msrb.mxu3 %v1291_v8  ;;  %v795_v5 = vld.sshfl [vmem:[#allocation1 + $0x20] sm:$0xff pattern:$0x73625140]  ;;  %v436_v6 = vadd.s32 1920, %v4223_v7  ;;  %802 = vst [vmem:[#allocation1 + $0x3] ss:$4 sm:$0xff] %v407_v4  ;;  %vm504_vm15 = vcmp.lt.s32.totalorder %v434_v2, %v4236_v19 }
  0xa9   : > { %2352 = vmatpush.msrb.mxu0 %v1241_v9  ;;  %2371 = vmatpush.msrb.mxu1 %v1258_v10  ;;  %v797_v8 = vld.sshfl [vmem:[#allocation1 + $0x30] sm:$0xff pattern:$0x73625140]  ;;  %v1308_v9 = vld [vmem:[%s4101_s30 + $0x878] sm:$0xff]  ;;  %v1329_v58 = vld [vmem:[%s4101_s30 + $0x920] sm:$0xff] }
  0xaa   : > { %2392 = vmatpush.msrb.mxu2 %v1273_v11  ;;  %2411 = vmatpush.msrb.mxu3 %v1290_v12  ;;  %v1340_v10 = vld [vmem:[%s4101_s30 + $0x978] sm:$0xff]  ;;  %v1245_v11 = vld [vmem:[%s4101_s30 + $0x680] sm:$0xff]  ;;  %vm506_vm0 = vcmp.lt.s32.totalorder %v436_v6, %v4236_v19  ;;  %v1346_v59 = vld [vmem:[%s4101_s30 + $0x9a8] sm:$0xff] }
  0xab   : > { %2353 = vmatpush.msrb.mxu0 %v1240_v13  ;;  %2372 = vmatpush.msrb.mxu1 %v1257_v14  ;;  %v1277_v12 = vld [vmem:[%s4101_s30 + $0x780] sm:$0xff]  ;;  %v796_v13 = vld.sshfl [vmem:[#allocation1 + $0x28] sm:$0xff pattern:$0x73625140]  ;;  %v1327_v2 = vld [vmem:[%s4101_s30 + $0x910] sm:$0xff] }
  0xac   : > { %2393 = vmatpush.msrb.mxu2 %v1272_v15  ;;  %2412 = vmatpush.msrb.mxu3 %v1289_v16  ;;  %v798_v14 = vld.sshfl [vmem:[#allocation1 + $0x38] sm:$0xff pattern:$0x73625140]  ;;  %v1307_v15 = vld [vmem:[%s4101_s30 + $0x870] sm:$0xff]  ;;  %v1313_v61 = vld [vmem:[%s4101_s30 + $0x8a0] sm:$0xff] }
  0xad   : > { %2354 = vmatpush.msrb.mxu0 %v1239_v17  ;;  %2373 = vmatpush.msrb.mxu1 %v1256_v18  ;;  %v1324_v16 = vld [vmem:[%s4101_s30 + $0x8f8] sm:$0xff]  ;;  %v1339_v17 = vld [vmem:[%s4101_s30 + $0x970] sm:$0xff]  ;;  %v1294_v4 = vld [vmem:[%s4101_s30 + $0x808] sm:$0xff] }
  0xae   : > { %2394 = vmatpush.msrb.mxu2 %v1271_v20  ;;  %2413 = vmatpush.msrb.mxu3 %v1288_v21  ;;  %v1356_v18 = vld [vmem:[%s4101_s30 + $0x9f8] sm:$0xff]  ;;  %v1306_v20 = vld [vmem:[%s4101_s30 + $0x868] sm:$0xff]  ;;  %v1323_v21 = vld [vmem:[%s4101_s30 + $0x8f0] sm:$0xff] }
  0xaf   : > { %2355 = vmatpush.msrb.mxu0 %v1238_v22  ;;  %2374 = vmatpush.msrb.mxu1 %v1255_v23  ;;  %v1338_v22 = vld [vmem:[%s4101_s30 + $0x968] sm:$0xff]  ;;  %v1355_v23 = vld [vmem:[%s4101_s30 + $0x9f0] sm:$0xff]  ;;  %v1344_v3 = vld [vmem:[%s4101_s30 + $0x998] sm:$0xff] }
  0xb0   : > { %2395 = vmatpush.msrb.mxu2 %v1270_v24  ;;  %2414 = vmatpush.msrb.mxu3 %v1287_v25  ;;  %v1305_v24 = vld [vmem:[%s4101_s30 + $0x860] sm:$0xff]  ;;  %v1322_v25 = vld [vmem:[%s4101_s30 + $0x8e8] sm:$0xff] }
  0xb1   : > { %2356 = vmatpush.msrb.mxu0 %v1237_v26  ;;  %2375 = vmatpush.msrb.mxu1 %v1254_v27  ;;  %v1337_v26 = vld [vmem:[%s4101_s30 + $0x960] sm:$0xff]  ;;  %v1354_v27 = vld [vmem:[%s4101_s30 + $0x9e8] sm:$0xff] }
  0xb2   : > { %2396 = vmatpush.msrb.mxu2 %v1269_v28  ;;  %2415 = vmatpush.msrb.mxu3 %v1286_v29  ;;  %v1304_v28 = vld [vmem:[%s4101_s30 + $0x858] sm:$0xff]  ;;  %v1321_v29 = vld [vmem:[%s4101_s30 + $0x8e0] sm:$0xff]  ;;  %v1326_v6 = vld [vmem:[%s4101_s30 + $0x908] sm:$0xff] }
  0xb3   : > { %2357 = vmatpush.msrb.mxu0 %v1236_v30  ;;  %2376 = vmatpush.msrb.mxu1 %v1253_v31  ;;  %v1336_v30 = vld [vmem:[%s4101_s30 + $0x958] sm:$0xff]  ;;  %v1353_v31 = vld [vmem:[%s4101_s30 + $0x9e0] sm:$0xff] }
  0xb4   : > { %2397 = vmatpush.msrb.mxu2 %v1268_v32  ;;  %2416 = vmatpush.msrb.mxu3 %v1285_v33  ;;  %v1303_v32 = vld [vmem:[%s4101_s30 + $0x850] sm:$0xff]  ;;  %v1320_v33 = vld [vmem:[%s4101_s30 + $0x8d8] sm:$0xff] }
  0xb5   : > { %2358 = vmatpush.msrb.mxu0 %v1235_v34  ;;  %2377 = vmatpush.msrb.mxu1 %v1252_v35  ;;  %v1335_v34 = vld [vmem:[%s4101_s30 + $0x950] sm:$0xff]  ;;  %v1352_v35 = vld [vmem:[%s4101_s30 + $0x9d8] sm:$0xff] }
  0xb6   : > { %2398 = vmatpush.msrb.mxu2 %v1267_v36  ;;  %2417 = vmatpush.msrb.mxu3 %v1284_v37  ;;  %v1302_v36 = vld [vmem:[%s4101_s30 + $0x848] sm:$0xff]  ;;  %v1319_v37 = vld [vmem:[%s4101_s30 + $0x8d0] sm:$0xff] }
  0xb7   : > { %2359 = vmatpush.msrb.mxu0 %v1234_v38  ;;  %2378 = vmatpush.msrb.mxu1 %v1251_v39  ;;  %v1334_v38 = vld [vmem:[%s4101_s30 + $0x948] sm:$0xff]  ;;  %v1351_v39 = vld [vmem:[%s4101_s30 + $0x9d0] sm:$0xff] }
  0xb8   : > { %2399 = vmatpush.msrb.mxu2 %v1266_v40  ;;  %2418 = vmatpush.msrb.mxu3 %v1283_v41  ;;  %v1301_v40 = vld [vmem:[%s4101_s30 + $0x840] sm:$0xff]  ;;  %v1318_v41 = vld [vmem:[%s4101_s30 + $0x8c8] sm:$0xff] }
  0xb9   : > { %2360 = vmatpush.msrb.mxu0 %v1233_v42  ;;  %2379 = vmatpush.msrb.mxu1 %v1250_v43  ;;  %v1333_v42 = vld [vmem:[%s4101_s30 + $0x940] sm:$0xff]  ;;  %v1350_v43 = vld [vmem:[%s4101_s30 + $0x9c8] sm:$0xff] }
  0xba   : > { %2400 = vmatpush.msrb.mxu2 %v1265_v44  ;;  %2419 = vmatpush.msrb.mxu3 %v1282_v45  ;;  %v1300_v44 = vld [vmem:[%s4101_s30 + $0x838] sm:$0xff]  ;;  %v1317_v45 = vld [vmem:[%s4101_s30 + $0x8c0] sm:$0xff] }
  0xbb   : > { %2361 = vmatpush.msrb.mxu0 %v1232_v46  ;;  %2380 = vmatpush.msrb.mxu1 %v1249_v47  ;;  %v1332_v46 = vld [vmem:[%s4101_s30 + $0x938] sm:$0xff]  ;;  %v1349_v47 = vld [vmem:[%s4101_s30 + $0x9c0] sm:$0xff] }
  0xbc   : > { %2401 = vmatpush.msrb.mxu2 %v1264_v48  ;;  %2420 = vmatpush.msrb.mxu3 %v1281_v49  ;;  %v1299_v48 = vld [vmem:[%s4101_s30 + $0x830] sm:$0xff]  ;;  %v1316_v49 = vld [vmem:[%s4101_s30 + $0x8b8] sm:$0xff] }
  0xbd   : > { %2362 = vmatpush.msrb.mxu0 %v1231_v50  ;;  %2381 = vmatpush.msrb.mxu1 %v1248_v51  ;;  %v1331_v50 = vld [vmem:[%s4101_s30 + $0x930] sm:$0xff]  ;;  %v1348_v51 = vld [vmem:[%s4101_s30 + $0x9b8] sm:$0xff] }
  0xbe   : > { %2402 = vmatpush.msrb.mxu2 %v1263_v52  ;;  %2421 = vmatpush.msrb.mxu3 %v1280_v53  ;;  %v1298_v52 = vld [vmem:[%s4101_s30 + $0x828] sm:$0xff]  ;;  %v1315_v53 = vld [vmem:[%s4101_s30 + $0x8b0] sm:$0xff] }
  0xbf   : > { %2363 = vmatpush.msrb.mxu0 %v1230_v54  ;;  %2382 = vmatpush.msrb.mxu1 %v1247_v55  ;;  %v1330_v54 = vld [vmem:[%s4101_s30 + $0x928] sm:$0xff]  ;;  %v1347_v55 = vld [vmem:[%s4101_s30 + $0x9b0] sm:$0xff] }
  0xc0   : > { %2403 = vmatpush.msrb.mxu2 %v1262_v56  ;;  %2422 = vmatpush.msrb.mxu3 %v1279_v57  ;;  %v1297_v56 = vld [vmem:[%s4101_s30 + $0x820] sm:$0xff]  ;;  %v1314_v57 = vld [vmem:[%s4101_s30 + $0x8a8] sm:$0xff] }
  0xc1   : > { %2364 = vmatpush.msrb.mxu0 %v1229_v62  ;;  %2383 = vmatpush.msrb.mxu1 %v1246_v63  ;;  %v1328_v62 = vld [vmem:[%s4101_s30 + $0x918] sm:$0xff]  ;;  %v1345_v63 = vld [vmem:[%s4101_s30 + $0x9a0] sm:$0xff] }
  0xc2   : > { %2404 = vmatpush.msrb.mxu2 %v1261_v0  ;;  %2423 = vmatpush.msrb.mxu3 %v1278_v1  ;;  %v1295_v0 = vld [vmem:[%s4101_s30 + $0x810] sm:$0xff]  ;;  %v1312_v1 = vld [vmem:[%s4101_s30 + $0x898] sm:$0xff] }
  0xc3   : > { %3664 = vmatmul.msk.f32.vlgmr.msrb.gmra.mxu0 %vm503_vm13, %v795_v5  ;;  %3666 = vmatmul.msk.f32.vlgmr.msrb.gmra.mxu2 %vm505_vm14, %v797_v8  ;;  %v1311_v5 = vld [vmem:[%s4101_s30 + $0x890] sm:$0xff] }
  0xc4   : > { %2429 = vmatpush.msra.mxu0 %v1308_v9  ;;  %2469 = vmatpush.msra.mxu2 %v1340_v10  ;;  %v1343_v8 = vld [vmem:[%s4101_s30 + $0x990] sm:$0xff]  ;;  %v437_v9 = vadd.s32 2048, %v4223_v7  ;;  %v439_v10 = vadd.s32 2304, %v4223_v7 }
  0xc5   : > { %2384 = vmatpush.msrb.mxu1 %v1245_v11  ;;  %2424 = vmatpush.msrb.mxu3 %v1277_v12  ;;  %v357_v11 = vld [vmem:[%s4103_s6 + $0x28] sm:$0xff] }
  0xc6   : > { %3665 = vmatmul.msk.f32.vlgmr.msrb.gmra.mxu1 %vm504_vm15, %v796_v13  ;;  %3667 = vmatmul.msk.f32.vlgmr.msrb.gmra.mxu3 %vm506_vm0, %v798_v14  ;;  %v374_v12 = vld [vmem:[%s4103_s6 + $0xae] sm:$0xff]  ;;  %v1310_v14 = vld [vmem:[%s4101_s30 + $0x888] sm:$0xff]  ;;  %803 = vst [vmem:[#allocation1 + $0x20] ss:$4 sm:$0xff] %v357_v11  ;;  %vm507_vm1 = vcmp.lt.s32.totalorder %v437_v9, %v4236_v19  ;;  %vm509_vm2 = vcmp.lt.s32.totalorder %v439_v10, %v4236_v19 }
  0xc7   : > { %2430 = vmatpush.msra.mxu0 %v1307_v15  ;;  %2449 = vmatpush.msra.mxu1 %v1324_v16  ;;  %v1293_v13 = vld [vmem:[%s4101_s30 + $0x800] sm:$0xff]  ;;  %v1342_v16 = vld [vmem:[%s4101_s30 + $0x988] sm:$0xff]  ;;  %804 = vst [vmem:[#allocation1 + $0x21] ss:$4 sm:$0xff] %v374_v12  ;;  %v1360_v11 = vld [vmem:[%s4101_s30 + $0xa18] sm:$0xff] }
  0xc8   : > { %2470 = vmatpush.msra.mxu2 %v1339_v17  ;;  %2489 = vmatpush.msra.mxu3 %v1356_v18  ;;  %v1325_v15 = vld [vmem:[%s4101_s30 + $0x900] sm:$0xff]  ;;  %v438_v17 = vadd.s32 2176, %v4223_v7  ;;  %v1410_v10 = vld [vmem:[%s4101_s30 + $0xba8] sm:$0xff] }
  0xc9   : > { %2431 = vmatpush.msra.mxu0 %v1306_v20  ;;  %2450 = vmatpush.msra.mxu1 %v1323_v21  ;;  %v391_v18 = vld [vmem:[%s4103_s6 + $0x134] sm:$0xff] }
  0xca   : > { %2471 = vmatpush.msra.mxu2 %v1338_v22  ;;  %2490 = vmatpush.msra.mxu3 %v1355_v23  ;;  %v408_v20 = vld [vmem:[%s4103_s6 + $0x1ba] sm:$0xff]  ;;  %v440_v22 = vadd.s32 2432, %v4223_v7  ;;  %805 = vst [vmem:[#allocation1 + $0x22] ss:$4 sm:$0xff] %v391_v18  ;;  %vm508_vm3 = vcmp.lt.s32.totalorder %v438_v17, %v4236_v19  ;;  %v1408_v18 = vld [vmem:[%s4101_s30 + $0xb98] sm:$0xff] }
  0xcb   : > { %2432 = vmatpush.msra.mxu0 %v1305_v24  ;;  %2451 = vmatpush.msra.mxu1 %v1322_v25  ;;  %v807_v21 = vld.sshfl [vmem:[#allocation1] sm:$0xff pattern:$0x73625140]  ;;  %v809_v23 = vld.sshfl [vmem:[#allocation1 + $0x10] sm:$0xff pattern:$0x73625140] }
  0xcc   : > { %2472 = vmatpush.msra.mxu2 %v1337_v26  ;;  %2491 = vmatpush.msra.mxu3 %v1354_v27  ;;  %806 = vst [vmem:[#allocation1 + $0x23] ss:$4 sm:$0xff] %v408_v20  ;;  %v1372_v24 = vld [vmem:[%s4101_s30 + $0xa78] sm:$0xff]  ;;  %v1309_v26 = vld [vmem:[%s4101_s30 + $0x880] sm:$0xff]  ;;  %vm510_vm4 = vcmp.lt.s32.totalorder %v440_v22, %v4236_v19  ;;  %v1391_v17 = vld [vmem:[%s4101_s30 + $0xb10] sm:$0xff] }
  0xcd   : > { %2433 = vmatpush.msra.mxu0 %v1304_v28  ;;  %2452 = vmatpush.msra.mxu1 %v1321_v29  ;;  %v1404_v25 = vld [vmem:[%s4101_s30 + $0xb78] sm:$0xff]  ;;  %v1341_v27 = vld [vmem:[%s4101_s30 + $0x980] sm:$0xff]  ;;  %v808_v28 = vld.sshfl [vmem:[#allocation1 + $0x8] sm:$0xff pattern:$0x73625140] }
  0xce   : > { %2473 = vmatpush.msra.mxu2 %v1336_v30  ;;  %2492 = vmatpush.msra.mxu3 %v1353_v31  ;;  %v810_v29 = vld.sshfl [vmem:[#allocation1 + $0x18] sm:$0xff pattern:$0x73625140]  ;;  %v1371_v30 = vld [vmem:[%s4101_s30 + $0xa70] sm:$0xff]  ;;  %v1393_v9 = vld [vmem:[%s4101_s30 + $0xb20] sm:$0xff] }
  0xcf   : > { %2434 = vmatpush.msra.mxu0 %v1303_v32  ;;  %2453 = vmatpush.msra.mxu1 %v1320_v33  ;;  %v1388_v31 = vld [vmem:[%s4101_s30 + $0xaf8] sm:$0xff]  ;;  %v1403_v32 = vld [vmem:[%s4101_s30 + $0xb70] sm:$0xff]  ;;  %v1377_v12 = vld [vmem:[%s4101_s30 + $0xaa0] sm:$0xff] }
  0xd0   : > { %2474 = vmatpush.msra.mxu2 %v1335_v34  ;;  %2493 = vmatpush.msra.mxu3 %v1352_v35  ;;  %v1420_v33 = vld [vmem:[%s4101_s30 + $0xbf8] sm:$0xff]  ;;  %v1370_v34 = vld [vmem:[%s4101_s30 + $0xa68] sm:$0xff]  ;;  %v1387_v35 = vld [vmem:[%s4101_s30 + $0xaf0] sm:$0xff] }
  0xd1   : > { %2435 = vmatpush.msra.mxu0 %v1302_v36  ;;  %2454 = vmatpush.msra.mxu1 %v1319_v37  ;;  %v1402_v36 = vld [vmem:[%s4101_s30 + $0xb68] sm:$0xff]  ;;  %v1419_v37 = vld [vmem:[%s4101_s30 + $0xbf0] sm:$0xff] }
  0xd2   : > { %2475 = vmatpush.msra.mxu2 %v1334_v38  ;;  %2494 = vmatpush.msra.mxu3 %v1351_v39  ;;  %v1369_v38 = vld [vmem:[%s4101_s30 + $0xa60] sm:$0xff]  ;;  %v1386_v39 = vld [vmem:[%s4101_s30 + $0xae8] sm:$0xff] }
  0xd3   : > { %2436 = vmatpush.msra.mxu0 %v1301_v40  ;;  %2455 = vmatpush.msra.mxu1 %v1318_v41  ;;  %v1401_v40 = vld [vmem:[%s4101_s30 + $0xb60] sm:$0xff]  ;;  %v1418_v41 = vld [vmem:[%s4101_s30 + $0xbe8] sm:$0xff] }
  0xd4   : > { %2476 = vmatpush.msra.mxu2 %v1333_v42  ;;  %2495 = vmatpush.msra.mxu3 %v1350_v43  ;;  %v1368_v42 = vld [vmem:[%s4101_s30 + $0xa58] sm:$0xff]  ;;  %v1385_v43 = vld [vmem:[%s4101_s30 + $0xae0] sm:$0xff]  ;;  %v1358_v20 = vld [vmem:[%s4101_s30 + $0xa08] sm:$0xff] }
  0xd5   : > { %2437 = vmatpush.msra.mxu0 %v1300_v44  ;;  %2456 = vmatpush.msra.mxu1 %v1317_v45  ;;  %v1400_v44 = vld [vmem:[%s4101_s30 + $0xb58] sm:$0xff]  ;;  %v1417_v45 = vld [vmem:[%s4101_s30 + $0xbe0] sm:$0xff]  ;;  %v1390_v22 = vld [vmem:[%s4101_s30 + $0xb08] sm:$0xff] }
  0xd6   : > { %2477 = vmatpush.msra.mxu2 %v1332_v46  ;;  %2496 = vmatpush.msra.mxu3 %v1349_v47  ;;  %v1367_v46 = vld [vmem:[%s4101_s30 + $0xa50] sm:$0xff]  ;;  %v1384_v47 = vld [vmem:[%s4101_s30 + $0xad8] sm:$0xff] }
  0xd7   : > { %2438 = vmatpush.msra.mxu0 %v1299_v48  ;;  %2457 = vmatpush.msra.mxu1 %v1316_v49  ;;  %v1399_v48 = vld [vmem:[%s4101_s30 + $0xb50] sm:$0xff]  ;;  %v1416_v49 = vld [vmem:[%s4101_s30 + $0xbd8] sm:$0xff] }
  0xd8   : > { %2478 = vmatpush.msra.mxu2 %v1331_v50  ;;  %2497 = vmatpush.msra.mxu3 %v1348_v51  ;;  %v1366_v50 = vld [vmem:[%s4101_s30 + $0xa48] sm:$0xff]  ;;  %v1383_v51 = vld [vmem:[%s4101_s30 + $0xad0] sm:$0xff] }
  0xd9   : > { %2439 = vmatpush.msra.mxu0 %v1298_v52  ;;  %2458 = vmatpush.msra.mxu1 %v1315_v53  ;;  %v1398_v52 = vld [vmem:[%s4101_s30 + $0xb48] sm:$0xff]  ;;  %v1415_v53 = vld [vmem:[%s4101_s30 + $0xbd0] sm:$0xff] }
  0xda   : > { %2479 = vmatpush.msra.mxu2 %v1330_v54  ;;  %2498 = vmatpush.msra.mxu3 %v1347_v55  ;;  %v1365_v54 = vld [vmem:[%s4101_s30 + $0xa40] sm:$0xff]  ;;  %v1382_v55 = vld [vmem:[%s4101_s30 + $0xac8] sm:$0xff] }
  0xdb   : > { %2440 = vmatpush.msra.mxu0 %v1297_v56  ;;  %2459 = vmatpush.msra.mxu1 %v1314_v57  ;;  %v1397_v56 = vld [vmem:[%s4101_s30 + $0xb40] sm:$0xff]  ;;  %v1414_v57 = vld [vmem:[%s4101_s30 + $0xbc8] sm:$0xff] }
  0xdc   : > { %2480 = vmatpush.msra.mxu2 %v1329_v58  ;;  %2499 = vmatpush.msra.mxu3 %v1346_v59  ;;  %v1364_v58 = vld [vmem:[%s4101_s30 + $0xa38] sm:$0xff]  ;;  %v1381_v59 = vld [vmem:[%s4101_s30 + $0xac0] sm:$0xff] }
  0xdd   : > { %2441 = vmatpush.msra.mxu0 %v1296_v60  ;;  %2460 = vmatpush.msra.mxu1 %v1313_v61  ;;  %v1396_v60 = vld [vmem:[%s4101_s30 + $0xb38] sm:$0xff]  ;;  %v1413_v61 = vld [vmem:[%s4101_s30 + $0xbc0] sm:$0xff] }
  0xde   : > { %2481 = vmatpush.msra.mxu2 %v1328_v62  ;;  %2500 = vmatpush.msra.mxu3 %v1345_v63  ;;  %v1363_v62 = vld [vmem:[%s4101_s30 + $0xa30] sm:$0xff]  ;;  %v1380_v63 = vld [vmem:[%s4101_s30 + $0xab8] sm:$0xff] }
  0xdf   : > { %2442 = vmatpush.msra.mxu0 %v1295_v0  ;;  %2461 = vmatpush.msra.mxu1 %v1312_v1  ;;  %v1395_v0 = vld [vmem:[%s4101_s30 + $0xb30] sm:$0xff]  ;;  %v1412_v1 = vld [vmem:[%s4101_s30 + $0xbb8] sm:$0xff] }
  0xe0   : > { %2482 = vmatpush.msra.mxu2 %v1327_v2  ;;  %2501 = vmatpush.msra.mxu3 %v1344_v3  ;;  %v1362_v2 = vld [vmem:[%s4101_s30 + $0xa28] sm:$0xff]  ;;  %v1379_v3 = vld [vmem:[%s4101_s30 + $0xab0] sm:$0xff] }
  0xe1   : > { %2443 = vmatpush.msra.mxu0 %v1294_v4  ;;  %2462 = vmatpush.msra.mxu1 %v1311_v5  ;;  %v1394_v4 = vld [vmem:[%s4101_s30 + $0xb28] sm:$0xff]  ;;  %v1411_v5 = vld [vmem:[%s4101_s30 + $0xbb0] sm:$0xff] }
  0xe2   : > { %2483 = vmatpush.msra.mxu2 %v1326_v6  ;;  %2502 = vmatpush.msra.mxu3 %v1343_v8  ;;  %v1361_v6 = vld [vmem:[%s4101_s30 + $0xa20] sm:$0xff]  ;;  %v1378_v8 = vld [vmem:[%s4101_s30 + $0xaa8] sm:$0xff] }
  0xe3   : > { %2444 = vmatpush.msra.mxu0 %v1293_v13  ;;  %2463 = vmatpush.msra.mxu1 %v1310_v14  ;;  %v1392_v13 = vld [vmem:[%s4101_s30 + $0xb18] sm:$0xff]  ;;  %v1409_v14 = vld [vmem:[%s4101_s30 + $0xba0] sm:$0xff] }
  0xe4   : > { %2484 = vmatpush.msra.mxu2 %v1325_v15  ;;  %2503 = vmatpush.msra.mxu3 %v1342_v16  ;;  %v1359_v15 = vld [vmem:[%s4101_s30 + $0xa10] sm:$0xff]  ;;  %v1376_v16 = vld [vmem:[%s4101_s30 + $0xa98] sm:$0xff] }
  0xe5   : > { %3668 = vmatmul.msk.f32.vlgmr.msra.gmra.mxu0 %vm507_vm1, %v807_v21  ;;  %3670 = vmatmul.msk.f32.vlgmr.msra.gmra.mxu2 %vm509_vm2, %v809_v23  ;;  %v1375_v21 = vld [vmem:[%s4101_s30 + $0xa90] sm:$0xff] }
  0xe6   : > { %2509 = vmatpush.msrb.mxu0 %v1372_v24  ;;  %2549 = vmatpush.msrb.mxu2 %v1404_v25  ;;  %v1407_v23 = vld [vmem:[%s4101_s30 + $0xb90] sm:$0xff]  ;;  %v441_v24 = vadd.s32 2560, %v4223_v7  ;;  %v443_v25 = vadd.s32 2816, %v4223_v7 }
  0xe7   : > { %2464 = vmatpush.msra.mxu1 %v1309_v26  ;;  %2504 = vmatpush.msra.mxu3 %v1341_v27  ;;  %v358_v26 = vld [vmem:[%s4103_s6 + $0x30] sm:$0xff] }
  0xe8   : > { %3669 = vmatmul.msk.f32.vlgmr.msra.gmra.mxu1 %vm508_vm3, %v808_v28  ;;  %3671 = vmatmul.msk.f32.vlgmr.msra.gmra.mxu3 %vm510_vm4, %v810_v29  ;;  %v375_v27 = vld [vmem:[%s4103_s6 + $0xb6] sm:$0xff]  ;;  %815 = vst [vmem:[#allocation1] ss:$4 sm:$0xff] %v358_v26  ;;  %vm511_vm5 = vcmp.lt.s32.totalorder %v441_v24, %v4236_v19  ;;  %vm513_vm6 = vcmp.lt.s32.totalorder %v443_v25, %v4236_v19 }
  0xe9   : > { %2510 = vmatpush.msrb.mxu0 %v1371_v30  ;;  %2529 = vmatpush.msrb.mxu1 %v1388_v31  ;;  %v1357_v28 = vld [vmem:[%s4101_s30 + $0xa00] sm:$0xff]  ;;  %v1374_v29 = vld [vmem:[%s4101_s30 + $0xa88] sm:$0xff]  ;;  %816 = vst [vmem:[#allocation1 + $0x1] ss:$4 sm:$0xff] %v375_v27  ;;  %v1424_v26 = vld [vmem:[%s4101_s30 + $0xc18] sm:$0xff] }
  0xea   : > { %2550 = vmatpush.msrb.mxu2 %v1403_v32  ;;  %2569 = vmatpush.msrb.mxu3 %v1420_v33  ;;  %v1389_v30 = vld [vmem:[%s4101_s30 + $0xb00] sm:$0xff]  ;;  %v1406_v31 = vld [vmem:[%s4101_s30 + $0xb88] sm:$0xff]  ;;  %v442_v32 = vadd.s32 2688, %v4223_v7 }
  0xeb   : > { %2511 = vmatpush.msrb.mxu0 %v1370_v34  ;;  %2530 = vmatpush.msrb.mxu1 %v1387_v35  ;;  %v392_v33 = vld [vmem:[%s4103_s6 + $0x13c] sm:$0xff] }
  0xec   : > { %2551 = vmatpush.msrb.mxu2 %v1402_v36  ;;  %2570 = vmatpush.msrb.mxu3 %v1419_v37  ;;  %v409_v34 = vld [vmem:[%s4103_s6 + $0x1c2] sm:$0xff]  ;;  %v811_v35 = vld.sshfl [vmem:[#allocation1 + $0x20] sm:$0xff pattern:$0x73625140]  ;;  %v444_v36 = vadd.s32 2944, %v4223_v7  ;;  %vm512_vm7 = vcmp.lt.s32.totalorder %v442_v32, %v4236_v19 }
  0xed   : > { %2512 = vmatpush.msrb.mxu0 %v1369_v38  ;;  %2531 = vmatpush.msrb.mxu1 %v1386_v39  ;;  %817 = vst [vmem:[#allocation1 + $0x2] ss:$4 sm:$0xff] %v392_v33  ;;  %v813_v37 = vld.sshfl [vmem:[#allocation1 + $0x30] sm:$0xff pattern:$0x73625140]  ;;  %v1436_v38 = vld [vmem:[%s4101_s30 + $0xc78] sm:$0xff] }
  0xee   : > { %2552 = vmatpush.msrb.mxu2 %v1401_v40  ;;  %2571 = vmatpush.msrb.mxu3 %v1418_v41  ;;  %818 = vst [vmem:[#allocation1 + $0x3] ss:$4 sm:$0xff] %v409_v34  ;;  %v1468_v39 = vld [vmem:[%s4101_s30 + $0xd78] sm:$0xff]  ;;  %v1373_v40 = vld [vmem:[%s4101_s30 + $0xa80] sm:$0xff]  ;;  %vm514_vm8 = vcmp.lt.s32.totalorder %v444_v36, %v4236_v19  ;;  %v1474_v25 = vld [vmem:[%s4101_s30 + $0xda8] sm:$0xff] }
  0xef   : > { %2513 = vmatpush.msrb.mxu0 %v1368_v42  ;;  %2532 = vmatpush.msrb.mxu1 %v1385_v43  ;;  %v1405_v41 = vld [vmem:[%s4101_s30 + $0xb80] sm:$0xff]  ;;  %v812_v42 = vld.sshfl [vmem:[#allocation1 + $0x28] sm:$0xff pattern:$0x73625140]  ;;  %v1455_v32 = vld [vmem:[%s4101_s30 + $0xd10] sm:$0xff] }
  0xf0   : > { %2553 = vmatpush.msrb.mxu2 %v1400_v44  ;;  %2572 = vmatpush.msrb.mxu3 %v1417_v45  ;;  %v814_v43 = vld.sshfl [vmem:[#allocation1 + $0x38] sm:$0xff pattern:$0x73625140]  ;;  %v1435_v44 = vld [vmem:[%s4101_s30 + $0xc70] sm:$0xff]  ;;  %v1457_v24 = vld [vmem:[%s4101_s30 + $0xd20] sm:$0xff] }
  0xf1   : > { %2514 = vmatpush.msrb.mxu0 %v1367_v46  ;;  %2533 = vmatpush.msrb.mxu1 %v1384_v47  ;;  %v1452_v45 = vld [vmem:[%s4101_s30 + $0xcf8] sm:$0xff]  ;;  %v1467_v46 = vld [vmem:[%s4101_s30 + $0xd70] sm:$0xff]  ;;  %v1441_v27 = vld [vmem:[%s4101_s30 + $0xca0] sm:$0xff] }
  0xf2   : > { %2554 = vmatpush.msrb.mxu2 %v1399_v48  ;;  %2573 = vmatpush.msrb.mxu3 %v1416_v49  ;;  %v1484_v47 = vld [vmem:[%s4101_s30 + $0xdf8] sm:$0xff]  ;;  %v1434_v48 = vld [vmem:[%s4101_s30 + $0xc68] sm:$0xff]  ;;  %v1451_v49 = vld [vmem:[%s4101_s30 + $0xcf0] sm:$0xff] }
  0xf3   : > { %2515 = vmatpush.msrb.mxu0 %v1366_v50  ;;  %2534 = vmatpush.msrb.mxu1 %v1383_v51  ;;  %v1466_v50 = vld [vmem:[%s4101_s30 + $0xd68] sm:$0xff]  ;;  %v1483_v51 = vld [vmem:[%s4101_s30 + $0xdf0] sm:$0xff]  ;;  %v1472_v33 = vld [vmem:[%s4101_s30 + $0xd98] sm:$0xff] }
  0xf4   : > { %2555 = vmatpush.msrb.mxu2 %v1398_v52  ;;  %2574 = vmatpush.msrb.mxu3 %v1415_v53  ;;  %v1433_v52 = vld [vmem:[%s4101_s30 + $0xc60] sm:$0xff]  ;;  %v1450_v53 = vld [vmem:[%s4101_s30 + $0xce8] sm:$0xff] }
  0xf5   : > { %2516 = vmatpush.msrb.mxu0 %v1365_v54  ;;  %2535 = vmatpush.msrb.mxu1 %v1382_v55  ;;  %v1465_v54 = vld [vmem:[%s4101_s30 + $0xd60] sm:$0xff]  ;;  %v1482_v55 = vld [vmem:[%s4101_s30 + $0xde8] sm:$0xff] }
  0xf6   : > { %2556 = vmatpush.msrb.mxu2 %v1397_v56  ;;  %2575 = vmatpush.msrb.mxu3 %v1414_v57  ;;  %v1432_v56 = vld [vmem:[%s4101_s30 + $0xc58] sm:$0xff]  ;;  %v1449_v57 = vld [vmem:[%s4101_s30 + $0xce0] sm:$0xff]  ;;  %v1422_v34 = vld [vmem:[%s4101_s30 + $0xc08] sm:$0xff] }
  0xf7   : > { %2517 = vmatpush.msrb.mxu0 %v1364_v58  ;;  %2536 = vmatpush.msrb.mxu1 %v1381_v59  ;;  %v1464_v58 = vld [vmem:[%s4101_s30 + $0xd58] sm:$0xff]  ;;  %v1481_v59 = vld [vmem:[%s4101_s30 + $0xde0] sm:$0xff]  ;;  %v1454_v36 = vld [vmem:[%s4101_s30 + $0xd08] sm:$0xff] }
  0xf8   : > { %2557 = vmatpush.msrb.mxu2 %v1396_v60  ;;  %2576 = vmatpush.msrb.mxu3 %v1413_v61  ;;  %v1431_v60 = vld [vmem:[%s4101_s30 + $0xc50] sm:$0xff]  ;;  %v1448_v61 = vld [vmem:[%s4101_s30 + $0xcd8] sm:$0xff] }
  0xf9   : > { %2518 = vmatpush.msrb.mxu0 %v1363_v62  ;;  %2537 = vmatpush.msrb.mxu1 %v1380_v63  ;;  %v1463_v62 = vld [vmem:[%s4101_s30 + $0xd50] sm:$0xff]  ;;  %v1480_v63 = vld [vmem:[%s4101_s30 + $0xdd8] sm:$0xff] }
  0xfa   : > { %2558 = vmatpush.msrb.mxu2 %v1395_v0  ;;  %2577 = vmatpush.msrb.mxu3 %v1412_v1  ;;  %v1430_v0 = vld [vmem:[%s4101_s30 + $0xc48] sm:$0xff]  ;;  %v1447_v1 = vld [vmem:[%s4101_s30 + $0xcd0] sm:$0xff] }
  0xfb   : > { %2519 = vmatpush.msrb.mxu0 %v1362_v2  ;;  %2538 = vmatpush.msrb.mxu1 %v1379_v3  ;;  %v1462_v2 = vld [vmem:[%s4101_s30 + $0xd48] sm:$0xff]  ;;  %v1479_v3 = vld [vmem:[%s4101_s30 + $0xdd0] sm:$0xff] }
  0xfc   : > { %2559 = vmatpush.msrb.mxu2 %v1394_v4  ;;  %2578 = vmatpush.msrb.mxu3 %v1411_v5  ;;  %v1429_v4 = vld [vmem:[%s4101_s30 + $0xc40] sm:$0xff]  ;;  %v1446_v5 = vld [vmem:[%s4101_s30 + $0xcc8] sm:$0xff] }
  0xfd   : > { %2520 = vmatpush.msrb.mxu0 %v1361_v6  ;;  %2539 = vmatpush.msrb.mxu1 %v1378_v8  ;;  %v1461_v6 = vld [vmem:[%s4101_s30 + $0xd40] sm:$0xff]  ;;  %v1478_v8 = vld [vmem:[%s4101_s30 + $0xdc8] sm:$0xff] }
  0xfe   : > { %2560 = vmatpush.msrb.mxu2 %v1393_v9  ;;  %2579 = vmatpush.msrb.mxu3 %v1410_v10  ;;  %v1428_v9 = vld [vmem:[%s4101_s30 + $0xc38] sm:$0xff]  ;;  %v1445_v10 = vld [vmem:[%s4101_s30 + $0xcc0] sm:$0xff] }
  0xff   : > { %2521 = vmatpush.msrb.mxu0 %v1360_v11  ;;  %2540 = vmatpush.msrb.mxu1 %v1377_v12  ;;  %v1460_v11 = vld [vmem:[%s4101_s30 + $0xd38] sm:$0xff]  ;;  %v1477_v12 = vld [vmem:[%s4101_s30 + $0xdc0] sm:$0xff] }
 0x100   : > { %2561 = vmatpush.msrb.mxu2 %v1392_v13  ;;  %2580 = vmatpush.msrb.mxu3 %v1409_v14  ;;  %v1427_v13 = vld [vmem:[%s4101_s30 + $0xc30] sm:$0xff]  ;;  %v1444_v14 = vld [vmem:[%s4101_s30 + $0xcb8] sm:$0xff] }
 0x101   : > { %2522 = vmatpush.msrb.mxu0 %v1359_v15  ;;  %2541 = vmatpush.msrb.mxu1 %v1376_v16  ;;  %v1459_v15 = vld [vmem:[%s4101_s30 + $0xd30] sm:$0xff]  ;;  %v1476_v16 = vld [vmem:[%s4101_s30 + $0xdb8] sm:$0xff] }
 0x102   : > { %2562 = vmatpush.msrb.mxu2 %v1391_v17  ;;  %2581 = vmatpush.msrb.mxu3 %v1408_v18  ;;  %v1426_v17 = vld [vmem:[%s4101_s30 + $0xc28] sm:$0xff]  ;;  %v1443_v18 = vld [vmem:[%s4101_s30 + $0xcb0] sm:$0xff] }
 0x103   : > { %2523 = vmatpush.msrb.mxu0 %v1358_v20  ;;  %2542 = vmatpush.msrb.mxu1 %v1375_v21  ;;  %v1458_v20 = vld [vmem:[%s4101_s30 + $0xd28] sm:$0xff]  ;;  %v1475_v21 = vld [vmem:[%s4101_s30 + $0xdb0] sm:$0xff] }
 0x104   : > { %2563 = vmatpush.msrb.mxu2 %v1390_v22  ;;  %2582 = vmatpush.msrb.mxu3 %v1407_v23  ;;  %v1425_v22 = vld [vmem:[%s4101_s30 + $0xc20] sm:$0xff]  ;;  %v1442_v23 = vld [vmem:[%s4101_s30 + $0xca8] sm:$0xff] }
 0x105   : > { %2524 = vmatpush.msrb.mxu0 %v1357_v28  ;;  %2543 = vmatpush.msrb.mxu1 %v1374_v29  ;;  %v1456_v28 = vld [vmem:[%s4101_s30 + $0xd18] sm:$0xff]  ;;  %v1473_v29 = vld [vmem:[%s4101_s30 + $0xda0] sm:$0xff] }
 0x106   : > { %2564 = vmatpush.msrb.mxu2 %v1389_v30  ;;  %2583 = vmatpush.msrb.mxu3 %v1406_v31  ;;  %v1423_v30 = vld [vmem:[%s4101_s30 + $0xc10] sm:$0xff]  ;;  %v1440_v31 = vld [vmem:[%s4101_s30 + $0xc98] sm:$0xff] }
 0x107   : > { %3672 = vmatmul.msk.f32.vlgmr.msrb.gmra.mxu0 %vm511_vm5, %v811_v35  ;;  %3674 = vmatmul.msk.f32.vlgmr.msrb.gmra.mxu2 %vm513_vm6, %v813_v37  ;;  %v1439_v35 = vld [vmem:[%s4101_s30 + $0xc90] sm:$0xff] }
 0x108   : > { %2589 = vmatpush.msra.mxu0 %v1436_v38  ;;  %2629 = vmatpush.msra.mxu2 %v1468_v39  ;;  %v1471_v37 = vld [vmem:[%s4101_s30 + $0xd90] sm:$0xff]  ;;  %v445_v38 = vadd.s32 3072, %v4223_v7  ;;  %v447_v39 = vadd.s32 3328, %v4223_v7 }
 0x109   : > { %2544 = vmatpush.msrb.mxu1 %v1373_v40  ;;  %2584 = vmatpush.msrb.mxu3 %v1405_v41  ;;  %v359_v40 = vld [vmem:[%s4103_s6 + $0x38] sm:$0xff] }
 0x10a   : > { %3673 = vmatmul.msk.f32.vlgmr.msrb.gmra.mxu1 %vm512_vm7, %v812_v42  ;;  %3675 = vmatmul.msk.f32.vlgmr.msrb.gmra.mxu3 %vm514_vm8, %v814_v43  ;;  %v376_v41 = vld [vmem:[%s4103_s6 + $0xbe] sm:$0xff]  ;;  %819 = vst [vmem:[#allocation1 + $0x20] ss:$4 sm:$0xff] %v359_v40  ;;  %vm515_vm9 = vcmp.lt.s32.totalorder %v445_v38, %v4236_v19  ;;  %vm517_vm10 = vcmp.lt.s32.totalorder %v447_v39, %v4236_v19  ;;  %v1488_v40 = vld [vmem:[%s4101_s30 + $0xe18] sm:$0xff] }
 0x10b   : > { %2590 = vmatpush.msra.mxu0 %v1435_v44  ;;  %2609 = vmatpush.msra.mxu1 %v1452_v45  ;;  %v1421_v42 = vld [vmem:[%s4101_s30 + $0xc00] sm:$0xff]  ;;  %v1438_v43 = vld [vmem:[%s4101_s30 + $0xc88] sm:$0xff]  ;;  %820 = vst [vmem:[#allocation1 + $0x21] ss:$4 sm:$0xff] %v376_v41 }
 0x10c   : > { %2630 = vmatpush.msra.mxu2 %v1467_v46  ;;  %2649 = vmatpush.msra.mxu3 %v1484_v47  ;;  %v1453_v44 = vld [vmem:[%s4101_s30 + $0xd00] sm:$0xff]  ;;  %v1470_v45 = vld [vmem:[%s4101_s30 + $0xd88] sm:$0xff]  ;;  %v446_v46 = vadd.s32 3200, %v4223_v7 }
 0x10d   : > { %2591 = vmatpush.msra.mxu0 %v1434_v48  ;;  %2610 = vmatpush.msra.mxu1 %v1451_v49  ;;  %v393_v47 = vld [vmem:[%s4103_s6 + $0x144] sm:$0xff]  ;;  %v823_v49 = vld.sshfl [vmem:[#allocation1] sm:$0xff pattern:$0x73625140] }
 0x10e   : > { %2631 = vmatpush.msra.mxu2 %v1466_v50  ;;  %2650 = vmatpush.msra.mxu3 %v1483_v51  ;;  %v410_v48 = vld [vmem:[%s4103_s6 + $0x1ca] sm:$0xff]  ;;  %v448_v50 = vadd.s32 3456, %v4223_v7  ;;  %821 = vst [vmem:[#allocation1 + $0x22] ss:$4 sm:$0xff] %v393_v47  ;;  %vm516_vm11 = vcmp.lt.s32.totalorder %v446_v46, %v4236_v19  ;;  %v1538_v39 = vld [vmem:[%s4101_s30 + $0xfa8] sm:$0xff] }
 0x10f   : > { %2592 = vmatpush.msra.mxu0 %v1433_v52  ;;  %2611 = vmatpush.msra.mxu1 %v1450_v53  ;;  %v825_v51 = vld.sshfl [vmem:[#allocation1 + $0x10] sm:$0xff pattern:$0x73625140]  ;;  %822 = vst [vmem:[#allocation1 + $0x23] ss:$4 sm:$0xff] %v410_v48  ;;  %v1500_v52 = vld [vmem:[%s4101_s30 + $0xe78] sm:$0xff] }
 0x110   : > { %2632 = vmatpush.msra.mxu2 %v1465_v54  ;;  %2651 = vmatpush.msra.mxu3 %v1482_v55  ;;  %v1532_v53 = vld [vmem:[%s4101_s30 + $0xf78] sm:$0xff]  ;;  %v1437_v54 = vld [vmem:[%s4101_s30 + $0xc80] sm:$0xff]  ;;  %vm518_vm12 = vcmp.lt.s32.totalorder %v448_v50, %v4236_v19  ;;  %v1519_v46 = vld [vmem:[%s4101_s30 + $0xf10] sm:$0xff] }
 0x111   : > { %2593 = vmatpush.msra.mxu0 %v1432_v56  ;;  %2612 = vmatpush.msra.mxu1 %v1449_v57  ;;  %v1469_v55 = vld [vmem:[%s4101_s30 + $0xd80] sm:$0xff]  ;;  %v824_v56 = vld.sshfl [vmem:[#allocation1 + $0x8] sm:$0xff pattern:$0x73625140]  ;;  %v1536_v47 = vld [vmem:[%s4101_s30 + $0xf98] sm:$0xff] }
 0x112   : > { %2633 = vmatpush.msra.mxu2 %v1464_v58  ;;  %2652 = vmatpush.msra.mxu3 %v1481_v59  ;;  %v826_v57 = vld.sshfl [vmem:[#allocation1 + $0x18] sm:$0xff pattern:$0x73625140]  ;;  %v1499_v58 = vld [vmem:[%s4101_s30 + $0xe70] sm:$0xff]  ;;  %v1521_v38 = vld [vmem:[%s4101_s30 + $0xf20] sm:$0xff] }
 0x113   : > { %2594 = vmatpush.msra.mxu0 %v1431_v60  ;;  %2613 = vmatpush.msra.mxu1 %v1448_v61  ;;  %v1516_v59 = vld [vmem:[%s4101_s30 + $0xef8] sm:$0xff]  ;;  %v1531_v60 = vld [vmem:[%s4101_s30 + $0xf70] sm:$0xff]  ;;  %v1505_v41 = vld [vmem:[%s4101_s30 + $0xea0] sm:$0xff] }
 0x114   : > { %2634 = vmatpush.msra.mxu2 %v1463_v62  ;;  %2653 = vmatpush.msra.mxu3 %v1480_v63  ;;  %v1548_v61 = vld [vmem:[%s4101_s30 + $0xff8] sm:$0xff]  ;;  %v1498_v62 = vld [vmem:[%s4101_s30 + $0xe68] sm:$0xff]  ;;  %v1515_v63 = vld [vmem:[%s4101_s30 + $0xef0] sm:$0xff] }
 0x115   : > { %2595 = vmatpush.msra.mxu0 %v1430_v0  ;;  %2614 = vmatpush.msra.mxu1 %v1447_v1  ;;  %v1530_v0 = vld [vmem:[%s4101_s30 + $0xf68] sm:$0xff]  ;;  %v1547_v1 = vld [vmem:[%s4101_s30 + $0xff0] sm:$0xff] }
 0x116   : > { %2635 = vmatpush.msra.mxu2 %v1462_v2  ;;  %2654 = vmatpush.msra.mxu3 %v1479_v3  ;;  %v1497_v2 = vld [vmem:[%s4101_s30 + $0xe60] sm:$0xff]  ;;  %v1514_v3 = vld [vmem:[%s4101_s30 + $0xee8] sm:$0xff] }
 0x117   : > { %2596 = vmatpush.msra.mxu0 %v1429_v4  ;;  %2615 = vmatpush.msra.mxu1 %v1446_v5  ;;  %v1529_v4 = vld [vmem:[%s4101_s30 + $0xf60] sm:$0xff]  ;;  %v1546_v5 = vld [vmem:[%s4101_s30 + $0xfe8] sm:$0xff] }
 0x118   : > { %2636 = vmatpush.msra.mxu2 %v1461_v6  ;;  %2655 = vmatpush.msra.mxu3 %v1478_v8  ;;  %v1496_v6 = vld [vmem:[%s4101_s30 + $0xe58] sm:$0xff]  ;;  %v1513_v8 = vld [vmem:[%s4101_s30 + $0xee0] sm:$0xff]  ;;  %v1486_v48 = vld [vmem:[%s4101_s30 + $0xe08] sm:$0xff] }
 0x119   : > { %2597 = vmatpush.msra.mxu0 %v1428_v9  ;;  %2616 = vmatpush.msra.mxu1 %v1445_v10  ;;  %v1528_v9 = vld [vmem:[%s4101_s30 + $0xf58] sm:$0xff]  ;;  %v1545_v10 = vld [vmem:[%s4101_s30 + $0xfe0] sm:$0xff]  ;;  %v1518_v50 = vld [vmem:[%s4101_s30 + $0xf08] sm:$0xff] }
 0x11a   : > { %2637 = vmatpush.msra.mxu2 %v1460_v11  ;;  %2656 = vmatpush.msra.mxu3 %v1477_v12  ;;  %v1495_v11 = vld [vmem:[%s4101_s30 + $0xe50] sm:$0xff]  ;;  %v1512_v12 = vld [vmem:[%s4101_s30 + $0xed8] sm:$0xff] }
 0x11b   : > { %2598 = vmatpush.msra.mxu0 %v1427_v13  ;;  %2617 = vmatpush.msra.mxu1 %v1444_v14  ;;  %v1527_v13 = vld [vmem:[%s4101_s30 + $0xf50] sm:$0xff]  ;;  %v1544_v14 = vld [vmem:[%s4101_s30 + $0xfd8] sm:$0xff] }
 0x11c   : > { %2638 = vmatpush.msra.mxu2 %v1459_v15  ;;  %2657 = vmatpush.msra.mxu3 %v1476_v16  ;;  %v1494_v15 = vld [vmem:[%s4101_s30 + $0xe48] sm:$0xff]  ;;  %v1511_v16 = vld [vmem:[%s4101_s30 + $0xed0] sm:$0xff] }
 0x11d   : > { %2599 = vmatpush.msra.mxu0 %v1426_v17  ;;  %2618 = vmatpush.msra.mxu1 %v1443_v18  ;;  %v1526_v17 = vld [vmem:[%s4101_s30 + $0xf48] sm:$0xff]  ;;  %v1543_v18 = vld [vmem:[%s4101_s30 + $0xfd0] sm:$0xff] }
 0x11e   : > { %2639 = vmatpush.msra.mxu2 %v1458_v20  ;;  %2658 = vmatpush.msra.mxu3 %v1475_v21  ;;  %v1493_v20 = vld [vmem:[%s4101_s30 + $0xe40] sm:$0xff]  ;;  %v1510_v21 = vld [vmem:[%s4101_s30 + $0xec8] sm:$0xff] }
 0x11f   : > { %2600 = vmatpush.msra.mxu0 %v1425_v22  ;;  %2619 = vmatpush.msra.mxu1 %v1442_v23  ;;  %v1525_v22 = vld [vmem:[%s4101_s30 + $0xf40] sm:$0xff]  ;;  %v1542_v23 = vld [vmem:[%s4101_s30 + $0xfc8] sm:$0xff] }
 0x120   : > { %2640 = vmatpush.msra.mxu2 %v1457_v24  ;;  %2659 = vmatpush.msra.mxu3 %v1474_v25  ;;  %v1492_v24 = vld [vmem:[%s4101_s30 + $0xe38] sm:$0xff]  ;;  %v1509_v25 = vld [vmem:[%s4101_s30 + $0xec0] sm:$0xff] }
 0x121   : > { %2601 = vmatpush.msra.mxu0 %v1424_v26  ;;  %2620 = vmatpush.msra.mxu1 %v1441_v27  ;;  %v1524_v26 = vld [vmem:[%s4101_s30 + $0xf38] sm:$0xff]  ;;  %v1541_v27 = vld [vmem:[%s4101_s30 + $0xfc0] sm:$0xff] }
 0x122   : > { %2641 = vmatpush.msra.mxu2 %v1456_v28  ;;  %2660 = vmatpush.msra.mxu3 %v1473_v29  ;;  %v1491_v28 = vld [vmem:[%s4101_s30 + $0xe30] sm:$0xff]  ;;  %v1508_v29 = vld [vmem:[%s4101_s30 + $0xeb8] sm:$0xff] }
 0x123   : > { %2602 = vmatpush.msra.mxu0 %v1423_v30  ;;  %2621 = vmatpush.msra.mxu1 %v1440_v31  ;;  %v1523_v30 = vld [vmem:[%s4101_s30 + $0xf30] sm:$0xff]  ;;  %v1540_v31 = vld [vmem:[%s4101_s30 + $0xfb8] sm:$0xff] }
 0x124   : > { %2642 = vmatpush.msra.mxu2 %v1455_v32  ;;  %2661 = vmatpush.msra.mxu3 %v1472_v33  ;;  %v1490_v32 = vld [vmem:[%s4101_s30 + $0xe28] sm:$0xff]  ;;  %v1507_v33 = vld [vmem:[%s4101_s30 + $0xeb0] sm:$0xff] }
 0x125   : > { %2603 = vmatpush.msra.mxu0 %v1422_v34  ;;  %2622 = vmatpush.msra.mxu1 %v1439_v35  ;;  %v1522_v34 = vld [vmem:[%s4101_s30 + $0xf28] sm:$0xff]  ;;  %v1539_v35 = vld [vmem:[%s4101_s30 + $0xfb0] sm:$0xff] }
 0x126   : > { %2643 = vmatpush.msra.mxu2 %v1454_v36  ;;  %2662 = vmatpush.msra.mxu3 %v1471_v37  ;;  %v1489_v36 = vld [vmem:[%s4101_s30 + $0xe20] sm:$0xff]  ;;  %v1506_v37 = vld [vmem:[%s4101_s30 + $0xea8] sm:$0xff] }
 0x127   : > { %2604 = vmatpush.msra.mxu0 %v1421_v42  ;;  %2623 = vmatpush.msra.mxu1 %v1438_v43  ;;  %v1520_v42 = vld [vmem:[%s4101_s30 + $0xf18] sm:$0xff]  ;;  %v1537_v43 = vld [vmem:[%s4101_s30 + $0xfa0] sm:$0xff] }
 0x128   : > { %2644 = vmatpush.msra.mxu2 %v1453_v44  ;;  %2663 = vmatpush.msra.mxu3 %v1470_v45  ;;  %v1487_v44 = vld [vmem:[%s4101_s30 + $0xe10] sm:$0xff]  ;;  %v1504_v45 = vld [vmem:[%s4101_s30 + $0xe98] sm:$0xff] }
 0x129   : > { %3676 = vmatmul.msk.f32.vlgmr.msra.gmra.mxu0 %vm515_vm9, %v823_v49  ;;  %3678 = vmatmul.msk.f32.vlgmr.msra.gmra.mxu2 %vm517_vm10, %v825_v51  ;;  %v1503_v49 = vld [vmem:[%s4101_s30 + $0xe90] sm:$0xff] }
 0x12a   : > { %2669 = vmatpush.msrb.mxu0 %v1500_v52  ;;  %2709 = vmatpush.msrb.mxu2 %v1532_v53  ;;  %v1535_v51 = vld [vmem:[%s4101_s30 + $0xf90] sm:$0xff]  ;;  %v449_v52 = vadd.s32 3584, %v4223_v7  ;;  %v451_v53 = vadd.s32 3840, %v4223_v7 }
 0x12b   : > { %2624 = vmatpush.msra.mxu1 %v1437_v54  ;;  %2664 = vmatpush.msra.mxu3 %v1469_v55  ;;  %v360_v54 = vld [vmem:[%s4103_s6 + $0x40] sm:$0xff] }
 0x12c   : > { %3677 = vmatmul.msk.f32.vlgmr.msra.gmra.mxu1 %vm516_vm11, %v824_v56  ;;  %3679 = vmatmul.msk.f32.vlgmr.msra.gmra.mxu3 %vm518_vm12, %v826_v57  ;;  %v377_v55 = vld [vmem:[%s4103_s6 + $0xc6] sm:$0xff]  ;;  %v1485_v56 = vld [vmem:[%s4101_s30 + $0xe00] sm:$0xff]  ;;  %831 = vst [vmem:[#allocation1] ss:$4 sm:$0xff] %v360_v54  ;;  %vm519_vm13 = vcmp.lt.s32.totalorder %v449_v52, %v4236_v19  ;;  %vm521_vm14 = vcmp.lt.s32.totalorder %v451_v53, %v4236_v19 }
 0x12d   : > { %2670 = vmatpush.msrb.mxu0 %v1499_v58  ;;  %2689 = vmatpush.msrb.mxu1 %v1516_v59  ;;  %v1502_v57 = vld [vmem:[%s4101_s30 + $0xe88] sm:$0xff]  ;;  %v1517_v58 = vld [vmem:[%s4101_s30 + $0xf00] sm:$0xff]  ;;  %832 = vst [vmem:[#allocation1 + $0x1] ss:$4 sm:$0xff] %v377_v55  ;;  %v1552_v54 = vld [vmem:[%s4101_s30 + $0x1018] sm:$0xff] }
 0x12e   : > { %2710 = vmatpush.msrb.mxu2 %v1531_v60  ;;  %2729 = vmatpush.msrb.mxu3 %v1548_v61  ;;  %v1534_v59 = vld [vmem:[%s4101_s30 + $0xf88] sm:$0xff]  ;;  %v450_v60 = vadd.s32 3712, %v4223_v7  ;;  %v394_v61 = vld [vmem:[%s4103_s6 + $0x14c] sm:$0xff] }
 0x12f   : > { %2671 = vmatpush.msrb.mxu0 %v1498_v62  ;;  %2690 = vmatpush.msrb.mxu1 %v1515_v63  ;;  %v411_v62 = vld [vmem:[%s4103_s6 + $0x1d2] sm:$0xff]  ;;  %833 = vst [vmem:[#allocation1 + $0x2] ss:$4 sm:$0xff] %v394_v61 }
 0x130   : > { %2711 = vmatpush.msrb.mxu2 %v1530_v0  ;;  %2730 = vmatpush.msrb.mxu3 %v1547_v1  ;;  %v827_v63 = vld.sshfl [vmem:[#allocation1 + $0x20] sm:$0xff pattern:$0x73625140]  ;;  %v452_v0 = vadd.s32 3968, %v4223_v7  ;;  %834 = vst [vmem:[#allocation1 + $0x3] ss:$4 sm:$0xff] %v411_v62  ;;  %vm520_vm15 = vcmp.lt.s32.totalorder %v450_v60, %v4236_v19 }
 0x131   : > { %2672 = vmatpush.msrb.mxu0 %v1497_v2  ;;  %2691 = vmatpush.msrb.mxu1 %v1514_v3  ;;  %v829_v1 = vld.sshfl [vmem:[#allocation1 + $0x30] sm:$0xff pattern:$0x73625140]  ;;  %v1564_v2 = vld [vmem:[%s4101_s30 + $0x1078] sm:$0xff]  ;;  %v1585_v52 = vld [vmem:[%s4101_s30 + $0x1120] sm:$0xff] }
 0x132   : > { %2712 = vmatpush.msrb.mxu2 %v1529_v4  ;;  %2731 = vmatpush.msrb.mxu3 %v1546_v5  ;;  %v1596_v3 = vld [vmem:[%s4101_s30 + $0x1178] sm:$0xff]  ;;  %v1501_v4 = vld [vmem:[%s4101_s30 + $0xe80] sm:$0xff]  ;;  %vm522_vm0 = vcmp.lt.s32.totalorder %v452_v0, %v4236_v19  ;;  %v1602_v53 = vld [vmem:[%s4101_s30 + $0x11a8] sm:$0xff] }
 0x133   : > { %2673 = vmatpush.msrb.mxu0 %v1496_v6  ;;  %2692 = vmatpush.msrb.mxu1 %v1513_v8  ;;  %v1533_v5 = vld [vmem:[%s4101_s30 + $0xf80] sm:$0xff]  ;;  %v828_v6 = vld.sshfl [vmem:[#allocation1 + $0x28] sm:$0xff pattern:$0x73625140]  ;;  %v1583_v60 = vld [vmem:[%s4101_s30 + $0x1110] sm:$0xff] }
 0x134   : > { %2713 = vmatpush.msrb.mxu2 %v1528_v9  ;;  %2732 = vmatpush.msrb.mxu3 %v1545_v10  ;;  %v830_v8 = vld.sshfl [vmem:[#allocation1 + $0x38] sm:$0xff pattern:$0x73625140]  ;;  %v1563_v9 = vld [vmem:[%s4101_s30 + $0x1070] sm:$0xff]  ;;  %v1569_v55 = vld [vmem:[%s4101_s30 + $0x10a0] sm:$0xff] }
 0x135   : > { %2674 = vmatpush.msrb.mxu0 %v1495_v11  ;;  %2693 = vmatpush.msrb.mxu1 %v1512_v12  ;;  %v1580_v10 = vld [vmem:[%s4101_s30 + $0x10f8] sm:$0xff]  ;;  %v1595_v11 = vld [vmem:[%s4101_s30 + $0x1170] sm:$0xff]  ;;  %v1550_v62 = vld [vmem:[%s4101_s30 + $0x1008] sm:$0xff] }
 0x136   : > { %2714 = vmatpush.msrb.mxu2 %v1527_v13  ;;  %2733 = vmatpush.msrb.mxu3 %v1544_v14  ;;  %v1612_v12 = vld [vmem:[%s4101_s30 + $0x11f8] sm:$0xff]  ;;  %v1562_v13 = vld [vmem:[%s4101_s30 + $0x1068] sm:$0xff]  ;;  %v1579_v14 = vld [vmem:[%s4101_s30 + $0x10f0] sm:$0xff] }
 0x137   : > { %2675 = vmatpush.msrb.mxu0 %v1494_v15  ;;  %2694 = vmatpush.msrb.mxu1 %v1511_v16  ;;  %v1594_v15 = vld [vmem:[%s4101_s30 + $0x1168] sm:$0xff]  ;;  %v1611_v16 = vld [vmem:[%s4101_s30 + $0x11f0] sm:$0xff]  ;;  %v1600_v61 = vld [vmem:[%s4101_s30 + $0x1198] sm:$0xff] }
 0x138   : > { %2715 = vmatpush.msrb.mxu2 %v1526_v17  ;;  %2734 = vmatpush.msrb.mxu3 %v1543_v18  ;;  %v1561_v17 = vld [vmem:[%s4101_s30 + $0x1060] sm:$0xff]  ;;  %v1578_v18 = vld [vmem:[%s4101_s30 + $0x10e8] sm:$0xff] }
 0x139   : > { %2676 = vmatpush.msrb.mxu0 %v1493_v20  ;;  %2695 = vmatpush.msrb.mxu1 %v1510_v21  ;;  %v1593_v20 = vld [vmem:[%s4101_s30 + $0x1160] sm:$0xff]  ;;  %v1610_v21 = vld [vmem:[%s4101_s30 + $0x11e8] sm:$0xff] }
 0x13a   : > { %2716 = vmatpush.msrb.mxu2 %v1525_v22  ;;  %2735 = vmatpush.msrb.mxu3 %v1542_v23  ;;  %v1560_v22 = vld [vmem:[%s4101_s30 + $0x1058] sm:$0xff]  ;;  %v1577_v23 = vld [vmem:[%s4101_s30 + $0x10e0] sm:$0xff]  ;;  %v1582_v0 = vld [vmem:[%s4101_s30 + $0x1108] sm:$0xff] }
 0x13b   : > { %2677 = vmatpush.msrb.mxu0 %v1492_v24  ;;  %2696 = vmatpush.msrb.mxu1 %v1509_v25  ;;  %v1592_v24 = vld [vmem:[%s4101_s30 + $0x1158] sm:$0xff]  ;;  %v1609_v25 = vld [vmem:[%s4101_s30 + $0x11e0] sm:$0xff] }
 0x13c   : > { %2717 = vmatpush.msrb.mxu2 %v1524_v26  ;;  %2736 = vmatpush.msrb.mxu3 %v1541_v27  ;;  %v1559_v26 = vld [vmem:[%s4101_s30 + $0x1050] sm:$0xff]  ;;  %v1576_v27 = vld [vmem:[%s4101_s30 + $0x10d8] sm:$0xff] }
 0x13d   : > { %2678 = vmatpush.msrb.mxu0 %v1491_v28  ;;  %2697 = vmatpush.msrb.mxu1 %v1508_v29  ;;  %v1591_v28 = vld [vmem:[%s4101_s30 + $0x1150] sm:$0xff]  ;;  %v1608_v29 = vld [vmem:[%s4101_s30 + $0x11d8] sm:$0xff] }
 0x13e   : > { %2718 = vmatpush.msrb.mxu2 %v1523_v30  ;;  %2737 = vmatpush.msrb.mxu3 %v1540_v31  ;;  %v1558_v30 = vld [vmem:[%s4101_s30 + $0x1048] sm:$0xff]  ;;  %v1575_v31 = vld [vmem:[%s4101_s30 + $0x10d0] sm:$0xff] }
 0x13f   : > { %2679 = vmatpush.msrb.mxu0 %v1490_v32  ;;  %2698 = vmatpush.msrb.mxu1 %v1507_v33  ;;  %v1590_v32 = vld [vmem:[%s4101_s30 + $0x1148] sm:$0xff]  ;;  %v1607_v33 = vld [vmem:[%s4101_s30 + $0x11d0] sm:$0xff] }
 0x140   : > { %2719 = vmatpush.msrb.mxu2 %v1522_v34  ;;  %2738 = vmatpush.msrb.mxu3 %v1539_v35  ;;  %v1557_v34 = vld [vmem:[%s4101_s30 + $0x1040] sm:$0xff]  ;;  %v1574_v35 = vld [vmem:[%s4101_s30 + $0x10c8] sm:$0xff] }
 0x141   : > { %2680 = vmatpush.msrb.mxu0 %v1489_v36  ;;  %2699 = vmatpush.msrb.mxu1 %v1506_v37  ;;  %v1589_v36 = vld [vmem:[%s4101_s30 + $0x1140] sm:$0xff]  ;;  %v1606_v37 = vld [vmem:[%s4101_s30 + $0x11c8] sm:$0xff] }
 0x142   : > { %2720 = vmatpush.msrb.mxu2 %v1521_v38  ;;  %2739 = vmatpush.msrb.mxu3 %v1538_v39  ;;  %v1556_v38 = vld [vmem:[%s4101_s30 + $0x1038] sm:$0xff]  ;;  %v1573_v39 = vld [vmem:[%s4101_s30 + $0x10c0] sm:$0xff] }
 0x143   : > { %2681 = vmatpush.msrb.mxu0 %v1488_v40  ;;  %2700 = vmatpush.msrb.mxu1 %v1505_v41  ;;  %v1588_v40 = vld [vmem:[%s4101_s30 + $0x1138] sm:$0xff]  ;;  %v1605_v41 = vld [vmem:[%s4101_s30 + $0x11c0] sm:$0xff] }
 0x144   : > { %2721 = vmatpush.msrb.mxu2 %v1520_v42  ;;  %2740 = vmatpush.msrb.mxu3 %v1537_v43  ;;  %v1555_v42 = vld [vmem:[%s4101_s30 + $0x1030] sm:$0xff]  ;;  %v1572_v43 = vld [vmem:[%s4101_s30 + $0x10b8] sm:$0xff] }
 0x145   : > { %2682 = vmatpush.msrb.mxu0 %v1487_v44  ;;  %2701 = vmatpush.msrb.mxu1 %v1504_v45  ;;  %v1587_v44 = vld [vmem:[%s4101_s30 + $0x1130] sm:$0xff]  ;;  %v1604_v45 = vld [vmem:[%s4101_s30 + $0x11b8] sm:$0xff] }
 0x146   : > { %2722 = vmatpush.msrb.mxu2 %v1519_v46  ;;  %2741 = vmatpush.msrb.mxu3 %v1536_v47  ;;  %v1554_v46 = vld [vmem:[%s4101_s30 + $0x1028] sm:$0xff]  ;;  %v1571_v47 = vld [vmem:[%s4101_s30 + $0x10b0] sm:$0xff] }
 0x147   : > { %2683 = vmatpush.msrb.mxu0 %v1486_v48  ;;  %2702 = vmatpush.msrb.mxu1 %v1503_v49  ;;  %v1586_v48 = vld [vmem:[%s4101_s30 + $0x1128] sm:$0xff]  ;;  %v1603_v49 = vld [vmem:[%s4101_s30 + $0x11b0] sm:$0xff] }
 0x148   : > { %2723 = vmatpush.msrb.mxu2 %v1518_v50  ;;  %2742 = vmatpush.msrb.mxu3 %v1535_v51  ;;  %v1553_v50 = vld [vmem:[%s4101_s30 + $0x1020] sm:$0xff]  ;;  %v1570_v51 = vld [vmem:[%s4101_s30 + $0x10a8] sm:$0xff] }
 0x149   : > { %2684 = vmatpush.msrb.mxu0 %v1485_v56  ;;  %2703 = vmatpush.msrb.mxu1 %v1502_v57  ;;  %v1584_v56 = vld [vmem:[%s4101_s30 + $0x1118] sm:$0xff]  ;;  %v1601_v57 = vld [vmem:[%s4101_s30 + $0x11a0] sm:$0xff] }
 0x14a   : > { %2724 = vmatpush.msrb.mxu2 %v1517_v58  ;;  %2743 = vmatpush.msrb.mxu3 %v1534_v59  ;;  %v1551_v58 = vld [vmem:[%s4101_s30 + $0x1010] sm:$0xff]  ;;  %v1568_v59 = vld [vmem:[%s4101_s30 + $0x1098] sm:$0xff] }
 0x14b   : > { %3680 = vmatmul.msk.f32.vlgmr.msrb.gmra.mxu0 %vm519_vm13, %v827_v63  ;;  %3682 = vmatmul.msk.f32.vlgmr.msrb.gmra.mxu2 %vm521_vm14, %v829_v1  ;;  %v1567_v63 = vld [vmem:[%s4101_s30 + $0x1090] sm:$0xff] }
 0x14c   : > { %2749 = vmatpush.msra.mxu0 %v1564_v2  ;;  %2789 = vmatpush.msra.mxu2 %v1596_v3  ;;  %v1599_v1 = vld [vmem:[%s4101_s30 + $0x1190] sm:$0xff]  ;;  %v453_v2 = vadd.s32 4096, %v4223_v7  ;;  %v455_v3 = vadd.s32 4352, %v4223_v7 }
 0x14d   : > { %2704 = vmatpush.msrb.mxu1 %v1501_v4  ;;  %2744 = vmatpush.msrb.mxu3 %v1533_v5  ;;  %v361_v4 = vld [vmem:[%s4103_s6 + $0x48] sm:$0xff] }
 0x14e   : > { %3681 = vmatmul.msk.f32.vlgmr.msrb.gmra.mxu1 %vm520_vm15, %v828_v6  ;;  %3683 = vmatmul.msk.f32.vlgmr.msrb.gmra.mxu3 %vm522_vm0, %v830_v8  ;;  %v378_v5 = vld [vmem:[%s4103_s6 + $0xce] sm:$0xff]  ;;  %v1566_v8 = vld [vmem:[%s4101_s30 + $0x1088] sm:$0xff]  ;;  %835 = vst [vmem:[#allocation1 + $0x20] ss:$4 sm:$0xff] %v361_v4  ;;  %vm523_vm1 = vcmp.lt.s32.totalorder %v453_v2, %v4236_v19  ;;  %vm525_vm2 = vcmp.lt.s32.totalorder %v455_v3, %v4236_v19 }
 0x14f   : > { %2750 = vmatpush.msra.mxu0 %v1563_v9  ;;  %2769 = vmatpush.msra.mxu1 %v1580_v10  ;;  %v1549_v6 = vld [vmem:[%s4101_s30 + $0x1000] sm:$0xff]  ;;  %v1598_v10 = vld [vmem:[%s4101_s30 + $0x1188] sm:$0xff]  ;;  %836 = vst [vmem:[#allocation1 + $0x21] ss:$4 sm:$0xff] %v378_v5  ;;  %v1616_v4 = vld [vmem:[%s4101_s30 + $0x1218] sm:$0xff] }
 0x150   : > { %2790 = vmatpush.msra.mxu2 %v1595_v11  ;;  %2809 = vmatpush.msra.mxu3 %v1612_v12  ;;  %v1581_v9 = vld [vmem:[%s4101_s30 + $0x1100] sm:$0xff]  ;;  %v454_v11 = vadd.s32 4224, %v4223_v7  ;;  %v1666_v3 = vld [vmem:[%s4101_s30 + $0x13a8] sm:$0xff] }
 0x151   : > { %2751 = vmatpush.msra.mxu0 %v1562_v13  ;;  %2770 = vmatpush.msra.mxu1 %v1579_v14  ;;  %v395_v12 = vld [vmem:[%s4103_s6 + $0x154] sm:$0xff] }
 0x152   : > { %2791 = vmatpush.msra.mxu2 %v1594_v15  ;;  %2810 = vmatpush.msra.mxu3 %v1611_v16  ;;  %v412_v13 = vld [vmem:[%s4103_s6 + $0x1da] sm:$0xff]  ;;  %v456_v15 = vadd.s32 4480, %v4223_v7  ;;  %837 = vst [vmem:[#allocation1 + $0x22] ss:$4 sm:$0xff] %v395_v12  ;;  %vm524_vm3 = vcmp.lt.s32.totalorder %v454_v11, %v4236_v19  ;;  %v1664_v12 = vld [vmem:[%s4101_s30 + $0x1398] sm:$0xff] }
 0x153   : > { %2752 = vmatpush.msra.mxu0 %v1561_v17  ;;  %2771 = vmatpush.msra.mxu1 %v1578_v18  ;;  %v839_v14 = vld.sshfl [vmem:[#allocation1] sm:$0xff pattern:$0x73625140]  ;;  %v841_v16 = vld.sshfl [vmem:[#allocation1 + $0x10] sm:$0xff pattern:$0x73625140] }
 0x154   : > { %2792 = vmatpush.msra.mxu2 %v1593_v20  ;;  %2811 = vmatpush.msra.mxu3 %v1610_v21  ;;  %838 = vst [vmem:[#allocation1 + $0x23] ss:$4 sm:$0xff] %v412_v13  ;;  %v1628_v17 = vld [vmem:[%s4101_s30 + $0x1278] sm:$0xff]  ;;  %v1565_v20 = vld [vmem:[%s4101_s30 + $0x1080] sm:$0xff]  ;;  %vm526_vm4 = vcmp.lt.s32.totalorder %v456_v15, %v4236_v19  ;;  %v1647_v11 = vld [vmem:[%s4101_s30 + $0x1310] sm:$0xff] }
 0x155   : > { %2753 = vmatpush.msra.mxu0 %v1560_v22  ;;  %2772 = vmatpush.msra.mxu1 %v1577_v23  ;;  %v1660_v18 = vld [vmem:[%s4101_s30 + $0x1378] sm:$0xff]  ;;  %v1597_v21 = vld [vmem:[%s4101_s30 + $0x1180] sm:$0xff]  ;;  %v840_v22 = vld.sshfl [vmem:[#allocation1 + $0x8] sm:$0xff pattern:$0x73625140] }
 0x156   : > { %2793 = vmatpush.msra.mxu2 %v1592_v24  ;;  %2812 = vmatpush.msra.mxu3 %v1609_v25  ;;  %v842_v23 = vld.sshfl [vmem:[#allocation1 + $0x18] sm:$0xff pattern:$0x73625140]  ;;  %v1627_v24 = vld [vmem:[%s4101_s30 + $0x1270] sm:$0xff]  ;;  %v1649_v2 = vld [vmem:[%s4101_s30 + $0x1320] sm:$0xff] }
 0x157   : > { %2754 = vmatpush.msra.mxu0 %v1559_v26  ;;  %2773 = vmatpush.msra.mxu1 %v1576_v27  ;;  %v1644_v25 = vld [vmem:[%s4101_s30 + $0x12f8] sm:$0xff]  ;;  %v1659_v26 = vld [vmem:[%s4101_s30 + $0x1370] sm:$0xff]  ;;  %v1633_v5 = vld [vmem:[%s4101_s30 + $0x12a0] sm:$0xff] }
 0x158   : > { %2794 = vmatpush.msra.mxu2 %v1591_v28  ;;  %2813 = vmatpush.msra.mxu3 %v1608_v29  ;;  %v1676_v27 = vld [vmem:[%s4101_s30 + $0x13f8] sm:$0xff]  ;;  %v1626_v28 = vld [vmem:[%s4101_s30 + $0x1268] sm:$0xff]  ;;  %v1643_v29 = vld [vmem:[%s4101_s30 + $0x12f0] sm:$0xff] }
 0x159   : > { %2755 = vmatpush.msra.mxu0 %v1558_v30  ;;  %2774 = vmatpush.msra.mxu1 %v1575_v31  ;;  %v1658_v30 = vld [vmem:[%s4101_s30 + $0x1368] sm:$0xff]  ;;  %v1675_v31 = vld [vmem:[%s4101_s30 + $0x13f0] sm:$0xff] }
 0x15a   : > { %2795 = vmatpush.msra.mxu2 %v1590_v32  ;;  %2814 = vmatpush.msra.mxu3 %v1607_v33  ;;  %v1625_v32 = vld [vmem:[%s4101_s30 + $0x1260] sm:$0xff]  ;;  %v1642_v33 = vld [vmem:[%s4101_s30 + $0x12e8] sm:$0xff] }
 0x15b   : > { %2756 = vmatpush.msra.mxu0 %v1557_v34  ;;  %2775 = vmatpush.msra.mxu1 %v1574_v35  ;;  %v1657_v34 = vld [vmem:[%s4101_s30 + $0x1360] sm:$0xff]  ;;  %v1674_v35 = vld [vmem:[%s4101_s30 + $0x13e8] sm:$0xff] }
 0x15c   : > { %2796 = vmatpush.msra.mxu2 %v1589_v36  ;;  %2815 = vmatpush.msra.mxu3 %v1606_v37  ;;  %v1624_v36 = vld [vmem:[%s4101_s30 + $0x1258] sm:$0xff]  ;;  %v1641_v37 = vld [vmem:[%s4101_s30 + $0x12e0] sm:$0xff]  ;;  %v1614_v13 = vld [vmem:[%s4101_s30 + $0x1208] sm:$0xff] }
 0x15d   : > { %2757 = vmatpush.msra.mxu0 %v1556_v38  ;;  %2776 = vmatpush.msra.mxu1 %v1573_v39  ;;  %v1656_v38 = vld [vmem:[%s4101_s30 + $0x1358] sm:$0xff]  ;;  %v1673_v39 = vld [vmem:[%s4101_s30 + $0x13e0] sm:$0xff]  ;;  %v1646_v15 = vld [vmem:[%s4101_s30 + $0x1308] sm:$0xff] }
 0x15e   : > { %2797 = vmatpush.msra.mxu2 %v1588_v40  ;;  %2816 = vmatpush.msra.mxu3 %v1605_v41  ;;  %v1623_v40 = vld [vmem:[%s4101_s30 + $0x1250] sm:$0xff]  ;;  %v1640_v41 = vld [vmem:[%s4101_s30 + $0x12d8] sm:$0xff] }
 0x15f   : > { %2758 = vmatpush.msra.mxu0 %v1555_v42  ;;  %2777 = vmatpush.msra.mxu1 %v1572_v43  ;;  %v1655_v42 = vld [vmem:[%s4101_s30 + $0x1350] sm:$0xff]  ;;  %v1672_v43 = vld [vmem:[%s4101_s30 + $0x13d8] sm:$0xff] }
 0x160   : > { %2798 = vmatpush.msra.mxu2 %v1587_v44  ;;  %2817 = vmatpush.msra.mxu3 %v1604_v45  ;;  %v1622_v44 = vld [vmem:[%s4101_s30 + $0x1248] sm:$0xff]  ;;  %v1639_v45 = vld [vmem:[%s4101_s30 + $0x12d0] sm:$0xff] }
 0x161   : > { %2759 = vmatpush.msra.mxu0 %v1554_v46  ;;  %2778 = vmatpush.msra.mxu1 %v1571_v47  ;;  %v1654_v46 = vld [vmem:[%s4101_s30 + $0x1348] sm:$0xff]  ;;  %v1671_v47 = vld [vmem:[%s4101_s30 + $0x13d0] sm:$0xff] }
 0x162   : > { %2799 = vmatpush.msra.mxu2 %v1586_v48  ;;  %2818 = vmatpush.msra.mxu3 %v1603_v49  ;;  %v1621_v48 = vld [vmem:[%s4101_s30 + $0x1240] sm:$0xff]  ;;  %v1638_v49 = vld [vmem:[%s4101_s30 + $0x12c8] sm:$0xff] }
 0x163   : > { %2760 = vmatpush.msra.mxu0 %v1553_v50  ;;  %2779 = vmatpush.msra.mxu1 %v1570_v51  ;;  %v1653_v50 = vld [vmem:[%s4101_s30 + $0x1340] sm:$0xff]  ;;  %v1670_v51 = vld [vmem:[%s4101_s30 + $0x13c8] sm:$0xff] }
 0x164   : > { %2800 = vmatpush.msra.mxu2 %v1585_v52  ;;  %2819 = vmatpush.msra.mxu3 %v1602_v53  ;;  %v1620_v52 = vld [vmem:[%s4101_s30 + $0x1238] sm:$0xff]  ;;  %v1637_v53 = vld [vmem:[%s4101_s30 + $0x12c0] sm:$0xff] }
 0x165   : > { %2761 = vmatpush.msra.mxu0 %v1552_v54  ;;  %2780 = vmatpush.msra.mxu1 %v1569_v55  ;;  %v1652_v54 = vld [vmem:[%s4101_s30 + $0x1338] sm:$0xff]  ;;  %v1669_v55 = vld [vmem:[%s4101_s30 + $0x13c0] sm:$0xff] }
 0x166   : > { %2801 = vmatpush.msra.mxu2 %v1584_v56  ;;  %2820 = vmatpush.msra.mxu3 %v1601_v57  ;;  %v1619_v56 = vld [vmem:[%s4101_s30 + $0x1230] sm:$0xff]  ;;  %v1636_v57 = vld [vmem:[%s4101_s30 + $0x12b8] sm:$0xff] }
 0x167   : > { %2762 = vmatpush.msra.mxu0 %v1551_v58  ;;  %2781 = vmatpush.msra.mxu1 %v1568_v59  ;;  %v1651_v58 = vld [vmem:[%s4101_s30 + $0x1330] sm:$0xff]  ;;  %v1668_v59 = vld [vmem:[%s4101_s30 + $0x13b8] sm:$0xff] }
 0x168   : > { %2802 = vmatpush.msra.mxu2 %v1583_v60  ;;  %2821 = vmatpush.msra.mxu3 %v1600_v61  ;;  %v1618_v60 = vld [vmem:[%s4101_s30 + $0x1228] sm:$0xff]  ;;  %v1635_v61 = vld [vmem:[%s4101_s30 + $0x12b0] sm:$0xff] }
 0x169   : > { %2763 = vmatpush.msra.mxu0 %v1550_v62  ;;  %2782 = vmatpush.msra.mxu1 %v1567_v63  ;;  %v1650_v62 = vld [vmem:[%s4101_s30 + $0x1328] sm:$0xff]  ;;  %v1667_v63 = vld [vmem:[%s4101_s30 + $0x13b0] sm:$0xff] }
 0x16a   : > { %2803 = vmatpush.msra.mxu2 %v1582_v0  ;;  %2822 = vmatpush.msra.mxu3 %v1599_v1  ;;  %v1617_v0 = vld [vmem:[%s4101_s30 + $0x1220] sm:$0xff]  ;;  %v1634_v1 = vld [vmem:[%s4101_s30 + $0x12a8] sm:$0xff] }
 0x16b   : > { %2764 = vmatpush.msra.mxu0 %v1549_v6  ;;  %2783 = vmatpush.msra.mxu1 %v1566_v8  ;;  %v1648_v6 = vld [vmem:[%s4101_s30 + $0x1318] sm:$0xff]  ;;  %v1665_v8 = vld [vmem:[%s4101_s30 + $0x13a0] sm:$0xff] }
 0x16c   : > { %2804 = vmatpush.msra.mxu2 %v1581_v9  ;;  %2823 = vmatpush.msra.mxu3 %v1598_v10  ;;  %v1615_v9 = vld [vmem:[%s4101_s30 + $0x1210] sm:$0xff]  ;;  %v1632_v10 = vld [vmem:[%s4101_s30 + $0x1298] sm:$0xff] }
 0x16d   : > { %3684 = vmatmul.msk.f32.vlgmr.msra.gmra.mxu0 %vm523_vm1, %v839_v14  ;;  %3686 = vmatmul.msk.f32.vlgmr.msra.gmra.mxu2 %vm525_vm2, %v841_v16  ;;  %v1631_v14 = vld [vmem:[%s4101_s30 + $0x1290] sm:$0xff] }
 0x16e   : > { %2829 = vmatpush.msrb.mxu0 %v1628_v17  ;;  %2869 = vmatpush.msrb.mxu2 %v1660_v18  ;;  %v1663_v16 = vld [vmem:[%s4101_s30 + $0x1390] sm:$0xff]  ;;  %v457_v17 = vadd.s32 4608, %v4223_v7  ;;  %v459_v18 = vadd.s32 4864, %v4223_v7 }
 0x16f   : > { %2784 = vmatpush.msra.mxu1 %v1565_v20  ;;  %2824 = vmatpush.msra.mxu3 %v1597_v21  ;;  %v362_v20 = vld [vmem:[%s4103_s6 + $0x50] sm:$0xff] }
 0x170   : > { %3685 = vmatmul.msk.f32.vlgmr.msra.gmra.mxu1 %vm524_vm3, %v840_v22  ;;  %3687 = vmatmul.msk.f32.vlgmr.msra.gmra.mxu3 %vm526_vm4, %v842_v23  ;;  %v379_v21 = vld [vmem:[%s4103_s6 + $0xd6] sm:$0xff]  ;;  %847 = vst [vmem:[#allocation1] ss:$4 sm:$0xff] %v362_v20  ;;  %vm527_vm5 = vcmp.lt.s32.totalorder %v457_v17, %v4236_v19  ;;  %vm529_vm6 = vcmp.lt.s32.totalorder %v459_v18, %v4236_v19 }
 0x171   : > { %2830 = vmatpush.msrb.mxu0 %v1627_v24  ;;  %2849 = vmatpush.msrb.mxu1 %v1644_v25  ;;  %v1613_v22 = vld [vmem:[%s4101_s30 + $0x1200] sm:$0xff]  ;;  %v1630_v23 = vld [vmem:[%s4101_s30 + $0x1288] sm:$0xff]  ;;  %848 = vst [vmem:[#allocation1 + $0x1] ss:$4 sm:$0xff] %v379_v21  ;;  %v1680_v20 = vld [vmem:[%s4101_s30 + $0x1418] sm:$0xff] }
 0x172   : > { %2870 = vmatpush.msrb.mxu2 %v1659_v26  ;;  %2889 = vmatpush.msrb.mxu3 %v1676_v27  ;;  %v1645_v24 = vld [vmem:[%s4101_s30 + $0x1300] sm:$0xff]  ;;  %v1662_v25 = vld [vmem:[%s4101_s30 + $0x1388] sm:$0xff]  ;;  %v458_v26 = vadd.s32 4736, %v4223_v7 }
 0x173   : > { %2831 = vmatpush.msrb.mxu0 %v1626_v28  ;;  %2850 = vmatpush.msrb.mxu1 %v1643_v29  ;;  %v396_v27 = vld [vmem:[%s4103_s6 + $0x15c] sm:$0xff] }
 0x174   : > { %2871 = vmatpush.msrb.mxu2 %v1658_v30  ;;  %2890 = vmatpush.msrb.mxu3 %v1675_v31  ;;  %v413_v28 = vld [vmem:[%s4103_s6 + $0x1e2] sm:$0xff]  ;;  %v843_v29 = vld.sshfl [vmem:[#allocation1 + $0x20] sm:$0xff pattern:$0x73625140]  ;;  %v460_v30 = vadd.s32 4992, %v4223_v7  ;;  %vm528_vm7 = vcmp.lt.s32.totalorder %v458_v26, %v4236_v19 }
 0x175   : > { %2832 = vmatpush.msrb.mxu0 %v1625_v32  ;;  %2851 = vmatpush.msrb.mxu1 %v1642_v33  ;;  %849 = vst [vmem:[#allocation1 + $0x2] ss:$4 sm:$0xff] %v396_v27  ;;  %v845_v31 = vld.sshfl [vmem:[#allocation1 + $0x30] sm:$0xff pattern:$0x73625140]  ;;  %v1692_v32 = vld [vmem:[%s4101_s30 + $0x1478] sm:$0xff] }
 0x176   : > { %2872 = vmatpush.msrb.mxu2 %v1657_v34  ;;  %2891 = vmatpush.msrb.mxu3 %v1674_v35  ;;  %850 = vst [vmem:[#allocation1 + $0x3] ss:$4 sm:$0xff] %v413_v28  ;;  %v1724_v33 = vld [vmem:[%s4101_s30 + $0x1578] sm:$0xff]  ;;  %v1629_v34 = vld [vmem:[%s4101_s30 + $0x1280] sm:$0xff]  ;;  %vm530_vm8 = vcmp.lt.s32.totalorder %v460_v30, %v4236_v19  ;;  %v1730_v18 = vld [vmem:[%s4101_s30 + $0x15a8] sm:$0xff] }
 0x177   : > { %2833 = vmatpush.msrb.mxu0 %v1624_v36  ;;  %2852 = vmatpush.msrb.mxu1 %v1641_v37  ;;  %v1661_v35 = vld [vmem:[%s4101_s30 + $0x1380] sm:$0xff]  ;;  %v844_v36 = vld.sshfl [vmem:[#allocation1 + $0x28] sm:$0xff pattern:$0x73625140]  ;;  %v1711_v26 = vld [vmem:[%s4101_s30 + $0x1510] sm:$0xff] }
 0x178   : > { %2873 = vmatpush.msrb.mxu2 %v1656_v38  ;;  %2892 = vmatpush.msrb.mxu3 %v1673_v39  ;;  %v846_v37 = vld.sshfl [vmem:[#allocation1 + $0x38] sm:$0xff pattern:$0x73625140]  ;;  %v1691_v38 = vld [vmem:[%s4101_s30 + $0x1470] sm:$0xff]  ;;  %v1713_v17 = vld [vmem:[%s4101_s30 + $0x1520] sm:$0xff] }
 0x179   : > { %2834 = vmatpush.msrb.mxu0 %v1623_v40  ;;  %2853 = vmatpush.msrb.mxu1 %v1640_v41  ;;  %v1708_v39 = vld [vmem:[%s4101_s30 + $0x14f8] sm:$0xff]  ;;  %v1723_v40 = vld [vmem:[%s4101_s30 + $0x1570] sm:$0xff]  ;;  %v1697_v21 = vld [vmem:[%s4101_s30 + $0x14a0] sm:$0xff] }
 0x17a   : > { %2874 = vmatpush.msrb.mxu2 %v1655_v42  ;;  %2893 = vmatpush.msrb.mxu3 %v1672_v43  ;;  %v1740_v41 = vld [vmem:[%s4101_s30 + $0x15f8] sm:$0xff]  ;;  %v1690_v42 = vld [vmem:[%s4101_s30 + $0x1468] sm:$0xff]  ;;  %v1707_v43 = vld [vmem:[%s4101_s30 + $0x14f0] sm:$0xff] }
 0x17b   : > { %2835 = vmatpush.msrb.mxu0 %v1622_v44  ;;  %2854 = vmatpush.msrb.mxu1 %v1639_v45  ;;  %v1722_v44 = vld [vmem:[%s4101_s30 + $0x1568] sm:$0xff]  ;;  %v1739_v45 = vld [vmem:[%s4101_s30 + $0x15f0] sm:$0xff]  ;;  %v1728_v27 = vld [vmem:[%s4101_s30 + $0x1598] sm:$0xff] }
 0x17c   : > { %2875 = vmatpush.msrb.mxu2 %v1654_v46  ;;  %2894 = vmatpush.msrb.mxu3 %v1671_v47  ;;  %v1689_v46 = vld [vmem:[%s4101_s30 + $0x1460] sm:$0xff]  ;;  %v1706_v47 = vld [vmem:[%s4101_s30 + $0x14e8] sm:$0xff] }
 0x17d   : > { %2836 = vmatpush.msrb.mxu0 %v1621_v48  ;;  %2855 = vmatpush.msrb.mxu1 %v1638_v49  ;;  %v1721_v48 = vld [vmem:[%s4101_s30 + $0x1560] sm:$0xff]  ;;  %v1738_v49 = vld [vmem:[%s4101_s30 + $0x15e8] sm:$0xff] }
 0x17e   : > { %2876 = vmatpush.msrb.mxu2 %v1653_v50  ;;  %2895 = vmatpush.msrb.mxu3 %v1670_v51  ;;  %v1688_v50 = vld [vmem:[%s4101_s30 + $0x1458] sm:$0xff]  ;;  %v1705_v51 = vld [vmem:[%s4101_s30 + $0x14e0] sm:$0xff]  ;;  %v1678_v28 = vld [vmem:[%s4101_s30 + $0x1408] sm:$0xff] }
 0x17f   : > { %2837 = vmatpush.msrb.mxu0 %v1620_v52  ;;  %2856 = vmatpush.msrb.mxu1 %v1637_v53  ;;  %v1720_v52 = vld [vmem:[%s4101_s30 + $0x1558] sm:$0xff]  ;;  %v1737_v53 = vld [vmem:[%s4101_s30 + $0x15e0] sm:$0xff]  ;;  %v1710_v30 = vld [vmem:[%s4101_s30 + $0x1508] sm:$0xff] }
 0x180   : > { %2877 = vmatpush.msrb.mxu2 %v1652_v54  ;;  %2896 = vmatpush.msrb.mxu3 %v1669_v55  ;;  %v1687_v54 = vld [vmem:[%s4101_s30 + $0x1450] sm:$0xff]  ;;  %v1704_v55 = vld [vmem:[%s4101_s30 + $0x14d8] sm:$0xff] }
 0x181   : > { %2838 = vmatpush.msrb.mxu0 %v1619_v56  ;;  %2857 = vmatpush.msrb.mxu1 %v1636_v57  ;;  %v1719_v56 = vld [vmem:[%s4101_s30 + $0x1550] sm:$0xff]  ;;  %v1736_v57 = vld [vmem:[%s4101_s30 + $0x15d8] sm:$0xff] }
 0x182   : > { %2878 = vmatpush.msrb.mxu2 %v1651_v58  ;;  %2897 = vmatpush.msrb.mxu3 %v1668_v59  ;;  %v1686_v58 = vld [vmem:[%s4101_s30 + $0x1448] sm:$0xff]  ;;  %v1703_v59 = vld [vmem:[%s4101_s30 + $0x14d0] sm:$0xff] }
 0x183   : > { %2839 = vmatpush.msrb.mxu0 %v1618_v60  ;;  %2858 = vmatpush.msrb.mxu1 %v1635_v61  ;;  %v1718_v60 = vld [vmem:[%s4101_s30 + $0x1548] sm:$0xff]  ;;  %v1735_v61 = vld [vmem:[%s4101_s30 + $0x15d0] sm:$0xff] }
 0x184   : > { %2879 = vmatpush.msrb.mxu2 %v1650_v62  ;;  %2898 = vmatpush.msrb.mxu3 %v1667_v63  ;;  %v1685_v62 = vld [vmem:[%s4101_s30 + $0x1440] sm:$0xff]  ;;  %v1702_v63 = vld [vmem:[%s4101_s30 + $0x14c8] sm:$0xff] }
 0x185   : > { %2840 = vmatpush.msrb.mxu0 %v1617_v0  ;;  %2859 = vmatpush.msrb.mxu1 %v1634_v1  ;;  %v1717_v0 = vld [vmem:[%s4101_s30 + $0x1540] sm:$0xff]  ;;  %v1734_v1 = vld [vmem:[%s4101_s30 + $0x15c8] sm:$0xff] }
 0x186   : > { %2880 = vmatpush.msrb.mxu2 %v1649_v2  ;;  %2899 = vmatpush.msrb.mxu3 %v1666_v3  ;;  %v1684_v2 = vld [vmem:[%s4101_s30 + $0x1438] sm:$0xff]  ;;  %v1701_v3 = vld [vmem:[%s4101_s30 + $0x14c0] sm:$0xff] }
 0x187   : > { %2841 = vmatpush.msrb.mxu0 %v1616_v4  ;;  %2860 = vmatpush.msrb.mxu1 %v1633_v5  ;;  %v1716_v4 = vld [vmem:[%s4101_s30 + $0x1538] sm:$0xff]  ;;  %v1733_v5 = vld [vmem:[%s4101_s30 + $0x15c0] sm:$0xff] }
 0x188   : > { %2881 = vmatpush.msrb.mxu2 %v1648_v6  ;;  %2900 = vmatpush.msrb.mxu3 %v1665_v8  ;;  %v1683_v6 = vld [vmem:[%s4101_s30 + $0x1430] sm:$0xff]  ;;  %v1700_v8 = vld [vmem:[%s4101_s30 + $0x14b8] sm:$0xff] }
 0x189   : > { %2842 = vmatpush.msrb.mxu0 %v1615_v9  ;;  %2861 = vmatpush.msrb.mxu1 %v1632_v10  ;;  %v1715_v9 = vld [vmem:[%s4101_s30 + $0x1530] sm:$0xff]  ;;  %v1732_v10 = vld [vmem:[%s4101_s30 + $0x15b8] sm:$0xff] }
 0x18a   : > { %2882 = vmatpush.msrb.mxu2 %v1647_v11  ;;  %2901 = vmatpush.msrb.mxu3 %v1664_v12  ;;  %v1682_v11 = vld [vmem:[%s4101_s30 + $0x1428] sm:$0xff]  ;;  %v1699_v12 = vld [vmem:[%s4101_s30 + $0x14b0] sm:$0xff] }
 0x18b   : > { %2843 = vmatpush.msrb.mxu0 %v1614_v13  ;;  %2862 = vmatpush.msrb.mxu1 %v1631_v14  ;;  %v1714_v13 = vld [vmem:[%s4101_s30 + $0x1528] sm:$0xff]  ;;  %v1731_v14 = vld [vmem:[%s4101_s30 + $0x15b0] sm:$0xff] }
 0x18c   : > { %2883 = vmatpush.msrb.mxu2 %v1646_v15  ;;  %2902 = vmatpush.msrb.mxu3 %v1663_v16  ;;  %v1681_v15 = vld [vmem:[%s4101_s30 + $0x1420] sm:$0xff]  ;;  %v1698_v16 = vld [vmem:[%s4101_s30 + $0x14a8] sm:$0xff] }
 0x18d   : > { %2844 = vmatpush.msrb.mxu0 %v1613_v22  ;;  %2863 = vmatpush.msrb.mxu1 %v1630_v23  ;;  %v1712_v22 = vld [vmem:[%s4101_s30 + $0x1518] sm:$0xff]  ;;  %v1729_v23 = vld [vmem:[%s4101_s30 + $0x15a0] sm:$0xff] }
 0x18e   : > { %2884 = vmatpush.msrb.mxu2 %v1645_v24  ;;  %2903 = vmatpush.msrb.mxu3 %v1662_v25  ;;  %v1679_v24 = vld [vmem:[%s4101_s30 + $0x1410] sm:$0xff]  ;;  %v1696_v25 = vld [vmem:[%s4101_s30 + $0x1498] sm:$0xff] }
 0x18f   : > { %3688 = vmatmul.msk.f32.vlgmr.msrb.gmra.mxu0 %vm527_vm5, %v843_v29  ;;  %3690 = vmatmul.msk.f32.vlgmr.msrb.gmra.mxu2 %vm529_vm6, %v845_v31  ;;  %v1695_v29 = vld [vmem:[%s4101_s30 + $0x1490] sm:$0xff] }
 0x190   : > { %2909 = vmatpush.msra.mxu0 %v1692_v32  ;;  %2949 = vmatpush.msra.mxu2 %v1724_v33  ;;  %v1727_v31 = vld [vmem:[%s4101_s30 + $0x1590] sm:$0xff]  ;;  %v461_v32 = vadd.s32 5120, %v4223_v7  ;;  %v463_v33 = vadd.s32 5376, %v4223_v7 }
 0x191   : > { %2864 = vmatpush.msrb.mxu1 %v1629_v34  ;;  %2904 = vmatpush.msrb.mxu3 %v1661_v35  ;;  %v363_v34 = vld [vmem:[%s4103_s6 + $0x58] sm:$0xff] }
 0x192   : > { %3689 = vmatmul.msk.f32.vlgmr.msrb.gmra.mxu1 %vm528_vm7, %v844_v36  ;;  %3691 = vmatmul.msk.f32.vlgmr.msrb.gmra.mxu3 %vm530_vm8, %v846_v37  ;;  %v380_v35 = vld [vmem:[%s4103_s6 + $0xde] sm:$0xff]  ;;  %851 = vst [vmem:[#allocation1 + $0x20] ss:$4 sm:$0xff] %v363_v34  ;;  %vm531_vm9 = vcmp.lt.s32.totalorder %v461_v32, %v4236_v19  ;;  %vm533_vm10 = vcmp.lt.s32.totalorder %v463_v33, %v4236_v19  ;;  %v1744_v34 = vld [vmem:[%s4101_s30 + $0x1618] sm:$0xff] }
 0x193   : > { %2910 = vmatpush.msra.mxu0 %v1691_v38  ;;  %2929 = vmatpush.msra.mxu1 %v1708_v39  ;;  %v1677_v36 = vld [vmem:[%s4101_s30 + $0x1400] sm:$0xff]  ;;  %v1694_v37 = vld [vmem:[%s4101_s30 + $0x1488] sm:$0xff]  ;;  %852 = vst [vmem:[#allocation1 + $0x21] ss:$4 sm:$0xff] %v380_v35 }
 0x194   : > { %2950 = vmatpush.msra.mxu2 %v1723_v40  ;;  %2969 = vmatpush.msra.mxu3 %v1740_v41  ;;  %v1709_v38 = vld [vmem:[%s4101_s30 + $0x1500] sm:$0xff]  ;;  %v1726_v39 = vld [vmem:[%s4101_s30 + $0x1588] sm:$0xff]  ;;  %v462_v40 = vadd.s32 5248, %v4223_v7 }
 0x195   : > { %2911 = vmatpush.msra.mxu0 %v1690_v42  ;;  %2930 = vmatpush.msra.mxu1 %v1707_v43  ;;  %v397_v41 = vld [vmem:[%s4103_s6 + $0x164] sm:$0xff]  ;;  %v855_v43 = vld.sshfl [vmem:[#allocation1] sm:$0xff pattern:$0x73625140] }
 0x196   : > { %2951 = vmatpush.msra.mxu2 %v1722_v44  ;;  %2970 = vmatpush.msra.mxu3 %v1739_v45  ;;  %v414_v42 = vld [vmem:[%s4103_s6 + $0x1ea] sm:$0xff]  ;;  %v464_v44 = vadd.s32 5504, %v4223_v7  ;;  %853 = vst [vmem:[#allocation1 + $0x22] ss:$4 sm:$0xff] %v397_v41  ;;  %vm532_vm11 = vcmp.lt.s32.totalorder %v462_v40, %v4236_v19  ;;  %v1794_v33 = vld [vmem:[%s4101_s30 + $0x17a8] sm:$0xff] }
 0x197   : > { %2912 = vmatpush.msra.mxu0 %v1689_v46  ;;  %2931 = vmatpush.msra.mxu1 %v1706_v47  ;;  %v857_v45 = vld.sshfl [vmem:[#allocation1 + $0x10] sm:$0xff pattern:$0x73625140]  ;;  %854 = vst [vmem:[#allocation1 + $0x23] ss:$4 sm:$0xff] %v414_v42  ;;  %v1756_v46 = vld [vmem:[%s4101_s30 + $0x1678] sm:$0xff] }
 0x198   : > { %2952 = vmatpush.msra.mxu2 %v1721_v48  ;;  %2971 = vmatpush.msra.mxu3 %v1738_v49  ;;  %v1788_v47 = vld [vmem:[%s4101_s30 + $0x1778] sm:$0xff]  ;;  %v1693_v48 = vld [vmem:[%s4101_s30 + $0x1480] sm:$0xff]  ;;  %vm534_vm12 = vcmp.lt.s32.totalorder %v464_v44, %v4236_v19  ;;  %v1775_v40 = vld [vmem:[%s4101_s30 + $0x1710] sm:$0xff] }
 0x199   : > { %2913 = vmatpush.msra.mxu0 %v1688_v50  ;;  %2932 = vmatpush.msra.mxu1 %v1705_v51  ;;  %v1725_v49 = vld [vmem:[%s4101_s30 + $0x1580] sm:$0xff]  ;;  %v856_v50 = vld.sshfl [vmem:[#allocation1 + $0x8] sm:$0xff pattern:$0x73625140]  ;;  %v1792_v41 = vld [vmem:[%s4101_s30 + $0x1798] sm:$0xff] }
 0x19a   : > { %2953 = vmatpush.msra.mxu2 %v1720_v52  ;;  %2972 = vmatpush.msra.mxu3 %v1737_v53  ;;  %v858_v51 = vld.sshfl [vmem:[#allocation1 + $0x18] sm:$0xff pattern:$0x73625140]  ;;  %v1755_v52 = vld [vmem:[%s4101_s30 + $0x1670] sm:$0xff]  ;;  %v1777_v32 = vld [vmem:[%s4101_s30 + $0x1720] sm:$0xff] }
 0x19b   : > { %2914 = vmatpush.msra.mxu0 %v1687_v54  ;;  %2933 = vmatpush.msra.mxu1 %v1704_v55  ;;  %v1772_v53 = vld [vmem:[%s4101_s30 + $0x16f8] sm:$0xff]  ;;  %v1787_v54 = vld [vmem:[%s4101_s30 + $0x1770] sm:$0xff]  ;;  %v1761_v35 = vld [vmem:[%s4101_s30 + $0x16a0] sm:$0xff] }
 0x19c   : > { %2954 = vmatpush.msra.mxu2 %v1719_v56  ;;  %2973 = vmatpush.msra.mxu3 %v1736_v57  ;;  %v1804_v55 = vld [vmem:[%s4101_s30 + $0x17f8] sm:$0xff]  ;;  %v1754_v56 = vld [vmem:[%s4101_s30 + $0x1668] sm:$0xff]  ;;  %v1771_v57 = vld [vmem:[%s4101_s30 + $0x16f0] sm:$0xff] }
 0x19d   : > { %2915 = vmatpush.msra.mxu0 %v1686_v58  ;;  %2934 = vmatpush.msra.mxu1 %v1703_v59  ;;  %v1786_v58 = vld [vmem:[%s4101_s30 + $0x1768] sm:$0xff]  ;;  %v1803_v59 = vld [vmem:[%s4101_s30 + $0x17f0] sm:$0xff] }
 0x19e   : > { %2955 = vmatpush.msra.mxu2 %v1718_v60  ;;  %2974 = vmatpush.msra.mxu3 %v1735_v61  ;;  %v1753_v60 = vld [vmem:[%s4101_s30 + $0x1660] sm:$0xff]  ;;  %v1770_v61 = vld [vmem:[%s4101_s30 + $0x16e8] sm:$0xff] }
 0x19f   : > { %2916 = vmatpush.msra.mxu0 %v1685_v62  ;;  %2935 = vmatpush.msra.mxu1 %v1702_v63  ;;  %v1785_v62 = vld [vmem:[%s4101_s30 + $0x1760] sm:$0xff]  ;;  %v1802_v63 = vld [vmem:[%s4101_s30 + $0x17e8] sm:$0xff] }
 0x1a0   : > { %2956 = vmatpush.msra.mxu2 %v1717_v0  ;;  %2975 = vmatpush.msra.mxu3 %v1734_v1  ;;  %v1752_v0 = vld [vmem:[%s4101_s30 + $0x1658] sm:$0xff]  ;;  %v1769_v1 = vld [vmem:[%s4101_s30 + $0x16e0] sm:$0xff]  ;;  %v1742_v42 = vld [vmem:[%s4101_s30 + $0x1608] sm:$0xff] }
 0x1a1   : > { %2917 = vmatpush.msra.mxu0 %v1684_v2  ;;  %2936 = vmatpush.msra.mxu1 %v1701_v3  ;;  %v1784_v2 = vld [vmem:[%s4101_s30 + $0x1758] sm:$0xff]  ;;  %v1801_v3 = vld [vmem:[%s4101_s30 + $0x17e0] sm:$0xff]  ;;  %v1774_v44 = vld [vmem:[%s4101_s30 + $0x1708] sm:$0xff] }
 0x1a2   : > { %2957 = vmatpush.msra.mxu2 %v1716_v4  ;;  %2976 = vmatpush.msra.mxu3 %v1733_v5  ;;  %v1751_v4 = vld [vmem:[%s4101_s30 + $0x1650] sm:$0xff]  ;;  %v1768_v5 = vld [vmem:[%s4101_s30 + $0x16d8] sm:$0xff] }
 0x1a3   : > { %2918 = vmatpush.msra.mxu0 %v1683_v6  ;;  %2937 = vmatpush.msra.mxu1 %v1700_v8  ;;  %v1783_v6 = vld [vmem:[%s4101_s30 + $0x1750] sm:$0xff]  ;;  %v1800_v8 = vld [vmem:[%s4101_s30 + $0x17d8] sm:$0xff] }
 0x1a4   : > { %2958 = vmatpush.msra.mxu2 %v1715_v9  ;;  %2977 = vmatpush.msra.mxu3 %v1732_v10  ;;  %v1750_v9 = vld [vmem:[%s4101_s30 + $0x1648] sm:$0xff]  ;;  %v1767_v10 = vld [vmem:[%s4101_s30 + $0x16d0] sm:$0xff] }
 0x1a5   : > { %2919 = vmatpush.msra.mxu0 %v1682_v11  ;;  %2938 = vmatpush.msra.mxu1 %v1699_v12  ;;  %v1782_v11 = vld [vmem:[%s4101_s30 + $0x1748] sm:$0xff]  ;;  %v1799_v12 = vld [vmem:[%s4101_s30 + $0x17d0] sm:$0xff] }
 0x1a6   : > { %2959 = vmatpush.msra.mxu2 %v1714_v13  ;;  %2978 = vmatpush.msra.mxu3 %v1731_v14  ;;  %v1749_v13 = vld [vmem:[%s4101_s30 + $0x1640] sm:$0xff]  ;;  %v1766_v14 = vld [vmem:[%s4101_s30 + $0x16c8] sm:$0xff] }
 0x1a7   : > { %2920 = vmatpush.msra.mxu0 %v1681_v15  ;;  %2939 = vmatpush.msra.mxu1 %v1698_v16  ;;  %v1781_v15 = vld [vmem:[%s4101_s30 + $0x1740] sm:$0xff]  ;;  %v1798_v16 = vld [vmem:[%s4101_s30 + $0x17c8] sm:$0xff] }
 0x1a8   : > { %2960 = vmatpush.msra.mxu2 %v1713_v17  ;;  %2979 = vmatpush.msra.mxu3 %v1730_v18  ;;  %v1748_v17 = vld [vmem:[%s4101_s30 + $0x1638] sm:$0xff]  ;;  %v1765_v18 = vld [vmem:[%s4101_s30 + $0x16c0] sm:$0xff] }
 0x1a9   : > { %2921 = vmatpush.msra.mxu0 %v1680_v20  ;;  %2940 = vmatpush.msra.mxu1 %v1697_v21  ;;  %v1780_v20 = vld [vmem:[%s4101_s30 + $0x1738] sm:$0xff]  ;;  %v1797_v21 = vld [vmem:[%s4101_s30 + $0x17c0] sm:$0xff] }
 0x1aa   : > { %2961 = vmatpush.msra.mxu2 %v1712_v22  ;;  %2980 = vmatpush.msra.mxu3 %v1729_v23  ;;  %v1747_v22 = vld [vmem:[%s4101_s30 + $0x1630] sm:$0xff]  ;;  %v1764_v23 = vld [vmem:[%s4101_s30 + $0x16b8] sm:$0xff] }
 0x1ab   : > { %2922 = vmatpush.msra.mxu0 %v1679_v24  ;;  %2941 = vmatpush.msra.mxu1 %v1696_v25  ;;  %v1779_v24 = vld [vmem:[%s4101_s30 + $0x1730] sm:$0xff]  ;;  %v1796_v25 = vld [vmem:[%s4101_s30 + $0x17b8] sm:$0xff] }
 0x1ac   : > { %2962 = vmatpush.msra.mxu2 %v1711_v26  ;;  %2981 = vmatpush.msra.mxu3 %v1728_v27  ;;  %v1746_v26 = vld [vmem:[%s4101_s30 + $0x1628] sm:$0xff]  ;;  %v1763_v27 = vld [vmem:[%s4101_s30 + $0x16b0] sm:$0xff] }
 0x1ad   : > { %2923 = vmatpush.msra.mxu0 %v1678_v28  ;;  %2942 = vmatpush.msra.mxu1 %v1695_v29  ;;  %v1778_v28 = vld [vmem:[%s4101_s30 + $0x1728] sm:$0xff]  ;;  %v1795_v29 = vld [vmem:[%s4101_s30 + $0x17b0] sm:$0xff] }
 0x1ae   : > { %2963 = vmatpush.msra.mxu2 %v1710_v30  ;;  %2982 = vmatpush.msra.mxu3 %v1727_v31  ;;  %v1745_v30 = vld [vmem:[%s4101_s30 + $0x1620] sm:$0xff]  ;;  %v1762_v31 = vld [vmem:[%s4101_s30 + $0x16a8] sm:$0xff] }
 0x1af   : > { %2924 = vmatpush.msra.mxu0 %v1677_v36  ;;  %2943 = vmatpush.msra.mxu1 %v1694_v37  ;;  %v1776_v36 = vld [vmem:[%s4101_s30 + $0x1718] sm:$0xff]  ;;  %v1793_v37 = vld [vmem:[%s4101_s30 + $0x17a0] sm:$0xff] }
 0x1b0   : > { %2964 = vmatpush.msra.mxu2 %v1709_v38  ;;  %2983 = vmatpush.msra.mxu3 %v1726_v39  ;;  %v1743_v38 = vld [vmem:[%s4101_s30 + $0x1610] sm:$0xff]  ;;  %v1760_v39 = vld [vmem:[%s4101_s30 + $0x1698] sm:$0xff] }
 0x1b1   : > { %3692 = vmatmul.msk.f32.vlgmr.msra.gmra.mxu0 %vm531_vm9, %v855_v43  ;;  %3694 = vmatmul.msk.f32.vlgmr.msra.gmra.mxu2 %vm533_vm10, %v857_v45  ;;  %v1759_v43 = vld [vmem:[%s4101_s30 + $0x1690] sm:$0xff] }
 0x1b2   : > { %2989 = vmatpush.msrb.mxu0 %v1756_v46  ;;  %3029 = vmatpush.msrb.mxu2 %v1788_v47  ;;  %v1791_v45 = vld [vmem:[%s4101_s30 + $0x1790] sm:$0xff]  ;;  %v465_v46 = vadd.s32 5632, %v4223_v7  ;;  %v467_v47 = vadd.s32 5888, %v4223_v7 }
 0x1b3   : > { %2944 = vmatpush.msra.mxu1 %v1693_v48  ;;  %2984 = vmatpush.msra.mxu3 %v1725_v49  ;;  %v364_v48 = vld [vmem:[%s4103_s6 + $0x60] sm:$0xff] }
 0x1b4   : > { %3693 = vmatmul.msk.f32.vlgmr.msra.gmra.mxu1 %vm532_vm11, %v856_v50  ;;  %3695 = vmatmul.msk.f32.vlgmr.msra.gmra.mxu3 %vm534_vm12, %v858_v51  ;;  %v381_v49 = vld [vmem:[%s4103_s6 + $0xe6] sm:$0xff]  ;;  %v1741_v50 = vld [vmem:[%s4101_s30 + $0x1600] sm:$0xff]  ;;  %863 = vst [vmem:[#allocation1] ss:$4 sm:$0xff] %v364_v48  ;;  %vm535_vm13 = vcmp.lt.s32.totalorder %v465_v46, %v4236_v19  ;;  %vm537_vm14 = vcmp.lt.s32.totalorder %v467_v47, %v4236_v19 }
 0x1b5   : > { %2990 = vmatpush.msrb.mxu0 %v1755_v52  ;;  %3009 = vmatpush.msrb.mxu1 %v1772_v53  ;;  %v1758_v51 = vld [vmem:[%s4101_s30 + $0x1688] sm:$0xff]  ;;  %v1773_v52 = vld [vmem:[%s4101_s30 + $0x1700] sm:$0xff]  ;;  %864 = vst [vmem:[#allocation1 + $0x1] ss:$4 sm:$0xff] %v381_v49  ;;  %v1808_v48 = vld [vmem:[%s4101_s30 + $0x1818] sm:$0xff] }
 0x1b6   : > { %3030 = vmatpush.msrb.mxu2 %v1787_v54  ;;  %3049 = vmatpush.msrb.mxu3 %v1804_v55  ;;  %v1790_v53 = vld [vmem:[%s4101_s30 + $0x1788] sm:$0xff]  ;;  %v466_v54 = vadd.s32 5760, %v4223_v7  ;;  %v398_v55 = vld [vmem:[%s4103_s6 + $0x16c] sm:$0xff] }
 0x1b7   : > { %2991 = vmatpush.msrb.mxu0 %v1754_v56  ;;  %3010 = vmatpush.msrb.mxu1 %v1771_v57  ;;  %v415_v56 = vld [vmem:[%s4103_s6 + $0x1f2] sm:$0xff]  ;;  %865 = vst [vmem:[#allocation1 + $0x2] ss:$4 sm:$0xff] %v398_v55 }
 0x1b8   : > { %3031 = vmatpush.msrb.mxu2 %v1786_v58  ;;  %3050 = vmatpush.msrb.mxu3 %v1803_v59  ;;  %v859_v57 = vld.sshfl [vmem:[#allocation1 + $0x20] sm:$0xff pattern:$0x73625140]  ;;  %v468_v58 = vadd.s32 6016, %v4223_v7  ;;  %866 = vst [vmem:[#allocation1 + $0x3] ss:$4 sm:$0xff] %v415_v56  ;;  %vm536_vm15 = vcmp.lt.s32.totalorder %v466_v54, %v4236_v19 }
 0x1b9   : > { %2992 = vmatpush.msrb.mxu0 %v1753_v60  ;;  %3011 = vmatpush.msrb.mxu1 %v1770_v61  ;;  %v861_v59 = vld.sshfl [vmem:[#allocation1 + $0x30] sm:$0xff pattern:$0x73625140]  ;;  %v1820_v60 = vld [vmem:[%s4101_s30 + $0x1878] sm:$0xff]  ;;  %v1841_v46 = vld [vmem:[%s4101_s30 + $0x1920] sm:$0xff] }
 0x1ba   : > { %3032 = vmatpush.msrb.mxu2 %v1785_v62  ;;  %3051 = vmatpush.msrb.mxu3 %v1802_v63  ;;  %v1852_v61 = vld [vmem:[%s4101_s30 + $0x1978] sm:$0xff]  ;;  %v1757_v62 = vld [vmem:[%s4101_s30 + $0x1680] sm:$0xff]  ;;  %vm538_vm0 = vcmp.lt.s32.totalorder %v468_v58, %v4236_v19  ;;  %v1858_v47 = vld [vmem:[%s4101_s30 + $0x19a8] sm:$0xff] }
 0x1bb   : > { %2993 = vmatpush.msrb.mxu0 %v1752_v0  ;;  %3012 = vmatpush.msrb.mxu1 %v1769_v1  ;;  %v1789_v63 = vld [vmem:[%s4101_s30 + $0x1780] sm:$0xff]  ;;  %v860_v0 = vld.sshfl [vmem:[#allocation1 + $0x28] sm:$0xff pattern:$0x73625140]  ;;  %v1839_v54 = vld [vmem:[%s4101_s30 + $0x1910] sm:$0xff] }
 0x1bc   : > { %3033 = vmatpush.msrb.mxu2 %v1784_v2  ;;  %3052 = vmatpush.msrb.mxu3 %v1801_v3  ;;  %v862_v1 = vld.sshfl [vmem:[#allocation1 + $0x38] sm:$0xff pattern:$0x73625140]  ;;  %v1819_v2 = vld [vmem:[%s4101_s30 + $0x1870] sm:$0xff]  ;;  %v1825_v49 = vld [vmem:[%s4101_s30 + $0x18a0] sm:$0xff] }
 0x1bd   : > { %2994 = vmatpush.msrb.mxu0 %v1751_v4  ;;  %3013 = vmatpush.msrb.mxu1 %v1768_v5  ;;  %v1836_v3 = vld [vmem:[%s4101_s30 + $0x18f8] sm:$0xff]  ;;  %v1851_v4 = vld [vmem:[%s4101_s30 + $0x1970] sm:$0xff]  ;;  %v1806_v56 = vld [vmem:[%s4101_s30 + $0x1808] sm:$0xff] }
 0x1be   : > { %3034 = vmatpush.msrb.mxu2 %v1783_v6  ;;  %3053 = vmatpush.msrb.mxu3 %v1800_v8  ;;  %v1868_v5 = vld [vmem:[%s4101_s30 + $0x19f8] sm:$0xff]  ;;  %v1818_v6 = vld [vmem:[%s4101_s30 + $0x1868] sm:$0xff]  ;;  %v1835_v8 = vld [vmem:[%s4101_s30 + $0x18f0] sm:$0xff] }
 0x1bf   : > { %2995 = vmatpush.msrb.mxu0 %v1750_v9  ;;  %3014 = vmatpush.msrb.mxu1 %v1767_v10  ;;  %v1850_v9 = vld [vmem:[%s4101_s30 + $0x1968] sm:$0xff]  ;;  %v1867_v10 = vld [vmem:[%s4101_s30 + $0x19f0] sm:$0xff]  ;;  %v1856_v55 = vld [vmem:[%s4101_s30 + $0x1998] sm:$0xff] }
 0x1c0   : > { %3035 = vmatpush.msrb.mxu2 %v1782_v11  ;;  %3054 = vmatpush.msrb.mxu3 %v1799_v12  ;;  %v1817_v11 = vld [vmem:[%s4101_s30 + $0x1860] sm:$0xff]  ;;  %v1834_v12 = vld [vmem:[%s4101_s30 + $0x18e8] sm:$0xff] }
 0x1c1   : > { %2996 = vmatpush.msrb.mxu0 %v1749_v13  ;;  %3015 = vmatpush.msrb.mxu1 %v1766_v14  ;;  %v1849_v13 = vld [vmem:[%s4101_s30 + $0x1960] sm:$0xff]  ;;  %v1866_v14 = vld [vmem:[%s4101_s30 + $0x19e8] sm:$0xff] }
 0x1c2   : > { %3036 = vmatpush.msrb.mxu2 %v1781_v15  ;;  %3055 = vmatpush.msrb.mxu3 %v1798_v16  ;;  %v1816_v15 = vld [vmem:[%s4101_s30 + $0x1858] sm:$0xff]  ;;  %v1833_v16 = vld [vmem:[%s4101_s30 + $0x18e0] sm:$0xff]  ;;  %v1838_v58 = vld [vmem:[%s4101_s30 + $0x1908] sm:$0xff] }
 0x1c3   : > { %2997 = vmatpush.msrb.mxu0 %v1748_v17  ;;  %3016 = vmatpush.msrb.mxu1 %v1765_v18  ;;  %v1848_v17 = vld [vmem:[%s4101_s30 + $0x1958] sm:$0xff]  ;;  %v1865_v18 = vld [vmem:[%s4101_s30 + $0x19e0] sm:$0xff] }
 0x1c4   : > { %3037 = vmatpush.msrb.mxu2 %v1780_v20  ;;  %3056 = vmatpush.msrb.mxu3 %v1797_v21  ;;  %v1815_v20 = vld [vmem:[%s4101_s30 + $0x1850] sm:$0xff]  ;;  %v1832_v21 = vld [vmem:[%s4101_s30 + $0x18d8] sm:$0xff] }
 0x1c5   : > { %2998 = vmatpush.msrb.mxu0 %v1747_v22  ;;  %3017 = vmatpush.msrb.mxu1 %v1764_v23  ;;  %v1847_v22 = vld [vmem:[%s4101_s30 + $0x1950] sm:$0xff]  ;;  %v1864_v23 = vld [vmem:[%s4101_s30 + $0x19d8] sm:$0xff] }
 0x1c6   : > { %3038 = vmatpush.msrb.mxu2 %v1779_v24  ;;  %3057 = vmatpush.msrb.mxu3 %v1796_v25  ;;  %v1814_v24 = vld [vmem:[%s4101_s30 + $0x1848] sm:$0xff]  ;;  %v1831_v25 = vld [vmem:[%s4101_s30 + $0x18d0] sm:$0xff] }
 0x1c7   : > { %2999 = vmatpush.msrb.mxu0 %v1746_v26  ;;  %3018 = vmatpush.msrb.mxu1 %v1763_v27  ;;  %v1846_v26 = vld [vmem:[%s4101_s30 + $0x1948] sm:$0xff]  ;;  %v1863_v27 = vld [vmem:[%s4101_s30 + $0x19d0] sm:$0xff] }
 0x1c8   : > { %3039 = vmatpush.msrb.mxu2 %v1778_v28  ;;  %3058 = vmatpush.msrb.mxu3 %v1795_v29  ;;  %v1813_v28 = vld [vmem:[%s4101_s30 + $0x1840] sm:$0xff]  ;;  %v1830_v29 = vld [vmem:[%s4101_s30 + $0x18c8] sm:$0xff] }
 0x1c9   : > { %3000 = vmatpush.msrb.mxu0 %v1745_v30  ;;  %3019 = vmatpush.msrb.mxu1 %v1762_v31  ;;  %v1845_v30 = vld [vmem:[%s4101_s30 + $0x1940] sm:$0xff]  ;;  %v1862_v31 = vld [vmem:[%s4101_s30 + $0x19c8] sm:$0xff] }
 0x1ca   : > { %3040 = vmatpush.msrb.mxu2 %v1777_v32  ;;  %3059 = vmatpush.msrb.mxu3 %v1794_v33  ;;  %v1812_v32 = vld [vmem:[%s4101_s30 + $0x1838] sm:$0xff]  ;;  %v1829_v33 = vld [vmem:[%s4101_s30 + $0x18c0] sm:$0xff] }
 0x1cb   : > { %3001 = vmatpush.msrb.mxu0 %v1744_v34  ;;  %3020 = vmatpush.msrb.mxu1 %v1761_v35  ;;  %v1844_v34 = vld [vmem:[%s4101_s30 + $0x1938] sm:$0xff]  ;;  %v1861_v35 = vld [vmem:[%s4101_s30 + $0x19c0] sm:$0xff] }
 0x1cc   : > { %3041 = vmatpush.msrb.mxu2 %v1776_v36  ;;  %3060 = vmatpush.msrb.mxu3 %v1793_v37  ;;  %v1811_v36 = vld [vmem:[%s4101_s30 + $0x1830] sm:$0xff]  ;;  %v1828_v37 = vld [vmem:[%s4101_s30 + $0x18b8] sm:$0xff] }
 0x1cd   : > { %3002 = vmatpush.msrb.mxu0 %v1743_v38  ;;  %3021 = vmatpush.msrb.mxu1 %v1760_v39  ;;  %v1843_v38 = vld [vmem:[%s4101_s30 + $0x1930] sm:$0xff]  ;;  %v1860_v39 = vld [vmem:[%s4101_s30 + $0x19b8] sm:$0xff] }
 0x1ce   : > { %3042 = vmatpush.msrb.mxu2 %v1775_v40  ;;  %3061 = vmatpush.msrb.mxu3 %v1792_v41  ;;  %v1810_v40 = vld [vmem:[%s4101_s30 + $0x1828] sm:$0xff]  ;;  %v1827_v41 = vld [vmem:[%s4101_s30 + $0x18b0] sm:$0xff] }
 0x1cf   : > { %3003 = vmatpush.msrb.mxu0 %v1742_v42  ;;  %3022 = vmatpush.msrb.mxu1 %v1759_v43  ;;  %v1842_v42 = vld [vmem:[%s4101_s30 + $0x1928] sm:$0xff]  ;;  %v1859_v43 = vld [vmem:[%s4101_s30 + $0x19b0] sm:$0xff] }
 0x1d0   : > { %3043 = vmatpush.msrb.mxu2 %v1774_v44  ;;  %3062 = vmatpush.msrb.mxu3 %v1791_v45  ;;  %v1809_v44 = vld [vmem:[%s4101_s30 + $0x1820] sm:$0xff]  ;;  %v1826_v45 = vld [vmem:[%s4101_s30 + $0x18a8] sm:$0xff] }
 0x1d1   : > { %3004 = vmatpush.msrb.mxu0 %v1741_v50  ;;  %3023 = vmatpush.msrb.mxu1 %v1758_v51  ;;  %v1840_v50 = vld [vmem:[%s4101_s30 + $0x1918] sm:$0xff]  ;;  %v1857_v51 = vld [vmem:[%s4101_s30 + $0x19a0] sm:$0xff] }
 0x1d2   : > { %3044 = vmatpush.msrb.mxu2 %v1773_v52  ;;  %3063 = vmatpush.msrb.mxu3 %v1790_v53  ;;  %v1807_v52 = vld [vmem:[%s4101_s30 + $0x1810] sm:$0xff]  ;;  %v1824_v53 = vld [vmem:[%s4101_s30 + $0x1898] sm:$0xff] }
 0x1d3   : > { %3696 = vmatmul.msk.f32.vlgmr.msrb.gmra.mxu0 %vm535_vm13, %v859_v57  ;;  %3698 = vmatmul.msk.f32.vlgmr.msrb.gmra.mxu2 %vm537_vm14, %v861_v59  ;;  %v1823_v57 = vld [vmem:[%s4101_s30 + $0x1890] sm:$0xff] }
 0x1d4   : > { %3069 = vmatpush.msra.mxu0 %v1820_v60  ;;  %3109 = vmatpush.msra.mxu2 %v1852_v61  ;;  %v1855_v59 = vld [vmem:[%s4101_s30 + $0x1990] sm:$0xff]  ;;  %v469_v60 = vadd.s32 6144, %v4223_v7  ;;  %v471_v61 = vadd.s32 6400, %v4223_v7 }
 0x1d5   : > { %3024 = vmatpush.msrb.mxu1 %v1757_v62  ;;  %3064 = vmatpush.msrb.mxu3 %v1789_v63  ;;  %v365_v62 = vld [vmem:[%s4103_s6 + $0x68] sm:$0xff] }
 0x1d6   : > { %3697 = vmatmul.msk.f32.vlgmr.msrb.gmra.mxu1 %vm536_vm15, %v860_v0  ;;  %3699 = vmatmul.msk.f32.vlgmr.msrb.gmra.mxu3 %vm538_vm0, %v862_v1  ;;  %v382_v63 = vld [vmem:[%s4103_s6 + $0xee] sm:$0xff]  ;;  %v1822_v1 = vld [vmem:[%s4101_s30 + $0x1888] sm:$0xff]  ;;  %867 = vst [vmem:[#allocation1 + $0x20] ss:$4 sm:$0xff] %v365_v62  ;;  %vm539_vm1 = vcmp.lt.s32.totalorder %v469_v60, %v4236_v19  ;;  %vm541_vm2 = vcmp.lt.s32.totalorder %v471_v61, %v4236_v19 }
 0x1d7   : > { %3070 = vmatpush.msra.mxu0 %v1819_v2  ;;  %3089 = vmatpush.msra.mxu1 %v1836_v3  ;;  %v1805_v0 = vld [vmem:[%s4101_s30 + $0x1800] sm:$0xff]  ;;  %v1854_v3 = vld [vmem:[%s4101_s30 + $0x1988] sm:$0xff]  ;;  %868 = vst [vmem:[#allocation1 + $0x21] ss:$4 sm:$0xff] %v382_v63  ;;  %v1872_v62 = vld [vmem:[%s4101_s30 + $0x1a18] sm:$0xff] }
 0x1d8   : > { %3110 = vmatpush.msra.mxu2 %v1851_v4  ;;  %3129 = vmatpush.msra.mxu3 %v1868_v5  ;;  %v1837_v2 = vld [vmem:[%s4101_s30 + $0x1900] sm:$0xff]  ;;  %v470_v4 = vadd.s32 6272, %v4223_v7  ;;  %v1922_v61 = vld [vmem:[%s4101_s30 + $0x1ba8] sm:$0xff] }
 0x1d9   : > { %3071 = vmatpush.msra.mxu0 %v1818_v6  ;;  %3090 = vmatpush.msra.mxu1 %v1835_v8  ;;  %v399_v5 = vld [vmem:[%s4103_s6 + $0x174] sm:$0xff] }
 0x1da   : > { %3111 = vmatpush.msra.mxu2 %v1850_v9  ;;  %3130 = vmatpush.msra.mxu3 %v1867_v10  ;;  %v416_v6 = vld [vmem:[%s4103_s6 + $0x1fa] sm:$0xff]  ;;  %v472_v9 = vadd.s32 6528, %v4223_v7  ;;  %869 = vst [vmem:[#allocation1 + $0x22] ss:$4 sm:$0xff] %v399_v5  ;;  %vm540_vm3 = vcmp.lt.s32.totalorder %v470_v4, %v4236_v19  ;;  %v1920_v5 = vld [vmem:[%s4101_s30 + $0x1b98] sm:$0xff] }
 0x1db   : > { %3072 = vmatpush.msra.mxu0 %v1817_v11  ;;  %3091 = vmatpush.msra.mxu1 %v1834_v12  ;;  %v871_v8 = vld.sshfl [vmem:[#allocation1] sm:$0xff pattern:$0x73625140]  ;;  %v873_v10 = vld.sshfl [vmem:[#allocation1 + $0x10] sm:$0xff pattern:$0x73625140] }
 0x1dc   : > { %3112 = vmatpush.msra.mxu2 %v1849_v13  ;;  %3131 = vmatpush.msra.mxu3 %v1866_v14  ;;  %870 = vst [vmem:[#allocation1 + $0x23] ss:$4 sm:$0xff] %v416_v6  ;;  %v1884_v11 = vld [vmem:[%s4101_s30 + $0x1a78] sm:$0xff]  ;;  %v1821_v13 = vld [vmem:[%s4101_s30 + $0x1880] sm:$0xff]  ;;  %vm542_vm4 = vcmp.lt.s32.totalorder %v472_v9, %v4236_v19  ;;  %v1903_v4 = vld [vmem:[%s4101_s30 + $0x1b10] sm:$0xff] }
 0x1dd   : > { %3073 = vmatpush.msra.mxu0 %v1816_v15  ;;  %3092 = vmatpush.msra.mxu1 %v1833_v16  ;;  %v1916_v12 = vld [vmem:[%s4101_s30 + $0x1b78] sm:$0xff]  ;;  %v1853_v14 = vld [vmem:[%s4101_s30 + $0x1980] sm:$0xff]  ;;  %v872_v15 = vld.sshfl [vmem:[#allocation1 + $0x8] sm:$0xff pattern:$0x73625140] }
 0x1de   : > { %3113 = vmatpush.msra.mxu2 %v1848_v17  ;;  %3132 = vmatpush.msra.mxu3 %v1865_v18  ;;  %v874_v16 = vld.sshfl [vmem:[#allocation1 + $0x18] sm:$0xff pattern:$0x73625140]  ;;  %v1883_v17 = vld [vmem:[%s4101_s30 + $0x1a70] sm:$0xff]  ;;  %v1905_v60 = vld [vmem:[%s4101_s30 + $0x1b20] sm:$0xff] }
 0x1df   : > { %3074 = vmatpush.msra.mxu0 %v1815_v20  ;;  %3093 = vmatpush.msra.mxu1 %v1832_v21  ;;  %v1900_v18 = vld [vmem:[%s4101_s30 + $0x1af8] sm:$0xff]  ;;  %v1915_v20 = vld [vmem:[%s4101_s30 + $0x1b70] sm:$0xff]  ;;  %v1889_v63 = vld [vmem:[%s4101_s30 + $0x1aa0] sm:$0xff] }
 0x1e0   : > { %3114 = vmatpush.msra.mxu2 %v1847_v22  ;;  %3133 = vmatpush.msra.mxu3 %v1864_v23  ;;  %v1932_v21 = vld [vmem:[%s4101_s30 + $0x1bf8] sm:$0xff]  ;;  %v1882_v22 = vld [vmem:[%s4101_s30 + $0x1a68] sm:$0xff]  ;;  %v1899_v23 = vld [vmem:[%s4101_s30 + $0x1af0] sm:$0xff] }
 0x1e1   : > { %3075 = vmatpush.msra.mxu0 %v1814_v24  ;;  %3094 = vmatpush.msra.mxu1 %v1831_v25  ;;  %v1914_v24 = vld [vmem:[%s4101_s30 + $0x1b68] sm:$0xff]  ;;  %v1931_v25 = vld [vmem:[%s4101_s30 + $0x1bf0] sm:$0xff] }
 0x1e2   : > { %3115 = vmatpush.msra.mxu2 %v1846_v26  ;;  %3134 = vmatpush.msra.mxu3 %v1863_v27  ;;  %v1881_v26 = vld [vmem:[%s4101_s30 + $0x1a60] sm:$0xff]  ;;  %v1898_v27 = vld [vmem:[%s4101_s30 + $0x1ae8] sm:$0xff] }
 0x1e3   : > { %3076 = vmatpush.msra.mxu0 %v1813_v28  ;;  %3095 = vmatpush.msra.mxu1 %v1830_v29  ;;  %v1913_v28 = vld [vmem:[%s4101_s30 + $0x1b60] sm:$0xff]  ;;  %v1930_v29 = vld [vmem:[%s4101_s30 + $0x1be8] sm:$0xff] }
 0x1e4   : > { %3116 = vmatpush.msra.mxu2 %v1845_v30  ;;  %3135 = vmatpush.msra.mxu3 %v1862_v31  ;;  %v1880_v30 = vld [vmem:[%s4101_s30 + $0x1a58] sm:$0xff]  ;;  %v1897_v31 = vld [vmem:[%s4101_s30 + $0x1ae0] sm:$0xff]  ;;  %v1870_v6 = vld [vmem:[%s4101_s30 + $0x1a08] sm:$0xff] }
 0x1e5   : > { %3077 = vmatpush.msra.mxu0 %v1812_v32  ;;  %3096 = vmatpush.msra.mxu1 %v1829_v33  ;;  %v1912_v32 = vld [vmem:[%s4101_s30 + $0x1b58] sm:$0xff]  ;;  %v1929_v33 = vld [vmem:[%s4101_s30 + $0x1be0] sm:$0xff]  ;;  %v1902_v9 = vld [vmem:[%s4101_s30 + $0x1b08] sm:$0xff] }
 0x1e6   : > { %3117 = vmatpush.msra.mxu2 %v1844_v34  ;;  %3136 = vmatpush.msra.mxu3 %v1861_v35  ;;  %v1879_v34 = vld [vmem:[%s4101_s30 + $0x1a50] sm:$0xff]  ;;  %v1896_v35 = vld [vmem:[%s4101_s30 + $0x1ad8] sm:$0xff] }
 0x1e7   : > { %3078 = vmatpush.msra.mxu0 %v1811_v36  ;;  %3097 = vmatpush.msra.mxu1 %v1828_v37  ;;  %v1911_v36 = vld [vmem:[%s4101_s30 + $0x1b50] sm:$0xff]  ;;  %v1928_v37 = vld [vmem:[%s4101_s30 + $0x1bd8] sm:$0xff] }
 0x1e8   : > { %3118 = vmatpush.msra.mxu2 %v1843_v38  ;;  %3137 = vmatpush.msra.mxu3 %v1860_v39  ;;  %v1878_v38 = vld [vmem:[%s4101_s30 + $0x1a48] sm:$0xff]  ;;  %v1895_v39 = vld [vmem:[%s4101_s30 + $0x1ad0] sm:$0xff] }
 0x1e9   : > { %3079 = vmatpush.msra.mxu0 %v1810_v40  ;;  %3098 = vmatpush.msra.mxu1 %v1827_v41  ;;  %v1910_v40 = vld [vmem:[%s4101_s30 + $0x1b48] sm:$0xff]  ;;  %v1927_v41 = vld [vmem:[%s4101_s30 + $0x1bd0] sm:$0xff] }
 0x1ea   : > { %3119 = vmatpush.msra.mxu2 %v1842_v42  ;;  %3138 = vmatpush.msra.mxu3 %v1859_v43  ;;  %v1877_v42 = vld [vmem:[%s4101_s30 + $0x1a40] sm:$0xff]  ;;  %v1894_v43 = vld [vmem:[%s4101_s30 + $0x1ac8] sm:$0xff] }
 0x1eb   : > { %3080 = vmatpush.msra.mxu0 %v1809_v44  ;;  %3099 = vmatpush.msra.mxu1 %v1826_v45  ;;  %v1909_v44 = vld [vmem:[%s4101_s30 + $0x1b40] sm:$0xff]  ;;  %v1926_v45 = vld [vmem:[%s4101_s30 + $0x1bc8] sm:$0xff] }
 0x1ec   : > { %3120 = vmatpush.msra.mxu2 %v1841_v46  ;;  %3139 = vmatpush.msra.mxu3 %v1858_v47  ;;  %v1876_v46 = vld [vmem:[%s4101_s30 + $0x1a38] sm:$0xff]  ;;  %v1893_v47 = vld [vmem:[%s4101_s30 + $0x1ac0] sm:$0xff] }
 0x1ed   : > { %3081 = vmatpush.msra.mxu0 %v1808_v48  ;;  %3100 = vmatpush.msra.mxu1 %v1825_v49  ;;  %v1908_v48 = vld [vmem:[%s4101_s30 + $0x1b38] sm:$0xff]  ;;  %v1925_v49 = vld [vmem:[%s4101_s30 + $0x1bc0] sm:$0xff] }
 0x1ee   : > { %3121 = vmatpush.msra.mxu2 %v1840_v50  ;;  %3140 = vmatpush.msra.mxu3 %v1857_v51  ;;  %v1875_v50 = vld [vmem:[%s4101_s30 + $0x1a30] sm:$0xff]  ;;  %v1892_v51 = vld [vmem:[%s4101_s30 + $0x1ab8] sm:$0xff] }
 0x1ef   : > { %3082 = vmatpush.msra.mxu0 %v1807_v52  ;;  %3101 = vmatpush.msra.mxu1 %v1824_v53  ;;  %v1907_v52 = vld [vmem:[%s4101_s30 + $0x1b30] sm:$0xff]  ;;  %v1924_v53 = vld [vmem:[%s4101_s30 + $0x1bb8] sm:$0xff] }
 0x1f0   : > { %3122 = vmatpush.msra.mxu2 %v1839_v54  ;;  %3141 = vmatpush.msra.mxu3 %v1856_v55  ;;  %v1874_v54 = vld [vmem:[%s4101_s30 + $0x1a28] sm:$0xff]  ;;  %v1891_v55 = vld [vmem:[%s4101_s30 + $0x1ab0] sm:$0xff] }
 0x1f1   : > { %3083 = vmatpush.msra.mxu0 %v1806_v56  ;;  %3102 = vmatpush.msra.mxu1 %v1823_v57  ;;  %v1906_v56 = vld [vmem:[%s4101_s30 + $0x1b28] sm:$0xff]  ;;  %v1923_v57 = vld [vmem:[%s4101_s30 + $0x1bb0] sm:$0xff] }
 0x1f2   : > { %3123 = vmatpush.msra.mxu2 %v1838_v58  ;;  %3142 = vmatpush.msra.mxu3 %v1855_v59  ;;  %v1873_v58 = vld [vmem:[%s4101_s30 + $0x1a20] sm:$0xff]  ;;  %v1890_v59 = vld [vmem:[%s4101_s30 + $0x1aa8] sm:$0xff] }
 0x1f3   : > { %3084 = vmatpush.msra.mxu0 %v1805_v0  ;;  %3103 = vmatpush.msra.mxu1 %v1822_v1  ;;  %v1904_v0 = vld [vmem:[%s4101_s30 + $0x1b18] sm:$0xff]  ;;  %v1921_v1 = vld [vmem:[%s4101_s30 + $0x1ba0] sm:$0xff] }
 0x1f4   : > { %3124 = vmatpush.msra.mxu2 %v1837_v2  ;;  %3143 = vmatpush.msra.mxu3 %v1854_v3  ;;  %v1871_v2 = vld [vmem:[%s4101_s30 + $0x1a10] sm:$0xff]  ;;  %v1888_v3 = vld [vmem:[%s4101_s30 + $0x1a98] sm:$0xff] }
 0x1f5   : > { %3700 = vmatmul.msk.f32.vlgmr.msra.gmra.mxu0 %vm539_vm1, %v871_v8  ;;  %3702 = vmatmul.msk.f32.vlgmr.msra.gmra.mxu2 %vm541_vm2, %v873_v10  ;;  %v1887_v8 = vld [vmem:[%s4101_s30 + $0x1a90] sm:$0xff] }
 0x1f6   : > { %3149 = vmatpush.msrb.mxu0 %v1884_v11  ;;  %3189 = vmatpush.msrb.mxu2 %v1916_v12  ;;  %v1919_v10 = vld [vmem:[%s4101_s30 + $0x1b90] sm:$0xff]  ;;  %v473_v11 = vadd.s32 6656, %v4223_v7  ;;  %v475_v12 = vadd.s32 6912, %v4223_v7 }
 0x1f7   : > { %3104 = vmatpush.msra.mxu1 %v1821_v13  ;;  %3144 = vmatpush.msra.mxu3 %v1853_v14  ;;  %v366_v13 = vld [vmem:[%s4103_s6 + $0x70] sm:$0xff] }
 0x1f8   : > { %3701 = vmatmul.msk.f32.vlgmr.msra.gmra.mxu1 %vm540_vm3, %v872_v15  ;;  %3703 = vmatmul.msk.f32.vlgmr.msra.gmra.mxu3 %vm542_vm4, %v874_v16  ;;  %v383_v14 = vld [vmem:[%s4103_s6 + $0xf6] sm:$0xff]  ;;  %879 = vst [vmem:[#allocation1] ss:$4 sm:$0xff] %v366_v13  ;;  %vm543_vm5 = vcmp.lt.s32.totalorder %v473_v11, %v4236_v19  ;;  %vm545_vm6 = vcmp.lt.s32.totalorder %v475_v12, %v4236_v19  ;;  %vm3450_vm4 = vcmask 39936  }
 0x1f9   : > { %3150 = vmatpush.msrb.mxu0 %v1883_v17  ;;  %3169 = vmatpush.msrb.mxu1 %v1900_v18  ;;  %v1869_v15 = vld [vmem:[%s4101_s30 + $0x1a00] sm:$0xff]  ;;  %v1886_v16 = vld [vmem:[%s4101_s30 + $0x1a88] sm:$0xff]  ;;  %880 = vst [vmem:[#allocation1 + $0x1] ss:$4 sm:$0xff] %v383_v14  ;;  %v1936_v13 = vld [vmem:[%s4101_s30 + $0x1c18] sm:$0xff] }
 0x1fa   : > { %3190 = vmatpush.msrb.mxu2 %v1915_v20  ;;  %3209 = vmatpush.msrb.mxu3 %v1932_v21  ;;  %v1901_v17 = vld [vmem:[%s4101_s30 + $0x1b00] sm:$0xff]  ;;  %v1918_v18 = vld [vmem:[%s4101_s30 + $0x1b88] sm:$0xff]  ;;  %v474_v20 = vadd.s32 6784, %v4223_v7 }
 0x1fb   : > { %3151 = vmatpush.msrb.mxu0 %v1882_v22  ;;  %3170 = vmatpush.msrb.mxu1 %v1899_v23  ;;  %v400_v21 = vld [vmem:[%s4103_s6 + $0x17c] sm:$0xff] }
 0x1fc   : > { %3191 = vmatpush.msrb.mxu2 %v1914_v24  ;;  %3210 = vmatpush.msrb.mxu3 %v1931_v25  ;;  %v417_v22 = vld [vmem:[%s4103_s6 + $0x202] sm:$0xff]  ;;  %v875_v23 = vld.sshfl [vmem:[#allocation1 + $0x20] sm:$0xff pattern:$0x73625140]  ;;  %v476_v24 = vadd.s32 7040, %v4223_v7  ;;  %vm544_vm7 = vcmp.lt.s32.totalorder %v474_v20, %v4236_v19 }
 0x1fd   : > { %3152 = vmatpush.msrb.mxu0 %v1881_v26  ;;  %3171 = vmatpush.msrb.mxu1 %v1898_v27  ;;  %881 = vst [vmem:[#allocation1 + $0x2] ss:$4 sm:$0xff] %v400_v21  ;;  %v877_v25 = vld.sshfl [vmem:[#allocation1 + $0x30] sm:$0xff pattern:$0x73625140]  ;;  %v1948_v26 = vld [vmem:[%s4101_s30 + $0x1c78] sm:$0xff] }
 0x1fe   : > { %3192 = vmatpush.msrb.mxu2 %v1913_v28  ;;  %3211 = vmatpush.msrb.mxu3 %v1930_v29  ;;  %882 = vst [vmem:[#allocation1 + $0x3] ss:$4 sm:$0xff] %v417_v22  ;;  %v1980_v27 = vld [vmem:[%s4101_s30 + $0x1d78] sm:$0xff]  ;;  %v1885_v28 = vld [vmem:[%s4101_s30 + $0x1a80] sm:$0xff]  ;;  %vm546_vm8 = vcmp.lt.s32.totalorder %v476_v24, %v4236_v19  ;;  %v1986_v12 = vld [vmem:[%s4101_s30 + $0x1da8] sm:$0xff] }
 0x1ff   : > { %3153 = vmatpush.msrb.mxu0 %v1880_v30  ;;  %3172 = vmatpush.msrb.mxu1 %v1897_v31  ;;  %v1917_v29 = vld [vmem:[%s4101_s30 + $0x1b80] sm:$0xff]  ;;  %v876_v30 = vld.sshfl [vmem:[#allocation1 + $0x28] sm:$0xff pattern:$0x73625140]  ;;  %v1967_v20 = vld [vmem:[%s4101_s30 + $0x1d10] sm:$0xff] }
 0x200   : > { %3193 = vmatpush.msrb.mxu2 %v1912_v32  ;;  %3212 = vmatpush.msrb.mxu3 %v1929_v33  ;;  %v878_v31 = vld.sshfl [vmem:[#allocation1 + $0x38] sm:$0xff pattern:$0x73625140]  ;;  %v1947_v32 = vld [vmem:[%s4101_s30 + $0x1c70] sm:$0xff]  ;;  %v1969_v11 = vld [vmem:[%s4101_s30 + $0x1d20] sm:$0xff] }
 0x201   : > { %3154 = vmatpush.msrb.mxu0 %v1879_v34  ;;  %3173 = vmatpush.msrb.mxu1 %v1896_v35  ;;  %v1964_v33 = vld [vmem:[%s4101_s30 + $0x1cf8] sm:$0xff]  ;;  %v1979_v34 = vld [vmem:[%s4101_s30 + $0x1d70] sm:$0xff]  ;;  %v1953_v14 = vld [vmem:[%s4101_s30 + $0x1ca0] sm:$0xff] }
 0x202   : > { %3194 = vmatpush.msrb.mxu2 %v1911_v36  ;;  %3213 = vmatpush.msrb.mxu3 %v1928_v37  ;;  %v1996_v35 = vld [vmem:[%s4101_s30 + $0x1df8] sm:$0xff]  ;;  %v1946_v36 = vld [vmem:[%s4101_s30 + $0x1c68] sm:$0xff]  ;;  %v1963_v37 = vld [vmem:[%s4101_s30 + $0x1cf0] sm:$0xff] }
 0x203   : > { %3155 = vmatpush.msrb.mxu0 %v1878_v38  ;;  %3174 = vmatpush.msrb.mxu1 %v1895_v39  ;;  %v1978_v38 = vld [vmem:[%s4101_s30 + $0x1d68] sm:$0xff]  ;;  %v1995_v39 = vld [vmem:[%s4101_s30 + $0x1df0] sm:$0xff]  ;;  %v1984_v21 = vld [vmem:[%s4101_s30 + $0x1d98] sm:$0xff] }
 0x204   : > { %3195 = vmatpush.msrb.mxu2 %v1910_v40  ;;  %3214 = vmatpush.msrb.mxu3 %v1927_v41  ;;  %v1945_v40 = vld [vmem:[%s4101_s30 + $0x1c60] sm:$0xff]  ;;  %v1962_v41 = vld [vmem:[%s4101_s30 + $0x1ce8] sm:$0xff] }
 0x205   : > { %3156 = vmatpush.msrb.mxu0 %v1877_v42  ;;  %3175 = vmatpush.msrb.mxu1 %v1894_v43  ;;  %v1977_v42 = vld [vmem:[%s4101_s30 + $0x1d60] sm:$0xff]  ;;  %v1994_v43 = vld [vmem:[%s4101_s30 + $0x1de8] sm:$0xff] }
 0x206   : > { %3196 = vmatpush.msrb.mxu2 %v1909_v44  ;;  %3215 = vmatpush.msrb.mxu3 %v1926_v45  ;;  %v1944_v44 = vld [vmem:[%s4101_s30 + $0x1c58] sm:$0xff]  ;;  %v1961_v45 = vld [vmem:[%s4101_s30 + $0x1ce0] sm:$0xff]  ;;  %v1934_v22 = vld [vmem:[%s4101_s30 + $0x1c08] sm:$0xff] }
 0x207   : > { %3157 = vmatpush.msrb.mxu0 %v1876_v46  ;;  %3176 = vmatpush.msrb.mxu1 %v1893_v47  ;;  %v1976_v46 = vld [vmem:[%s4101_s30 + $0x1d58] sm:$0xff]  ;;  %v1993_v47 = vld [vmem:[%s4101_s30 + $0x1de0] sm:$0xff]  ;;  %v1966_v24 = vld [vmem:[%s4101_s30 + $0x1d08] sm:$0xff] }
 0x208   : > { %3197 = vmatpush.msrb.mxu2 %v1908_v48  ;;  %3216 = vmatpush.msrb.mxu3 %v1925_v49  ;;  %v1943_v48 = vld [vmem:[%s4101_s30 + $0x1c50] sm:$0xff]  ;;  %v1960_v49 = vld [vmem:[%s4101_s30 + $0x1cd8] sm:$0xff] }
 0x209   : > { %3158 = vmatpush.msrb.mxu0 %v1875_v50  ;;  %3177 = vmatpush.msrb.mxu1 %v1892_v51  ;;  %v1975_v50 = vld [vmem:[%s4101_s30 + $0x1d50] sm:$0xff]  ;;  %v1992_v51 = vld [vmem:[%s4101_s30 + $0x1dd8] sm:$0xff] }
 0x20a   : > { %3198 = vmatpush.msrb.mxu2 %v1907_v52  ;;  %3217 = vmatpush.msrb.mxu3 %v1924_v53  ;;  %v1942_v52 = vld [vmem:[%s4101_s30 + $0x1c48] sm:$0xff]  ;;  %v1959_v53 = vld [vmem:[%s4101_s30 + $0x1cd0] sm:$0xff] }
 0x20b   : > { %3159 = vmatpush.msrb.mxu0 %v1874_v54  ;;  %3178 = vmatpush.msrb.mxu1 %v1891_v55  ;;  %v1974_v54 = vld [vmem:[%s4101_s30 + $0x1d48] sm:$0xff]  ;;  %v1991_v55 = vld [vmem:[%s4101_s30 + $0x1dd0] sm:$0xff] }
 0x20c   : > { %3199 = vmatpush.msrb.mxu2 %v1906_v56  ;;  %3218 = vmatpush.msrb.mxu3 %v1923_v57  ;;  %v1941_v56 = vld [vmem:[%s4101_s30 + $0x1c40] sm:$0xff]  ;;  %v1958_v57 = vld [vmem:[%s4101_s30 + $0x1cc8] sm:$0xff] }
 0x20d   : > { %3160 = vmatpush.msrb.mxu0 %v1873_v58  ;;  %3179 = vmatpush.msrb.mxu1 %v1890_v59  ;;  %v1973_v58 = vld [vmem:[%s4101_s30 + $0x1d40] sm:$0xff]  ;;  %v1990_v59 = vld [vmem:[%s4101_s30 + $0x1dc8] sm:$0xff] }
 0x20e   : > { %3200 = vmatpush.msrb.mxu2 %v1905_v60  ;;  %3219 = vmatpush.msrb.mxu3 %v1922_v61  ;;  %v1940_v60 = vld [vmem:[%s4101_s30 + $0x1c38] sm:$0xff]  ;;  %v1957_v61 = vld [vmem:[%s4101_s30 + $0x1cc0] sm:$0xff] }
 0x20f   : > { %3161 = vmatpush.msrb.mxu0 %v1872_v62  ;;  %3180 = vmatpush.msrb.mxu1 %v1889_v63  ;;  %v1972_v62 = vld [vmem:[%s4101_s30 + $0x1d38] sm:$0xff]  ;;  %v1989_v63 = vld [vmem:[%s4101_s30 + $0x1dc0] sm:$0xff] }
 0x210   : > { %3201 = vmatpush.msrb.mxu2 %v1904_v0  ;;  %3220 = vmatpush.msrb.mxu3 %v1921_v1  ;;  %v1939_v0 = vld [vmem:[%s4101_s30 + $0x1c30] sm:$0xff]  ;;  %v1956_v1 = vld [vmem:[%s4101_s30 + $0x1cb8] sm:$0xff] }
 0x211   : > { %3162 = vmatpush.msrb.mxu0 %v1871_v2  ;;  %3181 = vmatpush.msrb.mxu1 %v1888_v3  ;;  %v1971_v2 = vld [vmem:[%s4101_s30 + $0x1d30] sm:$0xff]  ;;  %v1988_v3 = vld [vmem:[%s4101_s30 + $0x1db8] sm:$0xff] }
 0x212   : > { %3202 = vmatpush.msrb.mxu2 %v1903_v4  ;;  %3221 = vmatpush.msrb.mxu3 %v1920_v5  ;;  %v1938_v4 = vld [vmem:[%s4101_s30 + $0x1c28] sm:$0xff]  ;;  %v1955_v5 = vld [vmem:[%s4101_s30 + $0x1cb0] sm:$0xff] }
 0x213   : > { %3163 = vmatpush.msrb.mxu0 %v1870_v6  ;;  %3182 = vmatpush.msrb.mxu1 %v1887_v8  ;;  %v1970_v6 = vld [vmem:[%s4101_s30 + $0x1d28] sm:$0xff]  ;;  %v1987_v8 = vld [vmem:[%s4101_s30 + $0x1db0] sm:$0xff] }
 0x214   : > { %3203 = vmatpush.msrb.mxu2 %v1902_v9  ;;  %3222 = vmatpush.msrb.mxu3 %v1919_v10  ;;  %v1937_v9 = vld [vmem:[%s4101_s30 + $0x1c20] sm:$0xff]  ;;  %v1954_v10 = vld [vmem:[%s4101_s30 + $0x1ca8] sm:$0xff] }
 0x215   : > { %3164 = vmatpush.msrb.mxu0 %v1869_v15  ;;  %3183 = vmatpush.msrb.mxu1 %v1886_v16  ;;  %v1968_v15 = vld [vmem:[%s4101_s30 + $0x1d18] sm:$0xff]  ;;  %v1985_v16 = vld [vmem:[%s4101_s30 + $0x1da0] sm:$0xff] }
 0x216   : > { %3204 = vmatpush.msrb.mxu2 %v1901_v17  ;;  %3223 = vmatpush.msrb.mxu3 %v1918_v18  ;;  %v1935_v17 = vld [vmem:[%s4101_s30 + $0x1c10] sm:$0xff]  ;;  %v1952_v18 = vld [vmem:[%s4101_s30 + $0x1c98] sm:$0xff] }
 0x217   : > { %3704 = vmatmul.msk.f32.vlgmr.msrb.gmra.mxu0 %vm543_vm5, %v875_v23  ;;  %3706 = vmatmul.msk.f32.vlgmr.msrb.gmra.mxu2 %vm545_vm6, %v877_v25  ;;  %v1951_v23 = vld [vmem:[%s4101_s30 + $0x1c90] sm:$0xff] }
 0x218   : > { %3229 = vmatpush.msra.mxu0 %v1948_v26  ;;  %3269 = vmatpush.msra.mxu2 %v1980_v27  ;;  %v1983_v25 = vld [vmem:[%s4101_s30 + $0x1d90] sm:$0xff]  ;;  %v477_v26 = vadd.s32 7168, %v4223_v7  ;;  %v479_v27 = vadd.s32 7424, %v4223_v7 }
 0x219   : > { %3184 = vmatpush.msrb.mxu1 %v1885_v28  ;;  %3224 = vmatpush.msrb.mxu3 %v1917_v29  ;;  %v367_v28 = vld [vmem:[%s4103_s6 + $0x78] sm:$0xff] }
 0x21a   : > { %3705 = vmatmul.msk.f32.vlgmr.msrb.gmra.mxu1 %vm544_vm7, %v876_v30  ;;  %3707 = vmatmul.msk.f32.vlgmr.msrb.gmra.mxu3 %vm546_vm8, %v878_v31  ;;  %v384_v29 = vld [vmem:[%s4103_s6 + $0xfe] sm:$0xff]  ;;  %883 = vst [vmem:[#allocation1 + $0x20] ss:$4 sm:$0xff] %v367_v28  ;;  %vm547_vm9 = vcmp.lt.s32.totalorder %v477_v26, %v4236_v19  ;;  %vm549_vm10 = vcmp.lt.s32.totalorder %v479_v27, %v4236_v19 }
 0x21b   : > { %3230 = vmatpush.msra.mxu0 %v1947_v32  ;;  %3249 = vmatpush.msra.mxu1 %v1964_v33  ;;  %v1933_v30 = vld [vmem:[%s4101_s30 + $0x1c00] sm:$0xff]  ;;  %v1950_v31 = vld [vmem:[%s4101_s30 + $0x1c88] sm:$0xff]  ;;  %884 = vst [vmem:[#allocation1 + $0x21] ss:$4 sm:$0xff] %v384_v29  ;;  %v2003_v28 = vld [vmem:[%s4101_s30 + $0x1e30] sm:$0xff] }
 0x21c   : > { %3270 = vmatpush.msra.mxu2 %v1979_v34  ;;  %3289 = vmatpush.msra.mxu3 %v1996_v35  ;;  %v1965_v32 = vld [vmem:[%s4101_s30 + $0x1d00] sm:$0xff]  ;;  %v1982_v33 = vld [vmem:[%s4101_s30 + $0x1d88] sm:$0xff]  ;;  %v478_v34 = vadd.s32 7296, %v4223_v7  ;;  %v2020_v29 = vld [vmem:[%s4101_s30 + $0x1eb8] sm:$0xff] }
 0x21d   : > { %3231 = vmatpush.msra.mxu0 %v1946_v36  ;;  %3250 = vmatpush.msra.mxu1 %v1963_v37  ;;  %v401_v35 = vld [vmem:[%s4103_s6 + $0x184] sm:$0xff]  ;;  %v887_v37 = vld.sshfl [vmem:[#allocation1] sm:$0xff pattern:$0x73625140] }
 0x21e   : > { %3271 = vmatpush.msra.mxu2 %v1978_v38  ;;  %3290 = vmatpush.msra.mxu3 %v1995_v39  ;;  %v418_v36 = vld [vmem:[%s4103_s6 + $0x20a] sm:$0xff]  ;;  %v480_v38 = vadd.s32 7552, %v4223_v7  ;;  %885 = vst [vmem:[#allocation1 + $0x22] ss:$4 sm:$0xff] %v401_v35  ;;  %v2146_v39 = vpop.f32.mrf.mxu1  ;;  %vm548_vm11 = vcmp.lt.s32.totalorder %v478_v34, %v4236_v19  ;;  %v2034_v35 = vld [vmem:[%s4101_s30 + $0x1f28] sm:$0xff] }
 0x21f   : > { %3232 = vmatpush.msra.mxu0 %v1945_v40  ;;  %3251 = vmatpush.msra.mxu1 %v1962_v41  ;;  %v889_v40 = vld.sshfl [vmem:[#allocation1 + $0x10] sm:$0xff pattern:$0x73625140]  ;;  %886 = vst [vmem:[#allocation1 + $0x23] ss:$4 sm:$0xff] %v418_v36  ;;  %v2012_v41 = vld [vmem:[%s4101_s30 + $0x1e78] sm:$0xff] }
 0x220   : > { %3272 = vmatpush.msra.mxu2 %v1977_v42  ;;  %3291 = vmatpush.msra.mxu3 %v1994_v43  ;;  %v2044_v42 = vld [vmem:[%s4101_s30 + $0x1f78] sm:$0xff]  ;;  %v2126_v43 = vpop.f32.mrf.mxu0  ;;  %vm550_vm12 = vcmp.lt.s32.totalorder %v480_v38, %v4236_v19  ;;  %v2053_v26 = vld [vmem:[%s4101_s30 + $0x1fc0] sm:$0xff]  ;;  %v2051_v36 = vld [vmem:[%s4101_s30 + $0x1fb0] sm:$0xff] }
 0x221   : > { %3233 = vmatpush.msra.mxu0 %v1944_v44  ;;  %3252 = vmatpush.msra.mxu1 %v1961_v45  ;;  %v1949_v44 = vld [vmem:[%s4101_s30 + $0x1c80] sm:$0xff] }
 0x222   : > { %3273 = vmatpush.msra.mxu2 %v1976_v46  ;;  %3292 = vmatpush.msra.mxu3 %v1993_v47  ;;  %v1981_v45 = vld [vmem:[%s4101_s30 + $0x1d80] sm:$0xff]  ;;  %v2147_v46 = vadd.f32 %v2146_v39, %v2126_v43  ;;  %v888_v47 = vld.sshfl [vmem:[#allocation1 + $0x8] sm:$0xff pattern:$0x73625140]  ;;  %v2000_v43 = vld [vmem:[%s4101_s30 + $0x1e18] sm:$0xff] }
 0x223   : > { %3234 = vmatpush.msra.mxu0 %v1943_v48  ;;  %3253 = vmatpush.msra.mxu1 %v1960_v49  ;;  %v890_v48 = vld.sshfl [vmem:[#allocation1 + $0x18] sm:$0xff pattern:$0x73625140]  ;;  %v2166_v49 = vpop.f32.mrf.mxu2  ;;  %v2001_v38 = vld [vmem:[%s4101_s30 + $0x1e20] sm:$0xff]  ;;  %v2018_v39 = vld [vmem:[%s4101_s30 + $0x1ea8] sm:$0xff] }
 0x224   : > { %3274 = vmatpush.msra.mxu2 %v1975_v50  ;;  %3293 = vmatpush.msra.mxu3 %v1992_v51  ;;  %v2011_v50 = vld [vmem:[%s4101_s30 + $0x1e70] sm:$0xff]  ;;  %v2028_v51 = vld [vmem:[%s4101_s30 + $0x1ef8] sm:$0xff] }
 0x225   : > { %3235 = vmatpush.msra.mxu0 %v1942_v52  ;;  %3254 = vmatpush.msra.mxu1 %v1959_v53  ;;  %v2043_v52 = vld [vmem:[%s4101_s30 + $0x1f70] sm:$0xff]  ;;  %v2060_v53 = vld [vmem:[%s4101_s30 + $0x1ff8] sm:$0xff] }
 0x226   : > { %3275 = vmatpush.msra.mxu2 %v1974_v54  ;;  %3294 = vmatpush.msra.mxu3 %v1991_v55  ;;  %v2010_v54 = vld [vmem:[%s4101_s30 + $0x1e68] sm:$0xff]  ;;  %v2027_v55 = vld [vmem:[%s4101_s30 + $0x1ef0] sm:$0xff] }
 0x227   : > { %3236 = vmatpush.msra.mxu0 %v1941_v56  ;;  %3255 = vmatpush.msra.mxu1 %v1958_v57  ;;  %v2167_v56 = vadd.f32 %v2166_v49, %v2147_v46  ;;  %v2042_v57 = vld [vmem:[%s4101_s30 + $0x1f68] sm:$0xff]  ;;  %v2016_v49 = vld [vmem:[%s4101_s30 + $0x1e98] sm:$0xff] }
 0x228   : > { %3276 = vmatpush.msra.mxu2 %v1973_v58  ;;  %3295 = vmatpush.msra.mxu3 %v1990_v59  ;;  %v2059_v58 = vld [vmem:[%s4101_s30 + $0x1ff0] sm:$0xff]  ;;  %v2186_v59 = vpop.f32.mrf.mxu3 }
 0x229   : > { %3237 = vmatpush.msra.mxu0 %v1940_v60  ;;  %3256 = vmatpush.msra.mxu1 %v1957_v61  ;;  %v2009_v60 = vld [vmem:[%s4101_s30 + $0x1e60] sm:$0xff]  ;;  %v2026_v61 = vld [vmem:[%s4101_s30 + $0x1ee8] sm:$0xff] }
 0x22a   : > { %3277 = vmatpush.msra.mxu2 %v1972_v62  ;;  %3296 = vmatpush.msra.mxu3 %v1989_v63  ;;  %v2041_v62 = vld [vmem:[%s4101_s30 + $0x1f60] sm:$0xff]  ;;  %v2058_v63 = vld [vmem:[%s4101_s30 + $0x1fe8] sm:$0xff] }
 0x22b   : > { %3238 = vmatpush.msra.mxu0 %v1939_v0  ;;  %3257 = vmatpush.msra.mxu1 %v1956_v1  ;;  %v2008_v0 = vld [vmem:[%s4101_s30 + $0x1e58] sm:$0xff]  ;;  %v2025_v1 = vld [vmem:[%s4101_s30 + $0x1ee0] sm:$0xff]  ;;  %v2246_v27 = vpop.f32.mrf.mxu2 }
 0x22c   : > { %3278 = vmatpush.msra.mxu2 %v1971_v2  ;;  %3297 = vmatpush.msra.mxu3 %v1988_v3  ;;  %v2187_v2 = vadd.f32 %v2186_v59, %v2167_v56  ;;  %v2040_v3 = vld [vmem:[%s4101_s30 + $0x1f58] sm:$0xff]  ;;  %v2047_v56 = vld [vmem:[%s4101_s30 + $0x1f90] sm:$0xff]  ;;  %v481_v59 = vadd.s32 7680, %v4223_v7 }
 0x22d   : > { %3239 = vmatpush.msra.mxu0 %v1938_v4  ;;  %3258 = vmatpush.msra.mxu1 %v1955_v5  ;;  %v2057_v4 = vld [vmem:[%s4101_s30 + $0x1fe0] sm:$0xff]  ;;  %v2206_v5 = vpop.f32.mrf.mxu0 }
 0x22e   : > { %3279 = vmatpush.msra.mxu2 %v1970_v6  ;;  %3298 = vmatpush.msra.mxu3 %v1987_v8  ;;  %v2007_v6 = vld [vmem:[%s4101_s30 + $0x1e50] sm:$0xff]  ;;  %v2024_v8 = vld [vmem:[%s4101_s30 + $0x1ed8] sm:$0xff]  ;;  %vm551_vm13 = vcmp.lt.s32.totalorder %v481_v59, %v4236_v19 }
 0x22f   : > { %3240 = vmatpush.msra.mxu0 %v1937_v9  ;;  %3259 = vmatpush.msra.mxu1 %v1954_v10  ;;  %v2039_v9 = vld [vmem:[%s4101_s30 + $0x1f50] sm:$0xff]  ;;  %v2056_v10 = vld [vmem:[%s4101_s30 + $0x1fd8] sm:$0xff] }
 0x230   : > { %3280 = vmatpush.msra.mxu2 %v1969_v11  ;;  %3299 = vmatpush.msra.mxu3 %v1986_v12  ;;  %v2006_v11 = vld [vmem:[%s4101_s30 + $0x1e48] sm:$0xff]  ;;  %v2023_v12 = vld [vmem:[%s4101_s30 + $0x1ed0] sm:$0xff] }
 0x231   : > { %3241 = vmatpush.msra.mxu0 %v1936_v13  ;;  %3260 = vmatpush.msra.mxu1 %v1953_v14  ;;  %v2207_v13 = vadd.f32 %v2206_v5, %v2187_v2  ;;  %v2038_v14 = vld [vmem:[%s4101_s30 + $0x1f48] sm:$0xff]  ;;  %v419_v5 = vld [vmem:[%s4103_s6 + $0x212] sm:$0x3f] }
 0x232   : > { %3281 = vmatpush.msra.mxu2 %v1968_v15  ;;  %3300 = vmatpush.msra.mxu3 %v1985_v16  ;;  %v2055_v15 = vld [vmem:[%s4101_s30 + $0x1fd0] sm:$0xff]  ;;  %v2226_v16 = vpop.f32.mrf.mxu1  ;;  %898 = vst [vmem:[#allocation1 + $0x3] ss:$4 sm:$0xff] %v419_v5  ;;  %v2064_v5 = vld [vmem:[%s4101_s30 + $0x2018] sm:$0xff] }
 0x233   : > { %3242 = vmatpush.msra.mxu0 %v1935_v17  ;;  %3261 = vmatpush.msra.mxu1 %v1952_v18  ;;  %v2005_v17 = vld [vmem:[%s4101_s30 + $0x1e40] sm:$0xff]  ;;  %v2022_v18 = vld [vmem:[%s4101_s30 + $0x1ec8] sm:$0xff]  ;;  %v2326_v2 = vpop.f32.mrf.mxu2 }
 0x234   : > { %3282 = vmatpush.msra.mxu2 %v1967_v20  ;;  %3301 = vmatpush.msra.mxu3 %v1984_v21  ;;  %v2037_v20 = vld [vmem:[%s4101_s30 + $0x1f40] sm:$0xff]  ;;  %v2054_v21 = vld [vmem:[%s4101_s30 + $0x1fc8] sm:$0xff] }
 0x235   : > { %3243 = vmatpush.msra.mxu0 %v1934_v22  ;;  %3262 = vmatpush.msra.mxu1 %v1951_v23  ;;  %v2004_v22 = vld [vmem:[%s4101_s30 + $0x1e38] sm:$0xff]  ;;  %v2021_v23 = vld [vmem:[%s4101_s30 + $0x1ec0] sm:$0xff] }
 0x236   : > { %3283 = vmatpush.msra.mxu2 %v1966_v24  ;;  %3302 = vmatpush.msra.mxu3 %v1983_v25  ;;  %v2227_v24 = vadd.f32 %v2226_v16, %v2207_v13  ;;  %v2036_v25 = vld [vmem:[%s4101_s30 + $0x1f38] sm:$0xff]  ;;  %v2045_v16 = vld [vmem:[%s4101_s30 + $0x1f80] sm:$0xff] }
 0x237   : > { %3244 = vmatpush.msra.mxu0 %v1933_v30  ;;  %3263 = vmatpush.msra.mxu1 %v1950_v31  ;;  %v2035_v30 = vld [vmem:[%s4101_s30 + $0x1f30] sm:$0xff]  ;;  %v2052_v31 = vld [vmem:[%s4101_s30 + $0x1fb8] sm:$0xff] }
 0x238   : > { %3284 = vmatpush.msra.mxu2 %v1965_v32  ;;  %3303 = vmatpush.msra.mxu3 %v1982_v33  ;;  %v2002_v32 = vld [vmem:[%s4101_s30 + $0x1e28] sm:$0xff]  ;;  %v2019_v33 = vld [vmem:[%s4101_s30 + $0x1eb0] sm:$0xff]  ;;  %v2247_v34 = vadd.f32 %v2246_v27, %v2227_v24  ;;  %v2108_v13 = vld [vmem:[%s4101_s30 + $0x2178] sm:$0xff] }
 0x239   : > { %3708 = vmatmul.msk.f32.vlgmr.msra.gmra.mxu0 %vm547_vm9, %v887_v37  ;;  %3710 = vmatmul.msk.f32.vlgmr.msra.gmra.mxu2 %vm549_vm10, %v889_v40  ;;  %v2266_v37 = vpop.f32.mrf.mxu3  ;;  %v2033_v40 = vld [vmem:[%s4101_s30 + $0x1f20] sm:$0xff]  ;;  %v2107_v24 = vld [vmem:[%s4101_s30 + $0x2170] sm:$0xff] }
 0x23a   : > { %3309 = vmatpush.msrb.mxu0 %v2012_v41  ;;  %3349 = vmatpush.msrb.mxu2 %v2044_v42  ;;  %v2050_v41 = vld [vmem:[%s4101_s30 + $0x1fa8] sm:$0xff]  ;;  %v2286_v42 = vpop.f32.mrf.mxu0  ;;  %v2267_v46 = vadd.f32 %v2266_v37, %v2247_v34  ;;  %v2072_v34 = vld [vmem:[%s4101_s30 + $0x2058] sm:$0xff] }
 0x23b   : > { %3264 = vmatpush.msra.mxu1 %v1949_v44  ;;  %3304 = vmatpush.msra.mxu3 %v1981_v45  ;;  %v2017_v44 = vld [vmem:[%s4101_s30 + $0x1ea0] sm:$0xff]  ;;  %v2032_v45 = vld [vmem:[%s4101_s30 + $0x1f18] sm:$0xff] }
 0x23c   : > { %3709 = vmatmul.msk.f32.vlgmr.msra.gmra.mxu1 %vm548_vm11, %v888_v47  ;;  %3711 = vmatmul.msk.f32.vlgmr.msra.gmra.mxu3 %vm550_vm12, %v890_v48  ;;  %v2049_v47 = vld [vmem:[%s4101_s30 + $0x1fa0] sm:$0xff]  ;;  %v1999_v48 = vld [vmem:[%s4101_s30 + $0x1e10] sm:$0xff]  ;;  %v2104_v37 = vld [vmem:[%s4101_s30 + $0x2158] sm:$0xff] }
 0x23d   : > { %3310 = vmatpush.msrb.mxu0 %v2011_v50  ;;  %3329 = vmatpush.msrb.mxu1 %v2028_v51  ;;  %v2031_v50 = vld [vmem:[%s4101_s30 + $0x1f10] sm:$0xff]  ;;  %v2048_v51 = vld [vmem:[%s4101_s30 + $0x1f98] sm:$0xff] }
 0x23e   : > { %3350 = vmatpush.msrb.mxu2 %v2043_v52  ;;  %3369 = vmatpush.msrb.mxu3 %v2060_v53  ;;  %v1998_v52 = vld [vmem:[%s4101_s30 + $0x1e08] sm:$0xff]  ;;  %v2287_v53 = vadd.f32 %v2286_v42, %v2267_v46 }
 0x23f   : > { %3311 = vmatpush.msrb.mxu0 %v2010_v54  ;;  %3330 = vmatpush.msrb.mxu1 %v2027_v55  ;;  %v2015_v54 = vld [vmem:[%s4101_s30 + $0x1e90] sm:$0xff]  ;;  %v2030_v55 = vld [vmem:[%s4101_s30 + $0x1f08] sm:$0xff] }
 0x240   : > { %3351 = vmatpush.msrb.mxu2 %v2042_v57  ;;  %3370 = vmatpush.msrb.mxu3 %v2059_v58  ;;  %v2306_v57 = vpop.f32.mrf.mxu1  ;;  %v1997_v58 = vld [vmem:[%s4101_s30 + $0x1e00] sm:$0xff] }
 0x241   : > { %3312 = vmatpush.msrb.mxu0 %v2009_v60  ;;  %3331 = vmatpush.msrb.mxu1 %v2026_v61  ;;  %v483_v60 = vadd.s32 7936, %v4223_v7  ;;  %v368_v61 = vld [vmem:[%s4103_s6 + $0x80] sm:$0x3f] }
 0x242   : > { %3352 = vmatpush.msrb.mxu2 %v2041_v62  ;;  %3371 = vmatpush.msrb.mxu3 %v2058_v63  ;;  %v385_v62 = vld [vmem:[%s4103_s6 + $0x106] sm:$0x3f]  ;;  %895 = vst [vmem:[#allocation1] ss:$4 sm:$0xff] %v368_v61 }
 0x243   : > { %3313 = vmatpush.msrb.mxu0 %v2008_v0  ;;  %3332 = vmatpush.msrb.mxu1 %v2025_v1  ;;  %v2014_v63 = vld [vmem:[%s4101_s30 + $0x1e88] sm:$0xff]  ;;  %v2029_v0 = vld [vmem:[%s4101_s30 + $0x1f00] sm:$0xff]  ;;  %896 = vst [vmem:[#allocation1 + $0x1] ss:$4 sm:$0xff] %v385_v62  ;;  %vm553_vm14 = vcmp.lt.s32.totalorder %v483_v60, %v4236_v19  ;;  %v2083_v61 = vld [vmem:[%s4101_s30 + $0x20b0] sm:$0xff] }
 0x244   : > { %3353 = vmatpush.msrb.mxu2 %v2040_v3  ;;  %3372 = vmatpush.msrb.mxu3 %v2057_v4  ;;  %v402_v1 = vld [vmem:[%s4103_s6 + $0x18c] sm:$0x3f]  ;;  %v2046_v3 = vld [vmem:[%s4101_s30 + $0x1f88] sm:$0xff]  ;;  %v482_v4 = vadd.s32 7808, %v4223_v7 }
 0x245   : > { %3314 = vmatpush.msrb.mxu0 %v2007_v6  ;;  %3333 = vmatpush.msrb.mxu1 %v2024_v8  ;;  %v2307_v6 = vadd.f32 %v2306_v57, %v2287_v53  ;;  %v891_v8 = vld.sshfl [vmem:[#allocation1 + $0x20] sm:$0xff pattern:$0x73625140]  ;;  %897 = vst [vmem:[#allocation1 + $0x2] ss:$4 sm:$0xff] %v402_v1  ;;  %v2084_v57 = vld [vmem:[%s4101_s30 + $0x20b8] sm:$0xff] }
 0x246   : > { %3354 = vmatpush.msrb.mxu2 %v2039_v9  ;;  %3373 = vmatpush.msrb.mxu3 %v2056_v10  ;;  %v484_v9 = vadd.s32 8064, %v4223_v7  ;;  %v893_v10 = vld.sshfl [vmem:[#allocation1 + $0x30] sm:$0xff pattern:$0x73625140]  ;;  %vm552_vm15 = vcmp.lt.s32.totalorder %v482_v4, %v4236_v19  ;;  %v2066_v60 = vld [vmem:[%s4101_s30 + $0x2028] sm:$0xff] }
 0x247   : > { %3315 = vmatpush.msrb.mxu0 %v2006_v11  ;;  %3334 = vmatpush.msrb.mxu1 %v2023_v12  ;;  %v2327_v11 = vadd.f32 %v2326_v2, %v2307_v6  ;;  %v2076_v12 = vld [vmem:[%s4101_s30 + $0x2078] sm:$0xff]  ;;  %v2082_v1 = vld [vmem:[%s4101_s30 + $0x20a8] sm:$0xff]  ;;  %v2081_v6 = vld [vmem:[%s4101_s30 + $0x20a0] sm:$0xff] }
 0x248   : > { %3355 = vmatpush.msrb.mxu2 %v2038_v14  ;;  %3374 = vmatpush.msrb.mxu3 %v2055_v15  ;;  %v2346_v14 = vpop.f32.mrf.mxu3  ;;  %v2013_v15 = vld [vmem:[%s4101_s30 + $0x1e80] sm:$0xff]  ;;  %vm554_vm0 = vcmp.lt.s32.totalorder %v484_v9, %v4236_v19 }
 0x249   : > { %3316 = vmatpush.msrb.mxu0 %v2005_v17  ;;  %3335 = vmatpush.msrb.mxu1 %v2022_v18  ;;  %v892_v17 = vld.sshfl [vmem:[#allocation1 + $0x28] sm:$0xff pattern:$0x73625140]  ;;  %v894_v18 = vld.sshfl [vmem:[#allocation1 + $0x38] sm:$0xff pattern:$0x73625140] }
 0x24a   : > { %3356 = vmatpush.msrb.mxu2 %v2037_v20  ;;  %3375 = vmatpush.msrb.mxu3 %v2054_v21  ;;  %v2366_v20 = vpop.f32.mrf.mxu0  ;;  %v2075_v21 = vld [vmem:[%s4101_s30 + $0x2070] sm:$0xff] }
 0x24b   : > { %3317 = vmatpush.msrb.mxu0 %v2004_v22  ;;  %3336 = vmatpush.msrb.mxu1 %v2021_v23  ;;  %v2092_v22 = vld [vmem:[%s4101_s30 + $0x20f8] sm:$0xff]  ;;  %v2347_v23 = vadd.f32 %v2346_v14, %v2327_v11  ;;  %v485_v14 = vadd.s32 8192, %v4223_v7 }
 0x24c   : > { %3357 = vmatpush.msrb.mxu2 %v2036_v25  ;;  %3376 = vmatpush.msrb.mxu3 %v2053_v26  ;;  %v2074_v25 = vld [vmem:[%s4101_s30 + $0x2068] sm:$0xff]  ;;  %v2091_v26 = vld [vmem:[%s4101_s30 + $0x20f0] sm:$0xff]  ;;  %v2080_v11 = vld [vmem:[%s4101_s30 + $0x2098] sm:$0xff] }
 0x24d   : > { %3318 = vmatpush.msrb.mxu0 %v2003_v28  ;;  %3337 = vmatpush.msrb.mxu1 %v2020_v29  ;;  %v2367_v27 = vadd.f32 %v2366_v20, %v2347_v23  ;;  %v2106_v28 = vld [vmem:[%s4101_s30 + $0x2168] sm:$0xff]  ;;  %v2386_v29 = vpop.f32.mrf.mxu1  ;;  %v2061_v23 = vld [vmem:[%s4101_s30 + $0x2000] sm:$0xff]  ;;  %vm555_vm1 = vcmp.lt.s32.totalorder %v485_v14, %v4236_v19 }
 0x24e   : > { %3358 = vmatpush.msrb.mxu2 %v2035_v30  ;;  %3377 = vmatpush.msrb.mxu3 %v2052_v31  ;;  %v2073_v30 = vld [vmem:[%s4101_s30 + $0x2060] sm:$0xff]  ;;  %v2090_v31 = vld [vmem:[%s4101_s30 + $0x20e8] sm:$0xff] }
 0x24f   : > { %3319 = vmatpush.msrb.mxu0 %v2002_v32  ;;  %3338 = vmatpush.msrb.mxu1 %v2019_v33  ;;  %v2105_v32 = vld [vmem:[%s4101_s30 + $0x2160] sm:$0xff]  ;;  %v2406_v33 = vpop.f32.mrf.mxu2  ;;  %v2094_v20 = vld [vmem:[%s4101_s30 + $0x2108] sm:$0xff] }
 0x250   : > { %3359 = vmatpush.msrb.mxu2 %v2034_v35  ;;  %3378 = vmatpush.msrb.mxu3 %v2051_v36  ;;  %v2089_v35 = vld [vmem:[%s4101_s30 + $0x20e0] sm:$0xff]  ;;  %v2387_v36 = vadd.f32 %v2386_v29, %v2367_v27  ;;  %v2426_v42 = vpop.f32.mrf.mxu3 }
 0x251   : > { %3320 = vmatpush.msrb.mxu0 %v2001_v38  ;;  %3339 = vmatpush.msrb.mxu1 %v2018_v39  ;;  %v2071_v38 = vld [vmem:[%s4101_s30 + $0x2050] sm:$0xff]  ;;  %v2088_v39 = vld [vmem:[%s4101_s30 + $0x20d8] sm:$0xff]  ;;  %v2077_v29 = vld [vmem:[%s4101_s30 + $0x2080] sm:$0xff] }
 0x252   : > { %3360 = vmatpush.msrb.mxu2 %v2033_v40  ;;  %3379 = vmatpush.msrb.mxu3 %v2050_v41  ;;  %v2407_v40 = vadd.f32 %v2406_v33, %v2387_v36  ;;  %v2103_v41 = vld [vmem:[%s4101_s30 + $0x2150] sm:$0xff]  ;;  %v2446_v46 = vpop.f32.mrf.mxu0 }
 0x253   : > { %3321 = vmatpush.msrb.mxu0 %v2000_v43  ;;  %3340 = vmatpush.msrb.mxu1 %v2017_v44  ;;  %v2070_v43 = vld [vmem:[%s4101_s30 + $0x2048] sm:$0xff]  ;;  %v2087_v44 = vld [vmem:[%s4101_s30 + $0x20d0] sm:$0xff] }
 0x254   : > { %3361 = vmatpush.msrb.mxu2 %v2032_v45  ;;  %3380 = vmatpush.msrb.mxu3 %v2049_v47  ;;  %v2102_v45 = vld [vmem:[%s4101_s30 + $0x2148] sm:$0xff]  ;;  %v2069_v47 = vld [vmem:[%s4101_s30 + $0x2040] sm:$0xff] }
 0x255   : > { %3322 = vmatpush.msrb.mxu0 %v1999_v48  ;;  %3341 = vmatpush.msrb.mxu1 %v2016_v49  ;;  %v2086_v48 = vld [vmem:[%s4101_s30 + $0x20c8] sm:$0xff]  ;;  %v2427_v49 = vadd.f32 %v2426_v42, %v2407_v40 }
 0x256   : > { %3362 = vmatpush.msrb.mxu2 %v2031_v50  ;;  %3381 = vmatpush.msrb.mxu3 %v2048_v51  ;;  %v2101_v50 = vld [vmem:[%s4101_s30 + $0x2140] sm:$0xff]  ;;  %v2068_v51 = vld [vmem:[%s4101_s30 + $0x2038] sm:$0xff] }
 0x257   : > { %3323 = vmatpush.msrb.mxu0 %v1998_v52  ;;  %3342 = vmatpush.msrb.mxu1 %v2015_v54  ;;  %v2085_v52 = vld [vmem:[%s4101_s30 + $0x20c0] sm:$0xff]  ;;  %v2447_v53 = vadd.f32 %v2446_v46, %v2427_v49  ;;  %v2100_v54 = vld [vmem:[%s4101_s30 + $0x2138] sm:$0xff]  ;;  %v2486_v59 = vpop.f32.mrf.mxu2 }
 0x258   : > { %3363 = vmatpush.msrb.mxu2 %v2030_v55  ;;  %3382 = vmatpush.msrb.mxu3 %v2047_v56  ;;  %v2466_v55 = vpop.f32.mrf.mxu1  ;;  %v2067_v56 = vld [vmem:[%s4101_s30 + $0x2030] sm:$0xff]  ;;  %v2506_v4 = vpop.f32.mrf.mxu3 }
 0x259   : > { %3324 = vmatpush.msrb.mxu0 %v1997_v58  ;;  %3343 = vmatpush.msrb.mxu1 %v2014_v63  ;;  %v2099_v58 = vld [vmem:[%s4101_s30 + $0x2130] sm:$0xff]  ;;  %v2467_v62 = vadd.f32 %v2466_v55, %v2447_v53  ;;  %v2098_v63 = vld [vmem:[%s4101_s30 + $0x2128] sm:$0xff] }
 0x25a   : > { %3364 = vmatpush.msrb.mxu2 %v2029_v0  ;;  %3383 = vmatpush.msrb.mxu3 %v2046_v3  ;;  %v2065_v0 = vld [vmem:[%s4101_s30 + $0x2020] sm:$0xff]  ;;  %v2526_v9 = vpop.f32.mrf.mxu0 }
 0x25b   : > { %3712 = vmatmul.msk.f32.vlgmr.msrb.gmra.mxu0 %vm551_vm13, %v891_v8  ;;  %3714 = vmatmul.msk.f32.vlgmr.msrb.gmra.mxu2 %vm553_vm14, %v893_v10  ;;  %v2487_v2 = vadd.f32 %v2486_v59, %v2467_v62  ;;  %v2097_v3 = vld [vmem:[%s4101_s30 + $0x2120] sm:$0xff]  ;;  %v2096_v8 = vld [vmem:[%s4101_s30 + $0x2118] sm:$0xff]  ;;  %v2063_v10 = vld [vmem:[%s4101_s30 + $0x2010] sm:$0xff] }
 0x25c   : > { %3389 = vmatpush.msra.mxu0 %v2076_v12  ;;  %3429 = vmatpush.msra.mxu2 %v2108_v13  ;;  %v2095_v13 = vld [vmem:[%s4101_s30 + $0x2110] sm:$0xff] }
 0x25d   : > { %3344 = vmatpush.msrb.mxu1 %v2013_v15  ;;  %3384 = vmatpush.msrb.mxu3 %v2045_v16  ;;  %v2507_v12 = vadd.f32 %v2506_v4, %v2487_v2  ;;  %v2062_v15 = vld [vmem:[%s4101_s30 + $0x2008] sm:$0xff]  ;;  %v2079_v16 = vld [vmem:[%s4101_s30 + $0x2090] sm:$0xff] }
 0x25e   : > { %3713 = vmatmul.msk.f32.vlgmr.msrb.gmra.mxu1 %vm552_vm15, %v892_v17  ;;  %3715 = vmatmul.msk.f32.vlgmr.msrb.gmra.mxu3 %vm554_vm0, %v894_v18  ;;  %v487_v17 = vadd.s32 8448, %v4223_v7 }
 0x25f   : > { %3390 = vmatpush.msra.mxu0 %v2075_v21  ;;  %3409 = vmatpush.msra.mxu1 %v2092_v22  ;;  %v2527_v18 = vadd.f32 %v2526_v9, %v2507_v12  ;;  %v486_v21 = vadd.s32 8320, %v4223_v7  ;;  %v2566_v27 = vpop.f32.mrf.mxu2  ;;  %v900_v7 = vld.sshfl [vmem:[#allocation1 + $0x8] sm:$0xff pattern:$0x73625140] }
 0x260   : > { %3430 = vmatpush.msra.mxu2 %v2107_v24  ;;  %v2546_v22 = vpop.f32.mrf.mxu1  ;;  %v2078_v24 = vld [vmem:[%s4101_s30 + $0x2088] sm:$0xff]  ;;  %vm557_vm2 = vcmp.lt.s32.totalorder %v487_v17, %v4236_v19 }
 0x261   : > { %3391 = vmatpush.msra.mxu0 %v2074_v25  ;;  %3410 = vmatpush.msra.mxu1 %v2091_v26  ;;  %v2093_v25 = vld [vmem:[%s4101_s30 + $0x2100] sm:$0xff]  ;;  %vm556_vm3 = vcmp.lt.s32.totalorder %v486_v21, %v4236_v19 }
 0x262   : > { %3431 = vmatpush.msra.mxu2 %v2106_v28  ;;  %v899_v26 = vld.sshfl [vmem:[#allocation1] sm:$0xff pattern:$0x73625140]  ;;  %v901_v28 = vld.sshfl [vmem:[#allocation1 + $0x10] sm:$0xff pattern:$0x73625140]  ;;  %v2606_v33 = vpop.f32.mrf.mxu0 }
 0x263   : > { %3392 = vmatpush.msra.mxu0 %v2073_v30  ;;  %3411 = vmatpush.msra.mxu1 %v2090_v31  ;;  %v2547_v30 = vadd.f32 %v2546_v22, %v2527_v18 }
 0x264   : > { %3432 = vmatpush.msra.mxu2 %v2105_v32  ;;  %v2586_v32 = vpop.f32.mrf.mxu3 }
 0x265   : > { %3393 = vmatpush.msra.mxu0 %v2072_v34  ;;  %3412 = vmatpush.msra.mxu1 %v2089_v35  ;;  %v2567_v31 = vadd.f32 %v2566_v27, %v2547_v30 }
 0x266   : > { %3433 = vmatpush.msra.mxu2 %v2104_v37 }
 0x267   : > { %3394 = vmatpush.msra.mxu0 %v2071_v38  ;;  %3413 = vmatpush.msra.mxu1 %v2088_v39  ;;  %v2587_v34 = vadd.f32 %v2586_v32, %v2567_v31  ;;  %v2646_v37 = vpop.f32.mrf.mxu2 }
 0x268   : > { %3434 = vmatpush.msra.mxu2 %v2103_v41  ;;  %v2626_v36 = vpop.f32.mrf.mxu1 }
 0x269   : > { %3395 = vmatpush.msra.mxu0 %v2070_v43  ;;  %3414 = vmatpush.msra.mxu1 %v2087_v44  ;;  %v2607_v35 = vadd.f32 %v2606_v33, %v2587_v34 }
 0x26a   : > { %3435 = vmatpush.msra.mxu2 %v2102_v45  ;;  %v2686_v41 = vpop.f32.mrf.mxu0 }
 0x26b   : > { %3396 = vmatpush.msra.mxu0 %v2069_v47  ;;  %3415 = vmatpush.msra.mxu1 %v2086_v48  ;;  %v2627_v38 = vadd.f32 %v2626_v36, %v2607_v35 }
 0x26c   : > { %3436 = vmatpush.msra.mxu2 %v2101_v50  ;;  %v2666_v40 = vpop.f32.mrf.mxu3 }
 0x26d   : > { %3397 = vmatpush.msra.mxu0 %v2068_v51  ;;  %3416 = vmatpush.msra.mxu1 %v2085_v52  ;;  %v2647_v39 = vadd.f32 %v2646_v37, %v2627_v38 }
 0x26e   : > { %3437 = vmatpush.msra.mxu2 %v2100_v54 }
 0x26f   : > { %3398 = vmatpush.msra.mxu0 %v2067_v56  ;;  %3417 = vmatpush.msra.mxu1 %v2084_v57  ;;  %v2667_v42 = vadd.f32 %v2666_v40, %v2647_v39  ;;  %v2726_v44 = vpop.f32.mrf.mxu2 }
 0x270   : > { %3438 = vmatpush.msra.mxu2 %v2099_v58  ;;  %v2706_v19 = vpop.f32.mrf.mxu1 }
 0x271   : > { %3399 = vmatpush.msra.mxu0 %v2066_v60  ;;  %3418 = vmatpush.msra.mxu1 %v2083_v61  ;;  %v2687_v43 = vadd.f32 %v2686_v41, %v2667_v42 }
 0x272   : > { %3439 = vmatpush.msra.mxu2 %v2098_v63  ;;  %v2766_v48 = vpop.f32.mrf.mxu0 }
 0x273   : > { %3400 = vmatpush.msra.mxu0 %v2065_v0  ;;  %3419 = vmatpush.msra.mxu1 %v2082_v1  ;;  %v2707_v45 = vadd.f32 %v2706_v19, %v2687_v43 }
 0x274   : > { %3440 = vmatpush.msra.mxu2 %v2097_v3  ;;  %v2746_v47 = vpop.f32.mrf.mxu3 }
 0x275   : > { %3401 = vmatpush.msra.mxu0 %v2064_v5  ;;  %3420 = vmatpush.msra.mxu1 %v2081_v6  ;;  %v2727_v46 = vadd.f32 %v2726_v44, %v2707_v45 }
 0x276   : > { %3441 = vmatpush.msra.mxu2 %v2096_v8 }
 0x277   : > { %3402 = vmatpush.msra.mxu0 %v2063_v10  ;;  %3421 = vmatpush.msra.mxu1 %v2080_v11  ;;  %v2747_v49 = vadd.f32 %v2746_v47, %v2727_v46  ;;  %v2806_v52 = vpop.f32.mrf.mxu2 }
 0x278   : > { %3442 = vmatpush.msra.mxu2 %v2095_v13  ;;  %v2786_v51 = vpop.f32.mrf.mxu1 }
 0x279   : > { %3403 = vmatpush.msra.mxu0 %v2062_v15  ;;  %3422 = vmatpush.msra.mxu1 %v2079_v16  ;;  %v2767_v50 = vadd.f32 %v2766_v48, %v2747_v49 }
 0x27a   : > { %3443 = vmatpush.msra.mxu2 %v2094_v20  ;;  %v2846_v56 = vpop.f32.mrf.mxu0 }
 0x27b   : > { %3404 = vmatpush.msra.mxu0 %v2061_v23  ;;  %3423 = vmatpush.msra.mxu1 %v2078_v24  ;;  %v2787_v53 = vadd.f32 %v2786_v51, %v2767_v50 }
 0x27c   : > { %3444 = vmatpush.msra.mxu2 %v2093_v25  ;;  %3716 = vmatmul.msk.f32.vlgmr.msra.gmra.mxu0 %vm555_vm1, %v899_v26  ;;  %v2826_v55 = vpop.f32.mrf.mxu3 }
 0x27d   : > { %3718 = vmatmul.msk.f32.vlgmr.msra.gmra.mxu2 %vm557_vm2, %v901_v28  ;;  %3424 = vmatpush.msra.mxu1 %v2077_v29  ;;  %v2807_v54 = vadd.f32 %v2806_v52, %v2787_v53  ;;  %v1036_v53 = vld [vmem:[#allocation2] sm:$0xff] }
 0x27e   : > { %3717 = vmatmul.msk.f32.vlgmr.msra.gmra.mxu1 %vm556_vm3, %v900_v7 }
 0x27f   : > { %v2827_v57 = vadd.f32 %v2826_v55, %v2807_v54  ;;  %v2886_v60 = vpop.f32.mrf.mxu2 }
 0x280   : > { %v2866_v59 = vpop.f32.mrf.mxu1 }
 0x281   : > { %v2847_v58 = vadd.f32 %v2846_v56, %v2827_v57 }
 0x282   : > { %v2926_v0 = vpop.f32.mrf.mxu0 }
 0x283   : > { %v2867_v61 = vadd.f32 %v2866_v59, %v2847_v58 }
 0x284   : > { %v2906_v63 = vpop.f32.mrf.mxu3 }
 0x285   : > { %v2887_v62 = vadd.f32 %v2886_v60, %v2867_v61 }
 0x287   : > { %v2907_v1 = vadd.f32 %v2906_v63, %v2887_v62  ;;  %v2966_v4 = vpop.f32.mrf.mxu2 }
 0x288   : > { %v2946_v3 = vpop.f32.mrf.mxu1 }
 0x289   : > { %v2927_v2 = vadd.f32 %v2926_v0, %v2907_v1 }
 0x28a   : > { %v3006_v9 = vpop.f32.mrf.mxu0 }
 0x28b   : > { %v2947_v5 = vadd.f32 %v2946_v3, %v2927_v2 }
 0x28c   : > { %v2986_v8 = vpop.f32.mrf.mxu3 }
 0x28d   : > { %v2967_v6 = vadd.f32 %v2966_v4, %v2947_v5 }
 0x28f   : > { %v2987_v10 = vadd.f32 %v2986_v8, %v2967_v6  ;;  %v3046_v13 = vpop.f32.mrf.mxu2 }
 0x290   : > { %v3026_v12 = vpop.f32.mrf.mxu1 }
 0x291   : > { %v3007_v11 = vadd.f32 %v3006_v9, %v2987_v10 }
 0x292   : > { %v3086_v17 = vpop.f32.mrf.mxu0 }
 0x293   : > { %v3027_v14 = vadd.f32 %v3026_v12, %v3007_v11 }
 0x294   : > { %v3066_v16 = vpop.f32.mrf.mxu3 }
 0x295   : > { %v3047_v15 = vadd.f32 %v3046_v13, %v3027_v14 }
 0x297   : > { %v3067_v18 = vadd.f32 %v3066_v16, %v3047_v15  ;;  %v3126_v22 = vpop.f32.mrf.mxu2 }
 0x298   : > { %v3106_v21 = vpop.f32.mrf.mxu1 }
 0x299   : > { %v3087_v20 = vadd.f32 %v3086_v17, %v3067_v18 }
 0x29a   : > { %v3166_v26 = vpop.f32.mrf.mxu0 }
 0x29b   : > { %v3107_v23 = vadd.f32 %v3106_v21, %v3087_v20 }
 0x29c   : > { %v3146_v25 = vpop.f32.mrf.mxu3 }
 0x29d   : > { %v3127_v24 = vadd.f32 %v3126_v22, %v3107_v23 }
 0x29f   : > { %v3147_v27 = vadd.f32 %v3146_v25, %v3127_v24  ;;  %v3206_v30 = vpop.f32.mrf.mxu2 }
 0x2a0   : > { %v3186_v29 = vpop.f32.mrf.mxu1 }
 0x2a1   : > { %v3167_v28 = vadd.f32 %v3166_v26, %v3147_v27 }
 0x2a3   : > { %v3187_v7 = vadd.f32 %v3186_v29, %v3167_v28 }
 0x2a4   : > { %v3226_v32 = vpop.f32.mrf.mxu3 }
 0x2a5   : > { %v3207_v31 = vadd.f32 %v3206_v30, %v3187_v7 }
 0x2a7   : > { %v3227_v34 = vadd.f32 %v3226_v32, %v3207_v31 }
 0x2b6   : > { %v3246_v33 = vpop.f32.mrf.mxu0 }
 0x2b7   : > { %v3247_v35 = vadd.f32 %v3246_v33, %v3227_v34 }
 0x2b9   : > { %v3266_v36 = vpop.f32.mrf.mxu1 }
 0x2ba   : > { %v3267_v38 = vadd.f32 %v3266_v36, %v3247_v35 }
 0x2bc   : > { %v3286_v37 = vpop.f32.mrf.mxu2 }
 0x2bd   : > { %v3287_v39 = vadd.f32 %v3286_v37, %v3267_v38 }
 0x2bf   : > { %v3306_v40 = vpop.f32.mrf.mxu3 }
 0x2c0   : > { %v3307_v42 = vadd.f32 %v3306_v40, %v3287_v39 }
 0x2d8   : > { %v3326_v41 = vpop.f32.mrf.mxu0 }
 0x2d9   : > { %v3327_v43 = vadd.f32 %v3326_v41, %v3307_v42 }
 0x2db   : > { %v3346_v19 = vpop.f32.mrf.mxu1 }
 0x2dc   : > { %v3347_v45 = vadd.f32 %v3346_v19, %v3327_v43 }
 0x2de   : > { %v3366_v44 = vpop.f32.mrf.mxu2 }
 0x2df   : > { %v3367_v46 = vadd.f32 %v3366_v44, %v3347_v45 }
 0x2e1   : > { %v3386_v47 = vpop.f32.mrf.mxu3 }
 0x2e2   : > { %v3387_v48 = vadd.f32 %v3386_v47, %v3367_v46 }
 0x2f9   : > { %v3406_v49 = vpop.f32.mrf.mxu0 }
 0x2fa   : > { %v3407_v50 = vadd.f32 %v3406_v49, %v3387_v48 }
 0x2fb   : > { %v3426_v51 = vpop.f32.mrf.mxu1 }
 0x2fc   : > { %v3427_v52 = vadd.f32 %v3426_v51, %v3407_v50 }
 0x300   : > { %v3446_v54 = vpop.f32.mrf.mxu2 }
 0x301   : > { %v3447_v55 = vadd.f32 %v3446_v54, %v3427_v52  ;;  %3455 = sbr.rel (%p3719_p13) target bundleno = 1178 (0x49a), region = 74 }
 0x303   : > { %v3449_v56 = vadd.f32 %v3447_v55, %v1036_v53 }
 0x305   : > { %3451 = vst.msk [vmem:[#allocation2] sm:$0xff] %vm3450_vm4, %v3449_v56 }
 0x306   : > { %v3463_v57 = vld [vmem:[%s5427_s3] sm:$0x1f]  ;;  %vm3471_vm5 = vcmask 1044480   ;;  %vm3495_vm6 = vcmask 23552  }
 0x307   : > { %3720 = vmatpush.msk.msra.mxu0 %vm3471_vm5, %v3463_v57  ;;  %v3840_v59 = vld [vmem:[%s5426_s2] ss:$0 sm:$0xff] }
 0x308   : > { %v3841_v62 = vld [vmem:[%s5428_s4] ss:$0 sm:$0xff] }
 0x30c   : > { %v3456_v58 = vld [vmem:[#allocation2] sm:$0xff] }
 0x30d   : > { %v3461_v60 = vadd.f32 %v3840_v59, %v3456_v58 }
 0x30f   : > { %v3462_v61 = vmax.f32 %v3461_v60, 0.0 }
 0x311   : > { %3721 = vmatmul.msk.f32.vlgmr.msra.gmra.mxu0 %vm3450_vm4, %v3462_v61 }
 0x38e   : > { %v3492_v63 = vpop.f32.mrf.mxu0 }
 0x38f   : > { %v3493_v0 = vadd.f32 %v3841_v62, %v3492_v63 }
 0x391   : > { %v3496_v1 = vsel %vm3495_vm6, %v3493_v0, -inf }
 0x392   : > { %3497 = vmax.xlane.f32.xlu0 %v3496_v1 }
 0x405   : > { %v3498_v2 = vpop.xlane.xlu0 %3497 }
 0x406   : > { %v3499_v3 = vsub.f32 %v3493_v0, %v3498_v2 }
 0x408   : > { %v3500_v4 = vmul.f32 1.442695, %v3499_v3 }
 0x40a   : > { %3842 = vpow2.f32 %v3500_v4 }
 0x410   : > { %v3843_v5 = vpop.eup %3842 }
 0x411   : > { %v3502_v6 = vsel %vm3495_vm6, %v3843_v5, 0.0 }
 0x412   : > { %3503 = vadd.xlane.f32.xlu0 %v3502_v6 }
 0x485   : > { %v3504_v8 = vpop.xlane.xlu0 %3503 }
 0x486   : > { %3844 = vrcp.f32 %v3504_v8  ;;  %v3516_v12 = vand.u32 2147483648, %v3504_v8  ;;  %v3514_v14 = vand.u32 2147483647, %v3504_v8  ;;  %vm3510_vm8 = vweird.f32 %v3504_v8 }
 0x488   : > { %v3517_v16 = vor.u32 1.1754944e-38, %v3516_v12  ;;  %vm3515_vm10 = vcmp.eq.f32.partialorder %v3514_v14, 8.507059e+37 }
 0x48c   : > { %v3845_v9 = vpop.eup %3844 }
 0x48d   : > { %v3506_v10 = vmul.f32 %v3845_v9, %v3504_v8  ;;  %vm3511_vm7 = vweird.f32 %v3845_v9 }
 0x48e   : > { %vm3512_vm9 = vmor %vm3510_vm8, %vm3511_vm7 }
 0x48f   : > { %v3507_v11 = vsub.f32 1.0, %v3506_v10 }
 0x491   : > { %v3508_v13 = vmul.f32 %v3845_v9, %v3507_v11 }
 0x493   : > { %v3509_v15 = vadd.f32 %v3845_v9, %v3508_v13 }
 0x495   : > { %v3513_v17 = vsel %vm3512_vm9, %v3845_v9, %v3509_v15 }
 0x496   : > { %v3518_v18 = vsel %vm3515_vm10, %v3517_v16, %v3513_v17 }
 0x497   : > { %v3519_v20 = vmul.f32 %v3843_v5, %v3518_v18 }
 0x499   : > { %3520 = vst.msk [vmem:[#allocation4] sm:$0xff] %vm3495_vm6, %v3519_v20 }
 0x49a PF: > { %p3722_p0 = scmp.ne.s32.totalorder %s3645_s23, 6 }
 0x49c   : > { %3523 = sbr.rel (%p3722_p0) target bundleno = 1189 (0x4a5), region = 78 }
 0x4a1   : > { %3529 = vsyncadd [#allocation5], 96  ;;  %s3536_s15 = sshll.u32 %s5429_s5, 4  ;;  %s3963_s16 = smov [#allocation4]   ;;  %s3537_s15 = int_to_ptr.hbm [resolvable:$true] %s3536_s15 }
 0x4a2   : > { %s3534_s17 = sshll.u32 %s3963_s16, 4  ;;  %s3964_s25 = smov 32   ;;  %s3535_s17 = int_to_ptr.vmem [resolvable:$true] %s3534_s17 }
 0x4a3   : > { %s3965_s26 = smov 2  }
 0x4a4   : > { %3542 = dma.vmem_to_hbm [thread:$0]  %s3535_s17, 32, %s3537_s15, [#allocation5], %s3964_s25, %s3964_s25, %s3965_s26  }
 0x4a5 PF: > { %p3731_p1 = scmp.eq.s32.totalorder %s3645_s23, 6 }
 0x4a7   : > { %3923 = dma.done.wait (%p3731_p1), [#allocation5], 128  }
 0x4a8   : > { %3925 = vsyncadd (%p3731_p1), [#allocation5], 4294967168 }
 0x4a9 PF: > { %s16_s22 = sadd.s32 1, %s3944_s22   ;;  %s5430_s18 = smov %s3932_s19 }
 0x4aa   : > { %p13_p2 = scmp.ge.s32.totalorder %s16_s22, 9   ;;  %s5431_s19 = smov %s4032_s27 }
 0x4ab   : > { %s5432_s20 = smov %s3940_s21  ;;  %s5433_s21 = smov %s5435_s24 }
 0x4ac   :  { %15 = sbr.rel (!%p13_p2) target bundleno = 3 (0x3), region = 141 }
 0x4b1   :  { %3553 = vsyncpa [#allocation5], 1 }
 0x4b2   :  { %3555 = vsyncpa [#allocation5 + $0x1], 1 }

</bundles_post_ra>
